<compile_context>
chip_gen: v7x
topology: tpu7x:2x2x1
jax: 0.10.0
libtpu: 0.0.40
codegen_flags: <defaults>
</compile_context>

<pallas_src>
import math
import numpy as np
import jax
import jax.numpy as jnp
from jax import lax
from jax.experimental import pallas as pl
from jax.experimental.pallas import tpu as pltpu

# ---------------------------------------------------------------------------
# Problem sizes consistent with the module's constraints (out_channels
# divisible by 8 for GroupNorm and by 16 for the attention reduction;
# in_channels == out_channels so the residual branch triggers).
# ---------------------------------------------------------------------------
B = 2
CIN = 32
COUT = 32
H = 16
W = 16
NK = 6                 # num_kernels -> conv kernel sizes 1,3,5,7,9,11
KK = 2 * NK - 1        # max kernel size (11)
PAD = NK - 1           # max "same" padding (5)
GROUPS = 8
GSIZE = COUT // GROUPS
CR = COUT // 16        # channel-attention hidden width (=2)
HW = H * W
KTOT = KK * KK * CIN   # 3872 rows of the shared im2col slab
MROWS = NK * COUT      # 192 output rows of the fused branch matmul
BN_EPS = 1e-5
GN_EPS = 1e-5
NEG_SLOPE = 0.2

# Ring-ordered tap list: branch i uses exactly the first (2i+1)^2 taps.
TAPS = []
for _r in range(NK):
    for _dy in range(KK):
        for _dx in range(KK):
            if max(abs(_dy - PAD), abs(_dx - PAD)) == _r:
                TAPS.append((_dy, _dx))
assert len(TAPS) == KK * KK


# ---------------------------------------------------------------------------
# Pallas kernel: grid = (batch,).  One fused matmul, then a static 6-iteration
# Python loop over 32-row slices for bias / LeakyReLU / GroupNorm.
# ---------------------------------------------------------------------------
def inception_kernel(p_ref, x_ref, w_ref, bias_ref, gng_ref, gnb_ref,
                     g_ref, fc1_ref, fc2_ref, out_ref):
    # All 6 inception branches in one MXU matmul:
    #   (NK*COUT, KTOT) @ (KTOT, HW) -> (NK*COUT, HW), bf16 in, f32 accumulate.
    yall = jnp.dot(w_ref[...], p_ref[0], preferred_element_type=jnp.float32)

    acc = jnp.zeros((COUT, HW), jnp.float32)
    for i in range(NK):
        # Branch i = rows [i*COUT, (i+1)*COUT) of the fused result.
        y = yall[i * COUT:(i + 1) * COUT, :] + bias_ref[i]   # (COUT, HW)

        # LeakyReLU(0.2)
        y = jnp.where(y > 0, y, NEG_SLOPE * y)

        # GroupNorm(8 groups): lane reduction first (XLU), then a tiny
        # (COUT,COUT)@(COUT,1) group-average matmul (mathematically identical
        # to averaging the full tile, but off the MXU critical path).
        sum_y = jnp.sum(y, axis=1, keepdims=True)            # (COUT, 1)
        mean_c = jnp.dot(g_ref[...], sum_y,
                         preferred_element_type=jnp.float32)  # (COUT, 1)
        cen = y - mean_c
        var_c = jnp.dot(g_ref[...],
                        jnp.sum(cen * cen, axis=1, keepdims=True),
                        preferred_element_type=jnp.float32)   # (COUT, 1)
        acc = acc + cen * lax.rsqrt(var_c + GN_EPS)

    # Mean over branches + GroupNorm affine (1/NK folded into gamma).
    res = acc * gng_ref[...] + gnb_ref[...]                   # (COUT, HW)

    # ---- ChannelAttention: avg & max pool -> one fused 2-column MLP pass ----
    avg = jnp.mean(res, axis=1, keepdims=True)                # (COUT, 1)
    mx = jnp.max(res, axis=1, keepdims=True)                  # (COUT, 1)
    pooled = jnp.concatenate([avg, mx], axis=1)               # (COUT, 2)
    hid = jnp.maximum(
        jnp.dot(fc1_ref[...], pooled, preferred_element_type=jnp.float32),
        0.0)                                                  # (CR, 2)
    o = jnp.dot(fc2_ref[...], hid, preferred_element_type=jnp.float32)
    att = jax.nn.sigmoid(o[:, 0:1] + o[:, 1:2])               # (COUT, 1)
    res = res * att

    # Dropout / Dropout2d: identity in eval mode.
    # Residual (x.shape == res.shape since CIN == COUT), kept in f32.
    res = res + x_ref[0]
    out_ref[0] = res.astype(out_ref.dtype)


# ---------------------------------------------------------------------------
# Parameter construction (deterministic, mirrors the PyTorch __init__ shapes)
# ---------------------------------------------------------------------------
def build_params(key):
    keys = jax.random.split(key, NK + 2)
    conv_w = []
    for i in range(NK):
        ksz = 2 * i + 1
        fan_out = COUT * ksz * ksz
        gain = math.sqrt(2.0 / (1.0 + NEG_SLOPE ** 2))   # kaiming, leaky_relu
        std = gain / math.sqrt(fan_out)
        conv_w.append(std * jax.random.normal(keys[i], (COUT, CIN, ksz, ksz),
                                              jnp.float32))
    conv_b = jnp.zeros((NK, COUT), jnp.float32)          # init.constant_(0)

    # BatchNorm2d eval: running_mean=0, running_var=1, gamma=1, beta=0
    bn_scale = jnp.full((NK, COUT), 1.0 / math.sqrt(1.0 + BN_EPS), jnp.float32)
    bn_shift = jnp.zeros((NK, COUT), jnp.float32)

    gn_gamma = jnp.ones((COUT,), jnp.float32)
    gn_beta = jnp.zeros((COUT,), jnp.float32)

    # ChannelAttention fc (bias=False), PyTorch Linear weight is (out, in)
    b1 = 1.0 / math.sqrt(COUT)
    w1 = jax.random.uniform(keys[NK], (CR, COUT), jnp.float32, -b1, b1)
    b2 = 1.0 / math.sqrt(CR)
    w2 = jax.random.uniform(keys[NK + 1], (COUT, CR), jnp.float32, -b2, b2)
    return dict(conv_w=conv_w, conv_b=conv_b, bn_scale=bn_scale,
                bn_shift=bn_shift, gn_gamma=gn_gamma, gn_beta=gn_beta,
                fc1=w1.T, fc2=w2.T)   # fc1: (COUT, CR), fc2: (CR, COUT)


# ---------------------------------------------------------------------------
# One-time host-side packing (hoisted out of the per-call path)
# ---------------------------------------------------------------------------
def pack_fused_weights(conv_w, bn_scale):
    """All 6 branches concatenated along output channels into one
    (NK*COUT, KTOT) matrix in shared ring-tap order; taps outside a branch's
    kernel stay zero.  BN scale folded in, cast to bf16 for the MXU."""
    wp = np.zeros((MROWS, KTOT), np.float32)
    for i in range(NK):
        ksz = 2 * i + 1
        nt = ksz * ksz
        w = np.asarray(conv_w[i])                        # (COUT, CIN, k, k)
        s = np.asarray(bn_scale[i])[:, None]
        for t in range(nt):
            dy, dx = TAPS[t]
            a = dy - (PAD - i)
            b = dx - (PAD - i)
            wp[i * COUT:(i + 1) * COUT, t * CIN:(t + 1) * CIN] = \
                w[:, :, a, b] * s
    return jnp.asarray(wp, jnp.bfloat16)


def group_avg_matrix():
    g = np.zeros((COUT, COUT), np.float32)
    for c1 in range(COUT):
        for c2 in range(COUT):
            if c1 // GSIZE == c2 // GSIZE:
                g[c1, c2] = 1.0 / (HW * GSIZE)
    return jnp.asarray(g)


def prepare_params(params):
    """Call once; returns packed device arrays reused by every forward."""
    w_fused = pack_fused_weights(params["conv_w"], params["bn_scale"])
    bias = jnp.asarray(params["conv_b"] * params["bn_scale"]
                       + params["bn_shift"]).reshape(NK, COUT, 1)
    gng = (params["gn_gamma"] / NK).reshape(COUT, 1)     # fold 1/NK branch mean
    gnb = params["gn_beta"].reshape(COUT, 1)
    gmat = group_avg_matrix()
    fc1 = jnp.asarray(params["fc1"]).T                   # (CR, COUT)
    fc2 = jnp.asarray(params["fc2"]).T                   # (COUT, CR)
    return dict(w=w_fused, bias=bias, gng=gng, gnb=gnb, g=gmat,
                fc1=fc1, fc2=fc2)


# ---------------------------------------------------------------------------
# Jitted wrapper
# ---------------------------------------------------------------------------
def _im2col_nchw(x_bf16):
    """Ring-ordered im2col slab built directly in NCHW layout:
    (B, 121*CIN, HW) bf16.  bf16 before padding; no transposes."""
    xp = jnp.pad(x_bf16, ((0, 0), (0, 0), (PAD, PAD), (PAD, PAD)))
    cols = [xp[:, :, dy:dy + H, dx:dx + W].reshape(B, CIN, HW)
            for dy, dx in TAPS]
    return jnp.concatenate(cols, axis=1)                 # (B, KTOT, HW)


@jax.jit
def inception_block_forward(x_nchw, packed):
    x_f32 = x_nchw.astype(jnp.float32)
    p = _im2col_nchw(x_nchw.astype(jnp.bfloat16))        # (B, KTOT, HW) bf16
    x_res = x_f32.reshape(B, CIN, HW)                    # residual, f32

    def const(shape):
        return pl.BlockSpec(shape, lambda b: (0,) * len(shape))

    # VMEM note (v7x guard): the slab block is KTOT*HW*2 B (~2 MB here) and is
    # double-buffered.  If H/W/CIN grow such that 2 buffers approach ~32 MB,
    # split KTOT with an extra "arbitrary" grid axis (accumulate pre-LeakyReLU
    # partial sums in a VMEM f32 scratch) and set vmem_limit_bytes explicitly.
    out_flat = pl.pallas_call(
        inception_kernel,
        out_shape=jax.ShapeDtypeStruct((B, COUT, HW), jnp.float32),
        grid_spec=pltpu.PrefetchScalarGridSpec(
            num_scalar_prefetch=0,
            grid=(B,),
            in_specs=[
                pl.BlockSpec((1, KTOT, HW), lambda b: (b, 0, 0)),   # im2col
                pl.BlockSpec((1, COUT, HW), lambda b: (b, 0, 0)),   # residual
                const((MROWS, KTOT)),                               # fused W
                const((NK, COUT, 1)),                               # bias
                const((COUT, 1)),                                   # gn gamma/NK
                const((COUT, 1)),                                   # gn beta
                const((COUT, COUT)),                                # group mat
                const((CR, COUT)),                                  # fc1
                const((COUT, CR)),                                  # fc2
            ],
            out_specs=pl.BlockSpec((1, COUT, HW), lambda b: (b, 0, 0)),
        ),
        compiler_params=pltpu.CompilerParams(
            dimension_semantics=("parallel",)),
        cost_estimate=pl.CostEstimate(
            flops=2 * B * MROWS * KTOT * HW,
            transcendentals=B * (NK * COUT + 2 * COUT),
            bytes_accessed=(B * KTOT * HW * 2 + MROWS * KTOT * 2
                            + 2 * B * COUT * HW * 4),
        ),
    )(p, x_res, packed["w"], packed["bias"], packed["gng"], packed["gnb"],
      packed["g"], packed["fc1"], packed["fc2"])

    return out_flat.reshape(B, COUT, H, W)               # NCHW directly


# ---------------------------------------------------------------------------
# Pure-JAX reference (eval-mode semantics of the PyTorch module)
# ---------------------------------------------------------------------------
def reference_forward(x_nchw, params):
    x = x_nchw.astype(jnp.float32)
    outs = []
    for i in range(NK):
        w = params["conv_w"][i]
        y = lax.conv_general_dilated(
            x, w, window_strides=(1, 1), padding=((i, i), (i, i)),
            dimension_numbers=("NCHW", "OIHW", "NCHW"))
        y = y + params["conv_b"][i][None, :, None, None]
        y = (y * params["bn_scale"][i][None, :, None, None]
             + params["bn_shift"][i][None, :, None, None])
        y = jnp.where(y > 0, y, NEG_SLOPE * y)
        yg = y.reshape(B, GROUPS, GSIZE, H, W)
        m = yg.mean(axis=(2, 3, 4), keepdims=True)
        v = yg.var(axis=(2, 3, 4), keepdims=True)
        yg = (yg - m) / jnp.sqrt(v + GN_EPS)
        y = yg.reshape(B, COUT, H, W)
        y = (y * params["gn_gamma"][None, :, None, None]
             + params["gn_beta"][None, :, None, None])
        outs.append(y)
    res = jnp.stack(outs, axis=-1).mean(axis=-1)

    avg = res.mean(axis=(2, 3))
    mx = res.max(axis=(2, 3))

    def mlp(v):
        return jnp.maximum(v @ params["fc1"], 0.0) @ params["fc2"]

    att = jax.nn.sigmoid(mlp(avg) + mlp(mx))
    res = res * att[:, :, None, None]
    # Dropout / Dropout2d: identity in eval mode
    return res + x


if __name__ == "__main__":
    key = jax.random.PRNGKey(0)
    pkey, xkey = jax.random.split(key)
    params = build_params(pkey)
    packed = prepare_params(params)           # one-time packing, cached on device
    x = jax.random.normal(xkey, (B, CIN, H, W), jnp.float32)   # NCHW input

    out = jax.block_until_ready(inception_block_forward(x, packed))
    ref = jax.block_until_ready(reference_forward(x, params))

    np.testing.assert_allclose(np.asarray(out), np.asarray(ref),
                               rtol=5e-2, atol=5e-2)
    print("KERNEL_OK")
</pallas_src>

<mosaic_0001>
module attributes {stable_mosaic.version = 11 : i64} {
  func.func @inception_kernel(%arg0: i32, %arg1: memref<1x3872x256xbf16, #tpu.memory_space<vmem>>, %arg2: memref<1x32x256xf32, #tpu.memory_space<vmem>>, %arg3: memref<192x3872xbf16, #tpu.memory_space<vmem>>, %arg4: memref<6x32x1xf32, #tpu.memory_space<vmem>>, %arg5: memref<32x1xf32, #tpu.memory_space<vmem>>, %arg6: memref<32x1xf32, #tpu.memory_space<vmem>>, %arg7: memref<32x32xf32, #tpu.memory_space<vmem>>, %arg8: memref<2x32xf32, #tpu.memory_space<vmem>>, %arg9: memref<32x2xf32, #tpu.memory_space<vmem>>, %arg10: memref<1x32x256xf32, #tpu.memory_space<vmem>>) attributes {dimension_semantics = [#tpu.dimension_semantics<parallel>], iteration_bounds = array<i64: 2>, scalar_prefetch = 0 : i64, scratch_operands = 0 : i64, tpu.core_type = #tpu.core_type<tc>, window_params = [{transform_indices = @transform_0, window_bounds = array<i64: 1, 3872, 256>}, {transform_indices = @transform_1, window_bounds = array<i64: 1, 32, 256>}, {pipeline_mode = #tpu.pipeline_mode<synchronous>, transform_indices = @transform_2, window_bounds = array<i64: 192, 3872>}, {pipeline_mode = #tpu.pipeline_mode<synchronous>, transform_indices = @transform_3, window_bounds = array<i64: 6, 32, 1>}, {pipeline_mode = #tpu.pipeline_mode<synchronous>, transform_indices = @transform_4, window_bounds = array<i64: 32, 1>}, {pipeline_mode = #tpu.pipeline_mode<synchronous>, transform_indices = @transform_5, window_bounds = array<i64: 32, 1>}, {pipeline_mode = #tpu.pipeline_mode<synchronous>, transform_indices = @transform_6, window_bounds = array<i64: 32, 32>}, {pipeline_mode = #tpu.pipeline_mode<synchronous>, transform_indices = @transform_7, window_bounds = array<i64: 2, 32>}, {pipeline_mode = #tpu.pipeline_mode<synchronous>, transform_indices = @transform_8, window_bounds = array<i64: 32, 2>}, {transform_indices = @transform_9, window_bounds = array<i64: 1, 32, 256>}]} {
    %c0 = arith.constant 0 : index
    %c0_0 = arith.constant 0 : index
    %0 = vector.load %arg3[%c0, %c0_0] : memref<192x3872xbf16, #tpu.memory_space<vmem>>, vector<192x3872xbf16>
    %c0_1 = arith.constant 0 : index
    %c0_2 = arith.constant 0 : index
    %c0_3 = arith.constant 0 : index
    %1 = vector.load %arg1[%c0_1, %c0_2, %c0_3] : memref<1x3872x256xbf16, #tpu.memory_space<vmem>>, vector<1x3872x256xbf16>
    %2 = vector.shape_cast %1 : vector<1x3872x256xbf16> to vector<3872x256xbf16>
    %cst = arith.constant dense<0.000000e+00> : vector<192x256xf32>
    %3 = tpu.matmul %0, %2, %cst {dimension_numbers = #tpu.dot_dimension_numbers<[1], [0], [0], [1], [0, 0, 1, 1], [], []>} : vector<192x3872xbf16>, vector<3872x256xbf16>, vector<192x256xf32> -> vector<192x256xf32>
    %cst_4 = arith.constant 0.000000e+00 : f32
    %4 = vector.broadcast %cst_4 : f32 to vector<32x256xf32>
    %5 = vector.extract_strided_slice %3 {offsets = [0, 0], sizes = [32, 256], strides = [1, 1]} : vector<192x256xf32> to vector<32x256xf32>
    %c0_5 = arith.constant 0 : index
    %c0_6 = arith.constant 0 : index
    %c0_7 = arith.constant 0 : index
    %6 = vector.load %arg4[%c0_5, %c0_6, %c0_7] : memref<6x32x1xf32, #tpu.memory_space<vmem>>, vector<1x32x1xf32>
    %7 = vector.shape_cast %6 : vector<1x32x1xf32> to vector<32x1xf32>
    %8 = vector.broadcast %7 : vector<32x1xf32> to vector<32x256xf32>
    %9 = arith.addf %5, %8 : vector<32x256xf32>
    %cst_8 = arith.constant 0.000000e+00 : f32
    %10 = vector.broadcast %cst_8 : f32 to vector<32x256xf32>
    %11 = arith.cmpf ogt, %9, %10 : vector<32x256xf32>
    %cst_9 = arith.constant 2.000000e-01 : f32
    %12 = vector.broadcast %cst_9 : f32 to vector<32x256xf32>
    %13 = arith.mulf %12, %9 : vector<32x256xf32>
    %14 = arith.select %11, %9, %13 : vector<32x256xi1>, vector<32x256xf32>
    %cst_10 = arith.constant dense<0.000000e+00> : vector<32xf32>
    %15 = vector.multi_reduction <add>, %14, %cst_10 [1] : vector<32x256xf32> to vector<32xf32>
    %16 = vector.shape_cast %15 : vector<32xf32> to vector<32x1xf32>
    %c0_11 = arith.constant 0 : index
    %c0_12 = arith.constant 0 : index
    %17 = vector.load %arg7[%c0_11, %c0_12] : memref<32x32xf32, #tpu.memory_space<vmem>>, vector<32x32xf32>
    %cst_13 = arith.constant dense<0.000000e+00> : vector<32x1xf32>
    %18 = tpu.matmul %17, %16, %cst_13 {dimension_numbers = #tpu.dot_dimension_numbers<[1], [0], [0], [1], [0, 0, 1, 1], [], []>} : vector<32x32xf32>, vector<32x1xf32>, vector<32x1xf32> -> vector<32x1xf32>
    %19 = vector.broadcast %18 : vector<32x1xf32> to vector<32x256xf32>
    %20 = arith.subf %14, %19 : vector<32x256xf32>
    %c0_14 = arith.constant 0 : index
    %c0_15 = arith.constant 0 : index
    %21 = vector.load %arg7[%c0_14, %c0_15] : memref<32x32xf32, #tpu.memory_space<vmem>>, vector<32x32xf32>
    %22 = arith.mulf %20, %20 : vector<32x256xf32>
    %cst_16 = arith.constant dense<0.000000e+00> : vector<32xf32>
    %23 = vector.multi_reduction <add>, %22, %cst_16 [1] : vector<32x256xf32> to vector<32xf32>
    %24 = vector.shape_cast %23 : vector<32xf32> to vector<32x1xf32>
    %cst_17 = arith.constant dense<0.000000e+00> : vector<32x1xf32>
    %25 = tpu.matmul %21, %24, %cst_17 {dimension_numbers = #tpu.dot_dimension_numbers<[1], [0], [0], [1], [0, 0, 1, 1], [], []>} : vector<32x32xf32>, vector<32x1xf32>, vector<32x1xf32> -> vector<32x1xf32>
    %cst_18 = arith.constant 9.99999974E-6 : f32
    %26 = vector.broadcast %cst_18 : f32 to vector<32x1xf32>
    %27 = arith.addf %25, %26 : vector<32x1xf32>
    %28 = math.rsqrt %27 : vector<32x1xf32>
    %29 = vector.broadcast %28 : vector<32x1xf32> to vector<32x256xf32>
    %30 = arith.mulf %20, %29 : vector<32x256xf32>
    %31 = arith.addf %4, %30 : vector<32x256xf32>
    %32 = vector.extract_strided_slice %3 {offsets = [32, 0], sizes = [32, 256], strides = [1, 1]} : vector<192x256xf32> to vector<32x256xf32>
    %c1 = arith.constant 1 : index
    %c0_19 = arith.constant 0 : index
    %c0_20 = arith.constant 0 : index
    %33 = vector.load %arg4[%c1, %c0_19, %c0_20] : memref<6x32x1xf32, #tpu.memory_space<vmem>>, vector<1x32x1xf32>
    %34 = vector.shape_cast %33 : vector<1x32x1xf32> to vector<32x1xf32>
    %35 = vector.broadcast %34 : vector<32x1xf32> to vector<32x256xf32>
    %36 = arith.addf %32, %35 : vector<32x256xf32>
    %cst_21 = arith.constant 0.000000e+00 : f32
    %37 = vector.broadcast %cst_21 : f32 to vector<32x256xf32>
    %38 = arith.cmpf ogt, %36, %37 : vector<32x256xf32>
    %cst_22 = arith.constant 2.000000e-01 : f32
    %39 = vector.broadcast %cst_22 : f32 to vector<32x256xf32>
    %40 = arith.mulf %39, %36 : vector<32x256xf32>
    %41 = arith.select %38, %36, %40 : vector<32x256xi1>, vector<32x256xf32>
    %cst_23 = arith.constant dense<0.000000e+00> : vector<32xf32>
    %42 = vector.multi_reduction <add>, %41, %cst_23 [1] : vector<32x256xf32> to vector<32xf32>
    %43 = vector.shape_cast %42 : vector<32xf32> to vector<32x1xf32>
    %c0_24 = arith.constant 0 : index
    %c0_25 = arith.constant 0 : index
    %44 = vector.load %arg7[%c0_24, %c0_25] : memref<32x32xf32, #tpu.memory_space<vmem>>, vector<32x32xf32>
    %cst_26 = arith.constant dense<0.000000e+00> : vector<32x1xf32>
    %45 = tpu.matmul %44, %43, %cst_26 {dimension_numbers = #tpu.dot_dimension_numbers<[1], [0], [0], [1], [0, 0, 1, 1], [], []>} : vector<32x32xf32>, vector<32x1xf32>, vector<32x1xf32> -> vector<32x1xf32>
    %46 = vector.broadcast %45 : vector<32x1xf32> to vector<32x256xf32>
    %47 = arith.subf %41, %46 : vector<32x256xf32>
    %c0_27 = arith.constant 0 : index
    %c0_28 = arith.constant 0 : index
    %48 = vector.load %arg7[%c0_27, %c0_28] : memref<32x32xf32, #tpu.memory_space<vmem>>, vector<32x32xf32>
    %49 = arith.mulf %47, %47 : vector<32x256xf32>
    %cst_29 = arith.constant dense<0.000000e+00> : vector<32xf32>
    %50 = vector.multi_reduction <add>, %49, %cst_29 [1] : vector<32x256xf32> to vector<32xf32>
    %51 = vector.shape_cast %50 : vector<32xf32> to vector<32x1xf32>
    %cst_30 = arith.constant dense<0.000000e+00> : vector<32x1xf32>
    %52 = tpu.matmul %48, %51, %cst_30 {dimension_numbers = #tpu.dot_dimension_numbers<[1], [0], [0], [1], [0, 0, 1, 1], [], []>} : vector<32x32xf32>, vector<32x1xf32>, vector<32x1xf32> -> vector<32x1xf32>
    %cst_31 = arith.constant 9.99999974E-6 : f32
    %53 = vector.broadcast %cst_31 : f32 to vector<32x1xf32>
    %54 = arith.addf %52, %53 : vector<32x1xf32>
    %55 = math.rsqrt %54 : vector<32x1xf32>
    %56 = vector.broadcast %55 : vector<32x1xf32> to vector<32x256xf32>
    %57 = arith.mulf %47, %56 : vector<32x256xf32>
    %58 = arith.addf %31, %57 : vector<32x256xf32>
    %59 = vector.extract_strided_slice %3 {offsets = [64, 0], sizes = [32, 256], strides = [1, 1]} : vector<192x256xf32> to vector<32x256xf32>
    %c2 = arith.constant 2 : index
    %c0_32 = arith.constant 0 : index
    %c0_33 = arith.constant 0 : index
    %60 = vector.load %arg4[%c2, %c0_32, %c0_33] : memref<6x32x1xf32, #tpu.memory_space<vmem>>, vector<1x32x1xf32>
    %61 = vector.shape_cast %60 : vector<1x32x1xf32> to vector<32x1xf32>
    %62 = vector.broadcast %61 : vector<32x1xf32> to vector<32x256xf32>
    %63 = arith.addf %59, %62 : vector<32x256xf32>
    %cst_34 = arith.constant 0.000000e+00 : f32
    %64 = vector.broadcast %cst_34 : f32 to vector<32x256xf32>
    %65 = arith.cmpf ogt, %63, %64 : vector<32x256xf32>
    %cst_35 = arith.constant 2.000000e-01 : f32
    %66 = vector.broadcast %cst_35 : f32 to vector<32x256xf32>
    %67 = arith.mulf %66, %63 : vector<32x256xf32>
    %68 = arith.select %65, %63, %67 : vector<32x256xi1>, vector<32x256xf32>
    %cst_36 = arith.constant dense<0.000000e+00> : vector<32xf32>
    %69 = vector.multi_reduction <add>, %68, %cst_36 [1] : vector<32x256xf32> to vector<32xf32>
    %70 = vector.shape_cast %69 : vector<32xf32> to vector<32x1xf32>
    %c0_37 = arith.constant 0 : index
    %c0_38 = arith.constant 0 : index
    %71 = vector.load %arg7[%c0_37, %c0_38] : memref<32x32xf32, #tpu.memory_space<vmem>>, vector<32x32xf32>
    %cst_39 = arith.constant dense<0.000000e+00> : vector<32x1xf32>
    %72 = tpu.matmul %71, %70, %cst_39 {dimension_numbers = #tpu.dot_dimension_numbers<[1], [0], [0], [1], [0, 0, 1, 1], [], []>} : vector<32x32xf32>, vector<32x1xf32>, vector<32x1xf32> -> vector<32x1xf32>
    %73 = vector.broadcast %72 : vector<32x1xf32> to vector<32x256xf32>
    %74 = arith.subf %68, %73 : vector<32x256xf32>
    %c0_40 = arith.constant 0 : index
    %c0_41 = arith.constant 0 : index
    %75 = vector.load %arg7[%c0_40, %c0_41] : memref<32x32xf32, #tpu.memory_space<vmem>>, vector<32x32xf32>
    %76 = arith.mulf %74, %74 : vector<32x256xf32>
    %cst_42 = arith.constant dense<0.000000e+00> : vector<32xf32>
    %77 = vector.multi_reduction <add>, %76, %cst_42 [1] : vector<32x256xf32> to vector<32xf32>
    %78 = vector.shape_cast %77 : vector<32xf32> to vector<32x1xf32>
    %cst_43 = arith.constant dense<0.000000e+00> : vector<32x1xf32>
    %79 = tpu.matmul %75, %78, %cst_43 {dimension_numbers = #tpu.dot_dimension_numbers<[1], [0], [0], [1], [0, 0, 1, 1], [], []>} : vector<32x32xf32>, vector<32x1xf32>, vector<32x1xf32> -> vector<32x1xf32>
    %cst_44 = arith.constant 9.99999974E-6 : f32
    %80 = vector.broadcast %cst_44 : f32 to vector<32x1xf32>
    %81 = arith.addf %79, %80 : vector<32x1xf32>
    %82 = math.rsqrt %81 : vector<32x1xf32>
    %83 = vector.broadcast %82 : vector<32x1xf32> to vector<32x256xf32>
    %84 = arith.mulf %74, %83 : vector<32x256xf32>
    %85 = arith.addf %58, %84 : vector<32x256xf32>
    %86 = vector.extract_strided_slice %3 {offsets = [96, 0], sizes = [32, 256], strides = [1, 1]} : vector<192x256xf32> to vector<32x256xf32>
    %c3 = arith.constant 3 : index
    %c0_45 = arith.constant 0 : index
    %c0_46 = arith.constant 0 : index
    %87 = vector.load %arg4[%c3, %c0_45, %c0_46] : memref<6x32x1xf32, #tpu.memory_space<vmem>>, vector<1x32x1xf32>
    %88 = vector.shape_cast %87 : vector<1x32x1xf32> to vector<32x1xf32>
    %89 = vector.broadcast %88 : vector<32x1xf32> to vector<32x256xf32>
    %90 = arith.addf %86, %89 : vector<32x256xf32>
    %cst_47 = arith.constant 0.000000e+00 : f32
    %91 = vector.broadcast %cst_47 : f32 to vector<32x256xf32>
    %92 = arith.cmpf ogt, %90, %91 : vector<32x256xf32>
    %cst_48 = arith.constant 2.000000e-01 : f32
    %93 = vector.broadcast %cst_48 : f32 to vector<32x256xf32>
    %94 = arith.mulf %93, %90 : vector<32x256xf32>
    %95 = arith.select %92, %90, %94 : vector<32x256xi1>, vector<32x256xf32>
    %cst_49 = arith.constant dense<0.000000e+00> : vector<32xf32>
    %96 = vector.multi_reduction <add>, %95, %cst_49 [1] : vector<32x256xf32> to vector<32xf32>
    %97 = vector.shape_cast %96 : vector<32xf32> to vector<32x1xf32>
    %c0_50 = arith.constant 0 : index
    %c0_51 = arith.constant 0 : index
    %98 = vector.load %arg7[%c0_50, %c0_51] : memref<32x32xf32, #tpu.memory_space<vmem>>, vector<32x32xf32>
    %cst_52 = arith.constant dense<0.000000e+00> : vector<32x1xf32>
    %99 = tpu.matmul %98, %97, %cst_52 {dimension_numbers = #tpu.dot_dimension_numbers<[1], [0], [0], [1], [0, 0, 1, 1], [], []>} : vector<32x32xf32>, vector<32x1xf32>, vector<32x1xf32> -> vector<32x1xf32>
    %100 = vector.broadcast %99 : vector<32x1xf32> to vector<32x256xf32>
    %101 = arith.subf %95, %100 : vector<32x256xf32>
    %c0_53 = arith.constant 0 : index
    %c0_54 = arith.constant 0 : index
    %102 = vector.load %arg7[%c0_53, %c0_54] : memref<32x32xf32, #tpu.memory_space<vmem>>, vector<32x32xf32>
    %103 = arith.mulf %101, %101 : vector<32x256xf32>
    %cst_55 = arith.constant dense<0.000000e+00> : vector<32xf32>
    %104 = vector.multi_reduction <add>, %103, %cst_55 [1] : vector<32x256xf32> to vector<32xf32>
    %105 = vector.shape_cast %104 : vector<32xf32> to vector<32x1xf32>
    %cst_56 = arith.constant dense<0.000000e+00> : vector<32x1xf32>
    %106 = tpu.matmul %102, %105, %cst_56 {dimension_numbers = #tpu.dot_dimension_numbers<[1], [0], [0], [1], [0, 0, 1, 1], [], []>} : vector<32x32xf32>, vector<32x1xf32>, vector<32x1xf32> -> vector<32x1xf32>
    %cst_57 = arith.constant 9.99999974E-6 : f32
    %107 = vector.broadcast %cst_57 : f32 to vector<32x1xf32>
    %108 = arith.addf %106, %107 : vector<32x1xf32>
    %109 = math.rsqrt %108 : vector<32x1xf32>
    %110 = vector.broadcast %109 : vector<32x1xf32> to vector<32x256xf32>
    %111 = arith.mulf %101, %110 : vector<32x256xf32>
    %112 = arith.addf %85, %111 : vector<32x256xf32>
    %113 = vector.extract_strided_slice %3 {offsets = [128, 0], sizes = [32, 256], strides = [1, 1]} : vector<192x256xf32> to vector<32x256xf32>
    %c4 = arith.constant 4 : index
    %c0_58 = arith.constant 0 : index
    %c0_59 = arith.constant 0 : index
    %114 = vector.load %arg4[%c4, %c0_58, %c0_59] : memref<6x32x1xf32, #tpu.memory_space<vmem>>, vector<1x32x1xf32>
    %115 = vector.shape_cast %114 : vector<1x32x1xf32> to vector<32x1xf32>
    %116 = vector.broadcast %115 : vector<32x1xf32> to vector<32x256xf32>
    %117 = arith.addf %113, %116 : vector<32x256xf32>
    %cst_60 = arith.constant 0.000000e+00 : f32
    %118 = vector.broadcast %cst_60 : f32 to vector<32x256xf32>
    %119 = arith.cmpf ogt, %117, %118 : vector<32x256xf32>
    %cst_61 = arith.constant 2.000000e-01 : f32
    %120 = vector.broadcast %cst_61 : f32 to vector<32x256xf32>
    %121 = arith.mulf %120, %117 : vector<32x256xf32>
    %122 = arith.select %119, %117, %121 : vector<32x256xi1>, vector<32x256xf32>
    %cst_62 = arith.constant dense<0.000000e+00> : vector<32xf32>
    %123 = vector.multi_reduction <add>, %122, %cst_62 [1] : vector<32x256xf32> to vector<32xf32>
    %124 = vector.shape_cast %123 : vector<32xf32> to vector<32x1xf32>
    %c0_63 = arith.constant 0 : index
    %c0_64 = arith.constant 0 : index
    %125 = vector.load %arg7[%c0_63, %c0_64] : memref<32x32xf32, #tpu.memory_space<vmem>>, vector<32x32xf32>
    %cst_65 = arith.constant dense<0.000000e+00> : vector<32x1xf32>
    %126 = tpu.matmul %125, %124, %cst_65 {dimension_numbers = #tpu.dot_dimension_numbers<[1], [0], [0], [1], [0, 0, 1, 1], [], []>} : vector<32x32xf32>, vector<32x1xf32>, vector<32x1xf32> -> vector<32x1xf32>
    %127 = vector.broadcast %126 : vector<32x1xf32> to vector<32x256xf32>
    %128 = arith.subf %122, %127 : vector<32x256xf32>
    %c0_66 = arith.constant 0 : index
    %c0_67 = arith.constant 0 : index
    %129 = vector.load %arg7[%c0_66, %c0_67] : memref<32x32xf32, #tpu.memory_space<vmem>>, vector<32x32xf32>
    %130 = arith.mulf %128, %128 : vector<32x256xf32>
    %cst_68 = arith.constant dense<0.000000e+00> : vector<32xf32>
    %131 = vector.multi_reduction <add>, %130, %cst_68 [1] : vector<32x256xf32> to vector<32xf32>
    %132 = vector.shape_cast %131 : vector<32xf32> to vector<32x1xf32>
    %cst_69 = arith.constant dense<0.000000e+00> : vector<32x1xf32>
    %133 = tpu.matmul %129, %132, %cst_69 {dimension_numbers = #tpu.dot_dimension_numbers<[1], [0], [0], [1], [0, 0, 1, 1], [], []>} : vector<32x32xf32>, vector<32x1xf32>, vector<32x1xf32> -> vector<32x1xf32>
    %cst_70 = arith.constant 9.99999974E-6 : f32
    %134 = vector.broadcast %cst_70 : f32 to vector<32x1xf32>
    %135 = arith.addf %133, %134 : vector<32x1xf32>
    %136 = math.rsqrt %135 : vector<32x1xf32>
    %137 = vector.broadcast %136 : vector<32x1xf32> to vector<32x256xf32>
    %138 = arith.mulf %128, %137 : vector<32x256xf32>
    %139 = arith.addf %112, %138 : vector<32x256xf32>
    %140 = vector.extract_strided_slice %3 {offsets = [160, 0], sizes = [32, 256], strides = [1, 1]} : vector<192x256xf32> to vector<32x256xf32>
    %c5 = arith.constant 5 : index
    %c0_71 = arith.constant 0 : index
    %c0_72 = arith.constant 0 : index
    %141 = vector.load %arg4[%c5, %c0_71, %c0_72] : memref<6x32x1xf32, #tpu.memory_space<vmem>>, vector<1x32x1xf32>
    %142 = vector.shape_cast %141 : vector<1x32x1xf32> to vector<32x1xf32>
    %143 = vector.broadcast %142 : vector<32x1xf32> to vector<32x256xf32>
    %144 = arith.addf %140, %143 : vector<32x256xf32>
    %cst_73 = arith.constant 0.000000e+00 : f32
    %145 = vector.broadcast %cst_73 : f32 to vector<32x256xf32>
    %146 = arith.cmpf ogt, %144, %145 : vector<32x256xf32>
    %cst_74 = arith.constant 2.000000e-01 : f32
    %147 = vector.broadcast %cst_74 : f32 to vector<32x256xf32>
    %148 = arith.mulf %147, %144 : vector<32x256xf32>
    %149 = arith.select %146, %144, %148 : vector<32x256xi1>, vector<32x256xf32>
    %cst_75 = arith.constant dense<0.000000e+00> : vector<32xf32>
    %150 = vector.multi_reduction <add>, %149, %cst_75 [1] : vector<32x256xf32> to vector<32xf32>
    %151 = vector.shape_cast %150 : vector<32xf32> to vector<32x1xf32>
    %c0_76 = arith.constant 0 : index
    %c0_77 = arith.constant 0 : index
    %152 = vector.load %arg7[%c0_76, %c0_77] : memref<32x32xf32, #tpu.memory_space<vmem>>, vector<32x32xf32>
    %cst_78 = arith.constant dense<0.000000e+00> : vector<32x1xf32>
    %153 = tpu.matmul %152, %151, %cst_78 {dimension_numbers = #tpu.dot_dimension_numbers<[1], [0], [0], [1], [0, 0, 1, 1], [], []>} : vector<32x32xf32>, vector<32x1xf32>, vector<32x1xf32> -> vector<32x1xf32>
    %154 = vector.broadcast %153 : vector<32x1xf32> to vector<32x256xf32>
    %155 = arith.subf %149, %154 : vector<32x256xf32>
    %c0_79 = arith.constant 0 : index
    %c0_80 = arith.constant 0 : index
    %156 = vector.load %arg7[%c0_79, %c0_80] : memref<32x32xf32, #tpu.memory_space<vmem>>, vector<32x32xf32>
    %157 = arith.mulf %155, %155 : vector<32x256xf32>
    %cst_81 = arith.constant dense<0.000000e+00> : vector<32xf32>
    %158 = vector.multi_reduction <add>, %157, %cst_81 [1] : vector<32x256xf32> to vector<32xf32>
    %159 = vector.shape_cast %158 : vector<32xf32> to vector<32x1xf32>
    %cst_82 = arith.constant dense<0.000000e+00> : vector<32x1xf32>
    %160 = tpu.matmul %156, %159, %cst_82 {dimension_numbers = #tpu.dot_dimension_numbers<[1], [0], [0], [1], [0, 0, 1, 1], [], []>} : vector<32x32xf32>, vector<32x1xf32>, vector<32x1xf32> -> vector<32x1xf32>
    %cst_83 = arith.constant 9.99999974E-6 : f32
    %161 = vector.broadcast %cst_83 : f32 to vector<32x1xf32>
    %162 = arith.addf %160, %161 : vector<32x1xf32>
    %163 = math.rsqrt %162 : vector<32x1xf32>
    %164 = vector.broadcast %163 : vector<32x1xf32> to vector<32x256xf32>
    %165 = arith.mulf %155, %164 : vector<32x256xf32>
    %166 = arith.addf %139, %165 : vector<32x256xf32>
    %c0_84 = arith.constant 0 : index
    %c0_85 = arith.constant 0 : index
    %167 = vector.load %arg5[%c0_84, %c0_85] : memref<32x1xf32, #tpu.memory_space<vmem>>, vector<32x1xf32>
    %168 = vector.broadcast %167 : vector<32x1xf32> to vector<32x256xf32>
    %169 = arith.mulf %166, %168 : vector<32x256xf32>
    %c0_86 = arith.constant 0 : index
    %c0_87 = arith.constant 0 : index
    %170 = vector.load %arg6[%c0_86, %c0_87] : memref<32x1xf32, #tpu.memory_space<vmem>>, vector<32x1xf32>
    %171 = vector.broadcast %170 : vector<32x1xf32> to vector<32x256xf32>
    %172 = arith.addf %169, %171 : vector<32x256xf32>
    %cst_88 = arith.constant dense<0.000000e+00> : vector<32xf32>
    %173 = vector.multi_reduction <add>, %172, %cst_88 [1] : vector<32x256xf32> to vector<32xf32>
    %174 = vector.shape_cast %173 : vector<32xf32> to vector<32x1xf32>
    %cst_89 = arith.constant 2.560000e+02 : f32
    %175 = vector.broadcast %cst_89 : f32 to vector<32x1xf32>
    %176 = arith.divf %174, %175 : vector<32x1xf32>
    %cst_90 = arith.constant dense<0xFF800000> : vector<32xf32>
    %177 = vector.multi_reduction <maximumf>, %172, %cst_90 [1] : vector<32x256xf32> to vector<32xf32>
    %178 = vector.shape_cast %177 : vector<32xf32> to vector<32x1xf32>
    %179 = tpu.concatenate %176, %178 in 1 : vector<32x1xf32>, vector<32x1xf32> -> vector<32x2xf32>
    %c0_91 = arith.constant 0 : index
    %c0_92 = arith.constant 0 : index
    %180 = vector.load %arg8[%c0_91, %c0_92] : memref<2x32xf32, #tpu.memory_space<vmem>>, vector<2x32xf32>
    %cst_93 = arith.constant dense<0.000000e+00> : vector<2x2xf32>
    %181 = tpu.matmul %180, %179, %cst_93 {dimension_numbers = #tpu.dot_dimension_numbers<[1], [0], [0], [1], [0, 0, 1, 1], [], []>} : vector<2x32xf32>, vector<32x2xf32>, vector<2x2xf32> -> vector<2x2xf32>
    %cst_94 = arith.constant 0.000000e+00 : f32
    %182 = vector.broadcast %cst_94 : f32 to vector<2x2xf32>
    %183 = arith.maximumf %181, %182 : vector<2x2xf32>
    %c0_95 = arith.constant 0 : index
    %c0_96 = arith.constant 0 : index
    %184 = vector.load %arg9[%c0_95, %c0_96] : memref<32x2xf32, #tpu.memory_space<vmem>>, vector<32x2xf32>
    %cst_97 = arith.constant dense<0.000000e+00> : vector<32x2xf32>
    %185 = tpu.matmul %184, %183, %cst_97 {dimension_numbers = #tpu.dot_dimension_numbers<[1], [0], [0], [1], [0, 0, 1, 1], [], []>} : vector<32x2xf32>, vector<2x2xf32>, vector<32x2xf32> -> vector<32x2xf32>
    %186 = vector.extract_strided_slice %185 {offsets = [0, 0], sizes = [32, 1], strides = [1, 1]} : vector<32x2xf32> to vector<32x1xf32>
    %187 = vector.extract_strided_slice %185 {offsets = [0, 1], sizes = [32, 1], strides = [1, 1]} : vector<32x2xf32> to vector<32x1xf32>
    %188 = arith.addf %186, %187 : vector<32x1xf32>
    %189 = arith.negf %188 : vector<32x1xf32>
    %190 = math.exp %189 : vector<32x1xf32>
    %cst_98 = arith.constant 1.000000e+00 : f32
    %191 = vector.broadcast %cst_98 : f32 to vector<32x1xf32>
    %192 = arith.addf %191, %190 : vector<32x1xf32>
    %193 = arith.divf %191, %192 : vector<32x1xf32>
    %194 = vector.broadcast %193 : vector<32x1xf32> to vector<32x256xf32>
    %195 = arith.mulf %172, %194 : vector<32x256xf32>
    %c0_99 = arith.constant 0 : index
    %c0_100 = arith.constant 0 : index
    %c0_101 = arith.constant 0 : index
    %196 = vector.load %arg2[%c0_99, %c0_100, %c0_101] : memref<1x32x256xf32, #tpu.memory_space<vmem>>, vector<1x32x256xf32>
    %197 = vector.shape_cast %196 : vector<1x32x256xf32> to vector<32x256xf32>
    %198 = arith.addf %195, %197 : vector<32x256xf32>
    %c0_102 = arith.constant 0 : index
    %c0_103 = arith.constant 0 : index
    %c0_104 = arith.constant 0 : index
    %199 = vector.load %arg10[%c0_102, %c0_103, %c0_104] : memref<1x32x256xf32, #tpu.memory_space<vmem>>, vector<1x32x256xf32>
    %200 = vector.shape_cast %199 : vector<1x32x256xf32> to vector<32x256xf32>
    %201 = vector.shape_cast %198 : vector<32x256xf32> to vector<1x32x256xf32>
    tpu.vector_store %arg10[%c0_102, %c0_103, %c0_104], %201 {strides = array<i32>} : memref<1x32x256xf32, #tpu.memory_space<vmem>>, vector<1x32x256xf32>,
    return
  }
  func.func @transform_0(%arg0: i32) -> (i32, i32, i32) {
    %c0_i32 = arith.constant 0 : i32
    %c0_i32_0 = arith.constant 0 : i32
    %c0_i32_1 = arith.constant 0 : i32
    return %arg0, %c0_i32, %c0_i32_0 : i32, i32, i32
  }
  func.func @transform_1(%arg0: i32) -> (i32, i32, i32) {
    %c0_i32 = arith.constant 0 : i32
    %c0_i32_0 = arith.constant 0 : i32
    %c0_i32_1 = arith.constant 0 : i32
    return %arg0, %c0_i32, %c0_i32_0 : i32, i32, i32
  }
  func.func @transform_2(%arg0: i32) -> (i32, i32) {
    %c0_i32 = arith.constant 0 : i32
    %c0_i32_0 = arith.constant 0 : i32
    %c0_i32_1 = arith.constant 0 : i32
    return %c0_i32, %c0_i32_0 : i32, i32
  }
  func.func @transform_3(%arg0: i32) -> (i32, i32, i32) {
    %c0_i32 = arith.constant 0 : i32
    %c0_i32_0 = arith.constant 0 : i32
    %c0_i32_1 = arith.constant 0 : i32
    %c0_i32_2 = arith.constant 0 : i32
    return %c0_i32, %c0_i32_0, %c0_i32_1 : i32, i32, i32
  }
  func.func @transform_4(%arg0: i32) -> (i32, i32) {
    %c0_i32 = arith.constant 0 : i32
    %c0_i32_0 = arith.constant 0 : i32
    %c0_i32_1 = arith.constant 0 : i32
    return %c0_i32, %c0_i32_0 : i32, i32
  }
  func.func @transform_5(%arg0: i32) -> (i32, i32) {
    %c0_i32 = arith.constant 0 : i32
    %c0_i32_0 = arith.constant 0 : i32
    %c0_i32_1 = arith.constant 0 : i32
    return %c0_i32, %c0_i32_0 : i32, i32
  }
  func.func @transform_6(%arg0: i32) -> (i32, i32) {
    %c0_i32 = arith.constant 0 : i32
    %c0_i32_0 = arith.constant 0 : i32
    %c0_i32_1 = arith.constant 0 : i32
    return %c0_i32, %c0_i32_0 : i32, i32
  }
  func.func @transform_7(%arg0: i32) -> (i32, i32) {
    %c0_i32 = arith.constant 0 : i32
    %c0_i32_0 = arith.constant 0 : i32
    %c0_i32_1 = arith.constant 0 : i32
    return %c0_i32, %c0_i32_0 : i32, i32
  }
  func.func @transform_8(%arg0: i32) -> (i32, i32) {
    %c0_i32 = arith.constant 0 : i32
    %c0_i32_0 = arith.constant 0 : i32
    %c0_i32_1 = arith.constant 0 : i32
    return %c0_i32, %c0_i32_0 : i32, i32
  }
  func.func @transform_9(%arg0: i32) -> (i32, i32, i32) {
    %c0_i32 = arith.constant 0 : i32
    %c0_i32_0 = arith.constant 0 : i32
    %c0_i32_1 = arith.constant 0 : i32
    return %arg0, %c0_i32, %c0_i32_0 : i32, i32, i32
  }
}

</mosaic_0001>

<bundles_post_ra>
// kernel: inception_block_forward.1
= control target key start
LH: loop header
LB: loop body
LE: loop exit
PB: predicated region body
PF: predicated region fallthrough
CT: control target
= control target key end

     0   :  { %s13938_s30 = smov 0   ;;  %s16606_s0 = inlined_call_operand.vmem [shape: bf16[2,3872,256], index: 0, kind: input, shape index: {}]   ;;  %s16607_s1 = inlined_call_operand.vmem [shape: f32[2,32,256], index: 1, kind: input, shape index: {}]   ;;  %s16608_s2 = inlined_call_operand.vmem [shape: bf16[192,3872], index: 2, kind: input, shape index: {}]   ;;  %s16609_s3 = inlined_call_operand.vmem [shape: f32[6,32,1], index: 3, kind: input, shape index: {}]   ;;  %s16610_s4 = inlined_call_operand.vmem [shape: f32[32,1], index: 4, kind: input, shape index: {}]   ;;  %s16611_s5 = inlined_call_operand.vmem [shape: f32[32,1], index: 5, kind: input, shape index: {}]   ;;  %s16612_s6 = inlined_call_operand.vmem [shape: f32[32,32], index: 6, kind: input, shape index: {}]   ;;  %s16613_s7 = inlined_call_operand.vmem [shape: f32[2,32], index: 7, kind: input, shape index: {}]   ;;  %s16614_s8 = inlined_call_operand.vmem [shape: f32[32,2], index: 8, kind: input, shape index: {}]   ;;  %s16615_s9 = inlined_call_operand.vmem [shape: f32[2,32,256], index: 9, kind: output, shape index: {}]  }
   0x1 LB: > { %s10406_s10 = sadd.s32 4294967295, %s13881_s30   ;;  %p10410_p0 = scmp.ge.s32.totalorder %s13881_s30, 1  ;;  %s13881_s30 = sphi %s13938_s30, %s19_s30  }
   0x2   : > { %p297_p1 = scmp.lt.s32.totalorder %s13881_s30, 3 }
   0x4   : > { %p298_p2 = pnand %p10410_p0, %p297_p1 }
   0x6   : > { %301 = sbr.rel (%p298_p2) target bundleno = 5498 (0x157a), region = 56 }
   0xd   : > { %p338_p3 = scmp.lt.s32.totalorder %s10406_s10, 1  ;;  %v12627_v0 = vld [vmem:[%s16608_s2 + $0x4] ss:$124 sps:$4 sm:$0xff]   ;;  %v12630_v1 = vld [vmem:[%s16608_s2 + $0x3c] ss:$124 sps:$4 sm:$0xff]   ;;  %vm5502_vm0 = vcmask 261120  }
   0xe   : > { %5571 = vmatprep.mubr.bf16.mxu1 %v12627_v0  ;;  %6642 = vmatprep.mubr.bf16.mxu0 %v12630_v1  ;;  %s13887_s12 = smov 127  }
   0xf   : > { %s16679_s10 = smov (!%p338_p3, %s10406_s10), 1 }
  0x10   : > { %s12513_s15 = smul.u32 3872, %s16679_s10  ;;  %s11364_s13 = sshll.u32 %s16679_s10, 6 }
  0x11   : > { %s347_s16 = scalar_lea.vmem %s16607_s1, %s11364_s13  ;;  %s352_s20 = scalar_lea.vmem %s16615_s9, %s11364_s13 }
  0x12   : > { %s13958_s18 = scalar_lea.vmem %s16606_s0, %s12513_s15 }
  0x13   : > { %v12529_v2 = vld [vmem:[%s13958_s18 + $0x4] ss:$8 sps:$4 sm:$0xff]   ;;  %v12533_v4 = vld [vmem:[%s13958_s18] ss:$8 sps:$4 sm:$0xff]   ;;  %v12535_v6 = vld [vmem:[%s13958_s18 + $0x14] ss:$8 sps:$4 sm:$0xff]  }
  0x14   : > { %v12531_v3 = vld [vmem:[%s13958_s18 + $0x704] ss:$8 sps:$4 sm:$0xff]   ;;  %5539 = vmatprep.subr.bf16.mxu1 %v12529_v2  ;;  %v12534_v5 = vld [vmem:[%s13958_s18 + $0x700] ss:$8 sps:$4 sm:$0xff]   ;;  %v12537_v7 = vld [vmem:[%s13958_s18 + $0x714] ss:$8 sps:$4 sm:$0xff]  }
  0x15   : > { %6610 = vmatprep.subr.bf16.mxu0 %v12531_v3  ;;  %5540 = vmatpush1.bf16.msra.mxu1 %v12533_v4  ;;  %v12539_v8 = vld [vmem:[%s13958_s18 + $0x10] ss:$8 sps:$4 sm:$0xff]   ;;  %v12541_v10 = vld [vmem:[%s13958_s18 + $0x24] ss:$8 sps:$4 sm:$0xff]   ;;  %v12545_v12 = vld [vmem:[%s13958_s18 + $0x20] ss:$8 sps:$4 sm:$0xff]  }
  0x16   : > { %6611 = vmatpush1.bf16.msra.mxu0 %v12534_v5  ;;  %5541 = vmatprep.subr.bf16.mxu1 %v12535_v6  ;;  %v12540_v9 = vld [vmem:[%s13958_s18 + $0x710] ss:$8 sps:$4 sm:$0xff]   ;;  %v12543_v11 = vld [vmem:[%s13958_s18 + $0x724] ss:$8 sps:$4 sm:$0xff]   ;;  %v12546_v13 = vld [vmem:[%s13958_s18 + $0x720] ss:$8 sps:$4 sm:$0xff]  }
  0x17   : > { %6612 = vmatprep.subr.bf16.mxu0 %v12537_v7  ;;  %v12547_v14 = vld [vmem:[%s13958_s18 + $0x34] ss:$8 sps:$4 sm:$0xff]   ;;  %v12551_v16 = vld [vmem:[%s13958_s18 + $0x30] ss:$8 sps:$4 sm:$0xff]   ;;  %v12553_v18 = vld [vmem:[%s13958_s18 + $0x44] ss:$8 sps:$4 sm:$0xff]  }
  0x18   : > { %v12549_v15 = vld [vmem:[%s13958_s18 + $0x734] ss:$8 sps:$4 sm:$0xff]   ;;  %v12552_v17 = vld [vmem:[%s13958_s18 + $0x730] ss:$8 sps:$4 sm:$0xff]   ;;  %v12555_v19 = vld [vmem:[%s13958_s18 + $0x744] ss:$8 sps:$4 sm:$0xff]  }
  0x19   : > { %5542 = vmatpush1.bf16.msra.mxu1 %v12539_v8  ;;  %v12557_v20 = vld [vmem:[%s13958_s18 + $0x40] ss:$8 sps:$4 sm:$0xff]   ;;  %v12559_v22 = vld [vmem:[%s13958_s18 + $0x54] ss:$8 sps:$4 sm:$0xff]   ;;  %v12563_v24 = vld [vmem:[%s13958_s18 + $0x50] ss:$8 sps:$4 sm:$0xff]  }
  0x1a   : > { %6613 = vmatpush1.bf16.msra.mxu0 %v12540_v9  ;;  %5543 = vmatprep.subr.bf16.mxu1 %v12541_v10  ;;  %v12558_v21 = vld [vmem:[%s13958_s18 + $0x740] ss:$8 sps:$4 sm:$0xff]   ;;  %v12561_v23 = vld [vmem:[%s13958_s18 + $0x754] ss:$8 sps:$4 sm:$0xff]   ;;  %v12564_v25 = vld [vmem:[%s13958_s18 + $0x750] ss:$8 sps:$4 sm:$0xff]  }
  0x1b   : > { %6614 = vmatprep.subr.bf16.mxu0 %v12543_v11  ;;  %v12565_v26 = vld [vmem:[%s13958_s18 + $0x64] ss:$8 sps:$4 sm:$0xff]   ;;  %v12569_v28 = vld [vmem:[%s13958_s18 + $0x60] ss:$8 sps:$4 sm:$0xff]   ;;  %v12571_v30 = vld [vmem:[%s13958_s18 + $0x74] ss:$8 sps:$4 sm:$0xff]  }
  0x1c   : > { %v12567_v27 = vld [vmem:[%s13958_s18 + $0x764] ss:$8 sps:$4 sm:$0xff]   ;;  %v12570_v29 = vld [vmem:[%s13958_s18 + $0x760] ss:$8 sps:$4 sm:$0xff]   ;;  %v12573_v31 = vld [vmem:[%s13958_s18 + $0x774] ss:$8 sps:$4 sm:$0xff]  }
  0x1d   : > { %5544 = vmatpush1.bf16.msra.mxu1 %v12545_v12  ;;  %v12575_v32 = vld [vmem:[%s13958_s18 + $0x70] ss:$8 sps:$4 sm:$0xff]   ;;  %v12577_v34 = vld [vmem:[%s13958_s18 + $0x84] ss:$8 sps:$4 sm:$0xff]   ;;  %v12581_v36 = vld [vmem:[%s13958_s18 + $0x80] ss:$8 sps:$4 sm:$0xff]  }
  0x1e   : > { %6615 = vmatpush1.bf16.msra.mxu0 %v12546_v13  ;;  %5545 = vmatprep.subr.bf16.mxu1 %v12547_v14  ;;  %v12576_v33 = vld [vmem:[%s13958_s18 + $0x770] ss:$8 sps:$4 sm:$0xff]   ;;  %v12579_v35 = vld [vmem:[%s13958_s18 + $0x784] ss:$8 sps:$4 sm:$0xff]   ;;  %v12582_v37 = vld [vmem:[%s13958_s18 + $0x780] ss:$8 sps:$4 sm:$0xff]  }
  0x1f   : > { %6616 = vmatprep.subr.bf16.mxu0 %v12549_v15  ;;  %v12583_v38 = vld [vmem:[%s13958_s18 + $0x94] ss:$8 sps:$4 sm:$0xff]   ;;  %v12587_v40 = vld [vmem:[%s13958_s18 + $0x90] ss:$8 sps:$4 sm:$0xff]   ;;  %v12589_v42 = vld [vmem:[%s13958_s18 + $0xa4] ss:$8 sps:$4 sm:$0xff]  }
  0x20   : > { %v12585_v39 = vld [vmem:[%s13958_s18 + $0x794] ss:$8 sps:$4 sm:$0xff]   ;;  %v12588_v41 = vld [vmem:[%s13958_s18 + $0x790] ss:$8 sps:$4 sm:$0xff]   ;;  %v12591_v43 = vld [vmem:[%s13958_s18 + $0x7a4] ss:$8 sps:$4 sm:$0xff]  }
  0x21   : > { %5546 = vmatpush1.bf16.msra.mxu1 %v12551_v16  ;;  %v12593_v44 = vld [vmem:[%s13958_s18 + $0xa0] ss:$8 sps:$4 sm:$0xff]   ;;  %v12595_v46 = vld [vmem:[%s13958_s18 + $0xb4] ss:$8 sps:$4 sm:$0xff]   ;;  %v12599_v48 = vld [vmem:[%s13958_s18 + $0xb0] ss:$8 sps:$4 sm:$0xff]  }
  0x22   : > { %6617 = vmatpush1.bf16.msra.mxu0 %v12552_v17  ;;  %5547 = vmatprep.subr.bf16.mxu1 %v12553_v18  ;;  %v12594_v45 = vld [vmem:[%s13958_s18 + $0x7a0] ss:$8 sps:$4 sm:$0xff]   ;;  %v12597_v47 = vld [vmem:[%s13958_s18 + $0x7b4] ss:$8 sps:$4 sm:$0xff]   ;;  %v12600_v49 = vld [vmem:[%s13958_s18 + $0x7b0] ss:$8 sps:$4 sm:$0xff]  }
  0x23   : > { %6618 = vmatprep.subr.bf16.mxu0 %v12555_v19  ;;  %v12601_v50 = vld [vmem:[%s13958_s18 + $0xc4] ss:$8 sps:$4 sm:$0xff]   ;;  %v12605_v52 = vld [vmem:[%s13958_s18 + $0xc0] ss:$8 sps:$4 sm:$0xff]   ;;  %v12607_v54 = vld [vmem:[%s13958_s18 + $0xd4] ss:$8 sps:$4 sm:$0xff]  }
  0x24   : > { %v12603_v51 = vld [vmem:[%s13958_s18 + $0x7c4] ss:$8 sps:$4 sm:$0xff]   ;;  %v12606_v53 = vld [vmem:[%s13958_s18 + $0x7c0] ss:$8 sps:$4 sm:$0xff]   ;;  %v12609_v55 = vld [vmem:[%s13958_s18 + $0x7d4] ss:$8 sps:$4 sm:$0xff]  }
  0x25   : > { %5548 = vmatpush1.bf16.msra.mxu1 %v12557_v20  ;;  %v12611_v56 = vld [vmem:[%s13958_s18 + $0xd0] ss:$8 sps:$4 sm:$0xff]   ;;  %v12613_v58 = vld [vmem:[%s13958_s18 + $0xe4] ss:$8 sps:$4 sm:$0xff]   ;;  %v12617_v60 = vld [vmem:[%s13958_s18 + $0xe0] ss:$8 sps:$4 sm:$0xff]  }
  0x26   : > { %6619 = vmatpush1.bf16.msra.mxu0 %v12558_v21  ;;  %5549 = vmatprep.subr.bf16.mxu1 %v12559_v22  ;;  %v12612_v57 = vld [vmem:[%s13958_s18 + $0x7d0] ss:$8 sps:$4 sm:$0xff]   ;;  %v12615_v59 = vld [vmem:[%s13958_s18 + $0x7e4] ss:$8 sps:$4 sm:$0xff]   ;;  %v12618_v61 = vld [vmem:[%s13958_s18 + $0x7e0] ss:$8 sps:$4 sm:$0xff]  }
  0x27   : > { %6620 = vmatprep.subr.bf16.mxu0 %v12561_v23  ;;  %v12619_v62 = vld [vmem:[%s13958_s18 + $0xf4] ss:$8 sps:$4 sm:$0xff]   ;;  %v12623_v0 = vld [vmem:[%s13958_s18 + $0xf0] ss:$8 sps:$4 sm:$0xff]   ;;  %v12651_v2 = vld [vmem:[%s13958_s18 + $0x804] ss:$8 sps:$4 sm:$0xff]  }
  0x28   : > { %v12621_v63 = vld [vmem:[%s13958_s18 + $0x7f4] ss:$8 sps:$4 sm:$0xff]   ;;  %v12624_v1 = vld [vmem:[%s13958_s18 + $0x7f0] ss:$8 sps:$4 sm:$0xff]   ;;  %v12659_v4 = vld [vmem:[%s13958_s18 + $0x104] ss:$8 sps:$4 sm:$0xff]  }
  0x29   : > { %5550 = vmatpush1.bf16.msra.mxu1 %v12563_v24  ;;  %v12625_v3 = vld [vmem:[%s16608_s2] ss:$124 sps:$4 sm:$0xff]   ;;  %v12628_v5 = vld [vmem:[%s16608_s2 + $0x38] ss:$124 sps:$4 sm:$0xff]   ;;  %v12636_v15 = vld [vmem:[%s16608_s2 + $0x130] ss:$124 sps:$4 sm:$0xff]  }
  0x2a   : > { %6621 = vmatpush1.bf16.msra.mxu0 %v12564_v25  ;;  %5551 = vmatprep.subr.bf16.mxu1 %v12565_v26  ;;  %v12631_v6 = vld [vmem:[%s16608_s2 + $0xfc] ss:$124 sps:$4 sm:$0xff]   ;;  %v12633_v7 = vld [vmem:[%s16608_s2 + $0x134] ss:$124 sps:$4 sm:$0xff]   ;;  %v12649_v8 = vld [vmem:[%s13958_s18 + $0x800] ss:$8 sps:$4 sm:$0xff]  }
  0x2b   : > { %6622 = vmatprep.subr.bf16.mxu0 %v12567_v27  ;;  %v12657_v9 = vld [vmem:[%s13958_s18 + $0x100] ss:$8 sps:$4 sm:$0xff]   ;;  %v12663_v10 = vld [vmem:[%s13958_s18 + $0x814] ss:$8 sps:$4 sm:$0xff]   ;;  %v12661_v12 = vld [vmem:[%s13958_s18 + $0x810] ss:$8 sps:$4 sm:$0xff]  }
  0x2c   : > { %v12666_v11 = vld [vmem:[%s13958_s18 + $0x114] ss:$8 sps:$4 sm:$0xff]   ;;  %v12664_v13 = vld [vmem:[%s13958_s18 + $0x110] ss:$8 sps:$4 sm:$0xff]   ;;  %v12669_v16 = vld [vmem:[%s13958_s18 + $0x824] ss:$8 sps:$4 sm:$0xff]  }
  0x2d   : > { %5552 = vmatpush1.bf16.msra.mxu1 %v12569_v28  ;;  %v12635_v14 = vld [vmem:[%s16608_s2 + $0xf8] ss:$124 sps:$4 sm:$0xff]   ;;  %v12677_v17 = vld [vmem:[%s13958_s18 + $0x124] ss:$8 sps:$4 sm:$0xff]   ;;  %v12667_v20 = vld [vmem:[%s13958_s18 + $0x820] ss:$8 sps:$4 sm:$0xff]  }
  0x2e   : > { %6623 = vmatpush1.bf16.msra.mxu0 %v12570_v29  ;;  %5553 = vmatprep.subr.bf16.mxu1 %v12571_v30  ;;  %v12637_v18 = vld [vmem:[%s16608_s2 + $0x1f4] ss:$124 sps:$4 sm:$0xff]   ;;  %v12639_v19 = vld [vmem:[%s16608_s2 + $0x22c] ss:$124 sps:$4 sm:$0xff]  }
  0x2f   : > { %6624 = vmatprep.subr.bf16.mxu0 %v12573_v31  ;;  %v12675_v21 = vld [vmem:[%s13958_s18 + $0x120] ss:$8 sps:$4 sm:$0xff]   ;;  %v12681_v22 = vld [vmem:[%s13958_s18 + $0x134] ss:$8 sps:$4 sm:$0xff]   ;;  %v12679_v24 = vld [vmem:[%s13958_s18 + $0x130] ss:$8 sps:$4 sm:$0xff]  }
  0x30   : > { %v12684_v23 = vld [vmem:[%s13958_s18 + $0x834] ss:$8 sps:$4 sm:$0xff]   ;;  %v12682_v25 = vld [vmem:[%s13958_s18 + $0x830] ss:$8 sps:$4 sm:$0xff]   ;;  %v12642_v27 = vld [vmem:[%s16608_s2 + $0x228] ss:$124 sps:$4 sm:$0xff]  }
  0x31   : > { %5554 = vmatpush1.bf16.msra.mxu1 %v12575_v32  ;;  %v12641_v26 = vld [vmem:[%s16608_s2 + $0x1f0] ss:$124 sps:$4 sm:$0xff]   ;;  %v12645_v31 = vld [vmem:[%s16608_s2 + $0x324] ss:$124 sps:$4 sm:$0xff]  }
  0x32   : > { %6625 = vmatpush1.bf16.msra.mxu0 %v12576_v33  ;;  %5555 = vmatprep.subr.bf16.mxu1 %v12577_v34  ;;  %v12692_v28 = vld [vmem:[%s13958_s18 + $0x144] ss:$8 sps:$4 sm:$0xff]   ;;  %v12690_v32 = vld [vmem:[%s13958_s18 + $0x140] ss:$8 sps:$4 sm:$0xff]   ;;  %v12699_v34 = vld [vmem:[%s13958_s18 + $0x154] ss:$8 sps:$4 sm:$0xff]  }
  0x33   : > { %6626 = vmatprep.subr.bf16.mxu0 %v12579_v35  ;;  %v12696_v29 = vld [vmem:[%s13958_s18 + $0x844] ss:$8 sps:$4 sm:$0xff]   ;;  %v12694_v33 = vld [vmem:[%s13958_s18 + $0x840] ss:$8 sps:$4 sm:$0xff]   ;;  %v12702_v35 = vld [vmem:[%s13958_s18 + $0x854] ss:$8 sps:$4 sm:$0xff]  }
  0x34   : > { %v12643_v30 = vld [vmem:[%s16608_s2 + $0x2ec] ss:$124 sps:$4 sm:$0xff]  }
  0x35   : > { %5556 = vmatpush1.bf16.msra.mxu1 %v12581_v36  ;;  %v12697_v36 = vld [vmem:[%s13958_s18 + $0x150] ss:$8 sps:$4 sm:$0xff]  }
  0x36   : > { %6627 = vmatpush1.bf16.msra.mxu0 %v12582_v37  ;;  %5557 = vmatprep.subr.bf16.mxu1 %v12583_v38  ;;  %v12700_v37 = vld [vmem:[%s13958_s18 + $0x850] ss:$8 sps:$4 sm:$0xff]   ;;  %v12647_v38 = vld [vmem:[%s16608_s2 + $0x2e8] ss:$124 sps:$4 sm:$0xff]  }
  0x37   : > { %6628 = vmatprep.subr.bf16.mxu0 %v12585_v39  ;;  %v12648_v39 = vld [vmem:[%s16608_s2 + $0x320] ss:$124 sps:$4 sm:$0xff]  }
  0x39   : > { %5558 = vmatpush1.bf16.msra.mxu1 %v12587_v40  ;;  %v12710_v40 = vld [vmem:[%s13958_s18 + $0x164] ss:$8 sps:$4 sm:$0xff]  }
  0x3a   : > { %6629 = vmatpush1.bf16.msra.mxu0 %v12588_v41  ;;  %5559 = vmatprep.subr.bf16.mxu1 %v12589_v42  ;;  %v12714_v41 = vld [vmem:[%s13958_s18 + $0x864] ss:$8 sps:$4 sm:$0xff]  }
  0x3b   : > { %6630 = vmatprep.subr.bf16.mxu0 %v12591_v43  ;;  %v12652_v42 = vld [vmem:[%s16608_s2 + $0x3e4] ss:$124 sps:$4 sm:$0xff]   ;;  %v12654_v43 = vld [vmem:[%s16608_s2 + $0x41c] ss:$124 sps:$4 sm:$0xff]  }
  0x3d   : > { %5560 = vmatpush1.bf16.msra.mxu1 %v12593_v44  ;;  %v12708_v44 = vld [vmem:[%s13958_s18 + $0x160] ss:$8 sps:$4 sm:$0xff]  }
  0x3e   : > { %6631 = vmatpush1.bf16.msra.mxu0 %v12594_v45  ;;  %5561 = vmatprep.subr.bf16.mxu1 %v12595_v46  ;;  %v12712_v45 = vld [vmem:[%s13958_s18 + $0x860] ss:$8 sps:$4 sm:$0xff]   ;;  %v12717_v46 = vld [vmem:[%s13958_s18 + $0x174] ss:$8 sps:$4 sm:$0xff]  }
  0x3f   : > { %6632 = vmatprep.subr.bf16.mxu0 %v12597_v47  ;;  %v12720_v47 = vld [vmem:[%s13958_s18 + $0x874] ss:$8 sps:$4 sm:$0xff]  }
  0x41   : > { %5562 = vmatpush1.bf16.msra.mxu1 %v12599_v48  ;;  %v12715_v48 = vld [vmem:[%s13958_s18 + $0x170] ss:$8 sps:$4 sm:$0xff]  }
  0x42   : > { %6633 = vmatpush1.bf16.msra.mxu0 %v12600_v49  ;;  %5563 = vmatprep.subr.bf16.mxu1 %v12601_v50  ;;  %v12718_v49 = vld [vmem:[%s13958_s18 + $0x870] ss:$8 sps:$4 sm:$0xff]   ;;  %v12656_v50 = vld [vmem:[%s16608_s2 + $0x3e0] ss:$124 sps:$4 sm:$0xff]  }
  0x43   : > { %6634 = vmatprep.subr.bf16.mxu0 %v12603_v51  ;;  %v12660_v51 = vld [vmem:[%s16608_s2 + $0x418] ss:$124 sps:$4 sm:$0xff]  }
  0x45   : > { %5564 = vmatpush1.bf16.msra.mxu1 %v12605_v52  ;;  %v12728_v52 = vld [vmem:[%s13958_s18 + $0x184] ss:$8 sps:$4 sm:$0xff]  }
  0x46   : > { %6635 = vmatpush1.bf16.msra.mxu0 %v12606_v53  ;;  %5565 = vmatprep.subr.bf16.mxu1 %v12607_v54  ;;  %v12732_v53 = vld [vmem:[%s13958_s18 + $0x884] ss:$8 sps:$4 sm:$0xff]   ;;  %v12670_v54 = vld [vmem:[%s16608_s2 + $0x4dc] ss:$124 sps:$4 sm:$0xff]  }
  0x47   : > { %6636 = vmatprep.subr.bf16.mxu0 %v12609_v55  ;;  %v12672_v55 = vld [vmem:[%s16608_s2 + $0x514] ss:$124 sps:$4 sm:$0xff]  }
  0x49   : > { %5566 = vmatpush1.bf16.msra.mxu1 %v12611_v56  ;;  %v12726_v56 = vld [vmem:[%s13958_s18 + $0x180] ss:$8 sps:$4 sm:$0xff]  }
  0x4a   : > { %6637 = vmatpush1.bf16.msra.mxu0 %v12612_v57  ;;  %5567 = vmatprep.subr.bf16.mxu1 %v12613_v58  ;;  %v12730_v57 = vld [vmem:[%s13958_s18 + $0x880] ss:$8 sps:$4 sm:$0xff]   ;;  %v12735_v58 = vld [vmem:[%s13958_s18 + $0x194] ss:$8 sps:$4 sm:$0xff]  }
  0x4b   : > { %6638 = vmatprep.subr.bf16.mxu0 %v12615_v59  ;;  %v12738_v59 = vld [vmem:[%s13958_s18 + $0x894] ss:$8 sps:$4 sm:$0xff]  }
  0x4d   : > { %5568 = vmatpush1.bf16.msra.mxu1 %v12617_v60  ;;  %v12733_v60 = vld [vmem:[%s13958_s18 + $0x190] ss:$8 sps:$4 sm:$0xff]  }
  0x4e   : > { %6639 = vmatpush1.bf16.msra.mxu0 %v12618_v61  ;;  %5569 = vmatprep.subr.bf16.mxu1 %v12619_v62  ;;  %v12736_v61 = vld [vmem:[%s13958_s18 + $0x890] ss:$8 sps:$4 sm:$0xff]  }
  0x4f   : > { %6640 = vmatprep.subr.bf16.mxu0 %v12621_v63  ;;  %v12674_v62 = vld [vmem:[%s16608_s2 + $0x4d8] ss:$124 sps:$4 sm:$0xff]   ;;  %v12678_v63 = vld [vmem:[%s16608_s2 + $0x510] ss:$124 sps:$4 sm:$0xff]  }
  0x51   : > { %5570 = vmatpush1.bf16.msra.mxu1 %v12623_v0  ;;  %v12746_v0 = vld [vmem:[%s13958_s18 + $0x1a4] ss:$8 sps:$4 sm:$0xff]  }
  0x52   : > { %6641 = vmatpush1.bf16.msra.mxu0 %v12624_v1  ;;  %5692 = vmatprep.subr.bf16.mxu1 %v12659_v4  ;;  %v12750_v1 = vld [vmem:[%s13958_s18 + $0x8a4] ss:$8 sps:$4 sm:$0xff]   ;;  %v12744_v4 = vld [vmem:[%s13958_s18 + $0x1a0] ss:$8 sps:$4 sm:$0xff]  }
  0x53   : > { %6763 = vmatprep.subr.bf16.mxu0 %v12651_v2  ;;  %v12685_v2 = vld [vmem:[%s16608_s2 + $0x5d4] ss:$124 sps:$4 sm:$0xff]  }
  0x54   : > { %5572 = vmatmul.mubr.bf16.vlgmr.msra.gmra.mrb[0].mxu1 %v12625_v3  ;;  %v12687_v3 = vld [vmem:[%s16608_s2 + $0x60c] ss:$124 sps:$4 sm:$0xff]  }
  0x55   : > { %6643 = vmatmul.mubr.bf16.vlgmr.msra.gmra.mrb[0].mxu0 %v12628_v5  ;;  %5581 = vmatprep.mubr.bf16.mxu1 %v12631_v6  ;;  %v12748_v5 = vld [vmem:[%s13958_s18 + $0x8a0] ss:$8 sps:$4 sm:$0xff]   ;;  %v12753_v6 = vld [vmem:[%s13958_s18 + $0x1b4] ss:$8 sps:$4 sm:$0xff]  }
  0x56   : > { %6652 = vmatprep.mubr.bf16.mxu0 %v12633_v7  ;;  %6764 = vmatpush1.bf16.msra.mxu0 %v12649_v8  ;;  %v12756_v7 = vld [vmem:[%s13958_s18 + $0x8b4] ss:$8 sps:$4 sm:$0xff]   ;;  %v12751_v8 = vld [vmem:[%s13958_s18 + $0x1b0] ss:$8 sps:$4 sm:$0xff]  }
  0x57   : > { %5693 = vmatpush1.bf16.msra.mxu1 %v12657_v9  ;;  %6765 = vmatprep.subr.bf16.mxu0 %v12663_v10  ;;  %v12754_v9 = vld [vmem:[%s13958_s18 + $0x8b0] ss:$8 sps:$4 sm:$0xff]  }
  0x58   : > { %5694 = vmatprep.subr.bf16.mxu1 %v12666_v11  ;;  %v12689_v10 = vld [vmem:[%s16608_s2 + $0x5d0] ss:$124 sps:$4 sm:$0xff]   ;;  %v12693_v11 = vld [vmem:[%s16608_s2 + $0x608] ss:$124 sps:$4 sm:$0xff]  }
  0x5a   : > { %6766 = vmatpush1.bf16.msra.mxu0 %v12661_v12  ;;  %v12764_v12 = vld [vmem:[%s13958_s18 + $0x1c4] ss:$8 sps:$4 sm:$0xff]  }
  0x5b   : > { %5695 = vmatpush1.bf16.msra.mxu1 %v12664_v13  ;;  %6767 = vmatprep.subr.bf16.mxu0 %v12669_v16  ;;  %v12768_v13 = vld [vmem:[%s13958_s18 + $0x8c4] ss:$8 sps:$4 sm:$0xff]   ;;  %v12762_v16 = vld [vmem:[%s13958_s18 + $0x1c0] ss:$8 sps:$4 sm:$0xff]  }
  0x5c   : > { %5696 = vmatprep.subr.bf16.mxu1 %v12677_v17  ;;  %5582 = vmatmul.mubr.bf16.gmra.mrb[4].mxu1 %v12635_v14  ;;  %v12703_v14 = vld [vmem:[%s16608_s2 + $0x6cc] ss:$124 sps:$4 sm:$0xff]  }
  0x5d   : > { %6653 = vmatmul.mubr.bf16.gmra.mrb[4].mxu0 %v12636_v15  ;;  %5591 = vmatprep.mubr.bf16.mxu1 %v12637_v18  ;;  %v12705_v15 = vld [vmem:[%s16608_s2 + $0x704] ss:$124 sps:$4 sm:$0xff]   ;;  %v12771_v18 = vld [vmem:[%s13958_s18 + $0x1d4] ss:$8 sps:$4 sm:$0xff]  }
  0x5e   : > { %6662 = vmatprep.mubr.bf16.mxu0 %v12639_v19  ;;  %6768 = vmatpush1.bf16.msra.mxu0 %v12667_v20  ;;  %v12766_v17 = vld [vmem:[%s13958_s18 + $0x8c0] ss:$8 sps:$4 sm:$0xff]   ;;  %v12774_v19 = vld [vmem:[%s13958_s18 + $0x8d4] ss:$8 sps:$4 sm:$0xff]   ;;  %v12769_v20 = vld [vmem:[%s13958_s18 + $0x1d0] ss:$8 sps:$4 sm:$0xff]  }
  0x5f   : > { %5697 = vmatpush1.bf16.msra.mxu1 %v12675_v21  ;;  %6769 = vmatprep.subr.bf16.mxu0 %v12684_v23  ;;  %v12707_v21 = vld [vmem:[%s16608_s2 + $0x6c8] ss:$124 sps:$4 sm:$0xff]   ;;  %v12772_v23 = vld [vmem:[%s13958_s18 + $0x8d0] ss:$8 sps:$4 sm:$0xff]  }
  0x60   : > { %5698 = vmatprep.subr.bf16.mxu1 %v12681_v22  ;;  %v12711_v22 = vld [vmem:[%s16608_s2 + $0x700] ss:$124 sps:$4 sm:$0xff]  }
  0x62   : > { %6770 = vmatpush1.bf16.msra.mxu0 %v12682_v25  ;;  %v12786_v25 = vld [vmem:[%s13958_s18 + $0x8e4] ss:$8 sps:$4 sm:$0xff]  }
  0x63   : > { %5699 = vmatpush1.bf16.msra.mxu1 %v12679_v24  ;;  %6771 = vmatprep.subr.bf16.mxu0 %v12696_v29  ;;  %v12782_v24 = vld [vmem:[%s13958_s18 + $0x1e4] ss:$8 sps:$4 sm:$0xff]   ;;  %v12784_v29 = vld [vmem:[%s13958_s18 + $0x8e0] ss:$8 sps:$4 sm:$0xff]  }
  0x64   : > { %5700 = vmatprep.subr.bf16.mxu1 %v12692_v28  ;;  %5592 = vmatmul.mubr.bf16.gmra.mrb[8].mxu1 %v12641_v26  ;;  %v12721_v26 = vld [vmem:[%s16608_s2 + $0x7c4] ss:$124 sps:$4 sm:$0xff]  }
  0x65   : > { %6663 = vmatmul.mubr.bf16.gmra.mrb[8].mxu0 %v12642_v27  ;;  %5601 = vmatprep.mubr.bf16.mxu1 %v12643_v30  ;;  %v12723_v27 = vld [vmem:[%s16608_s2 + $0x7fc] ss:$124 sps:$4 sm:$0xff]   ;;  %v12780_v28 = vld [vmem:[%s13958_s18 + $0x1e0] ss:$8 sps:$4 sm:$0xff]  }
  0x66   : > { %6672 = vmatprep.mubr.bf16.mxu0 %v12645_v31  ;;  %6772 = vmatpush1.bf16.msra.mxu0 %v12694_v33  ;;  %v12789_v30 = vld [vmem:[%s13958_s18 + $0x1f4] ss:$8 sps:$4 sm:$0xff]   ;;  %v12790_v33 = vld [vmem:[%s13958_s18 + $0x8f0] ss:$8 sps:$4 sm:$0xff]  }
  0x67   : > { %5701 = vmatpush1.bf16.msra.mxu1 %v12690_v32  ;;  %6773 = vmatprep.subr.bf16.mxu0 %v12702_v35  ;;  %v12792_v31 = vld [vmem:[%s13958_s18 + $0x8f4] ss:$8 sps:$4 sm:$0xff]   ;;  %v12787_v32 = vld [vmem:[%s13958_s18 + $0x1f0] ss:$8 sps:$4 sm:$0xff]   ;;  %v12827_v35 = vld [vmem:[%s13958_s18 + $0x204] ss:$8 sps:$4 sm:$0xff]  }
  0x68   : > { %5702 = vmatprep.subr.bf16.mxu1 %v12699_v34  ;;  %v12819_v34 = vld [vmem:[%s13958_s18 + $0x904] ss:$8 sps:$4 sm:$0xff]  }
  0x6a   : > { %6774 = vmatpush1.bf16.msra.mxu0 %v12700_v37  ;;  %v12729_v37 = vld [vmem:[%s16608_s2 + $0x7f8] ss:$124 sps:$4 sm:$0xff]  }
  0x6b   : > { %5703 = vmatpush1.bf16.msra.mxu1 %v12697_v36  ;;  %6775 = vmatprep.subr.bf16.mxu0 %v12714_v41  ;;  %v12725_v36 = vld [vmem:[%s16608_s2 + $0x7c0] ss:$124 sps:$4 sm:$0xff]   ;;  %v12747_v41 = vld [vmem:[%s16608_s2 + $0x8f0] ss:$124 sps:$4 sm:$0xff]  }
  0x6c   : > { %5704 = vmatprep.subr.bf16.mxu1 %v12710_v40  ;;  %5602 = vmatmul.mubr.bf16.gmra.mrb[12].mxu1 %v12647_v38  ;;  %v12739_v38 = vld [vmem:[%s16608_s2 + $0x8bc] ss:$124 sps:$4 sm:$0xff]  }
  0x6d   : > { %6673 = vmatmul.mubr.bf16.gmra.mrb[12].mxu0 %v12648_v39  ;;  %5611 = vmatprep.mubr.bf16.mxu1 %v12652_v42  ;;  %v12741_v39 = vld [vmem:[%s16608_s2 + $0x8f4] ss:$124 sps:$4 sm:$0xff]  }
  0x6e   : > { %6682 = vmatprep.mubr.bf16.mxu0 %v12654_v43  ;;  %6776 = vmatpush1.bf16.msra.mxu0 %v12712_v45  ;;  %v12743_v40 = vld [vmem:[%s16608_s2 + $0x8b8] ss:$124 sps:$4 sm:$0xff]   ;;  %v12759_v43 = vld [vmem:[%s16608_s2 + $0x9ec] ss:$124 sps:$4 sm:$0xff]  }
  0x6f   : > { %5705 = vmatpush1.bf16.msra.mxu1 %v12708_v44  ;;  %6777 = vmatprep.subr.bf16.mxu0 %v12720_v47  ;;  %v12757_v42 = vld [vmem:[%s16608_s2 + $0x9b4] ss:$124 sps:$4 sm:$0xff]   ;;  %v12765_v45 = vld [vmem:[%s16608_s2 + $0x9e8] ss:$124 sps:$4 sm:$0xff]  }
  0x70   : > { %5706 = vmatprep.subr.bf16.mxu1 %v12717_v46  ;;  %v12761_v44 = vld [vmem:[%s16608_s2 + $0x9b0] ss:$124 sps:$4 sm:$0xff]   ;;  %v12777_v47 = vld [vmem:[%s16608_s2 + $0xae4] ss:$124 sps:$4 sm:$0xff]  }
  0x71   : > { %v12775_v46 = vld [vmem:[%s16608_s2 + $0xaac] ss:$124 sps:$4 sm:$0xff]  }
  0x72   : > { %6778 = vmatpush1.bf16.msra.mxu0 %v12718_v49  ;;  %v12783_v49 = vld [vmem:[%s16608_s2 + $0xae0] ss:$124 sps:$4 sm:$0xff]  }
  0x73   : > { %5707 = vmatpush1.bf16.msra.mxu1 %v12715_v48  ;;  %6779 = vmatprep.subr.bf16.mxu0 %v12732_v53  ;;  %v12779_v48 = vld [vmem:[%s16608_s2 + $0xaa8] ss:$124 sps:$4 sm:$0xff]   ;;  %v12796_v53 = vld [vmem:[%s16608_s2 + $0x40] ss:$124 sps:$4 sm:$0xff]  }
  0x74   : > { %5708 = vmatprep.subr.bf16.mxu1 %v12728_v52  ;;  %5612 = vmatmul.mubr.bf16.gmra.mrb[16].mxu1 %v12656_v50  ;;  %v12795_v50 = vld [vmem:[%s16608_s2 + $0xc] ss:$124 sps:$4 sm:$0xff]  }
  0x75   : > { %6683 = vmatmul.mubr.bf16.gmra.mrb[16].mxu0 %v12660_v51  ;;  %5621 = vmatprep.mubr.bf16.mxu1 %v12670_v54  ;;  %v12798_v51 = vld [vmem:[%s16608_s2 + $0x44] ss:$124 sps:$4 sm:$0xff]  }
  0x76   : > { %6692 = vmatprep.mubr.bf16.mxu0 %v12672_v55  ;;  %6780 = vmatpush1.bf16.msra.mxu0 %v12730_v57  ;;  %v12793_v52 = vld [vmem:[%s16608_s2 + $0x8] ss:$124 sps:$4 sm:$0xff]   ;;  %v12801_v55 = vld [vmem:[%s16608_s2 + $0x13c] ss:$124 sps:$4 sm:$0xff]  }
  0x77   : > { %5709 = vmatpush1.bf16.msra.mxu1 %v12726_v56  ;;  %6781 = vmatprep.subr.bf16.mxu0 %v12738_v59  ;;  %v12799_v54 = vld [vmem:[%s16608_s2 + $0x104] ss:$124 sps:$4 sm:$0xff]   ;;  %v12834_v59 = vld [vmem:[%s13958_s18 + $0x214] ss:$8 sps:$4 sm:$0xff]  }
  0x78   : > { %5710 = vmatprep.subr.bf16.mxu1 %v12735_v58  ;;  %v12817_v56 = vld [vmem:[%s13958_s18 + $0x900] ss:$8 sps:$4 sm:$0xff]   ;;  %v12831_v58 = vld [vmem:[%s13958_s18 + $0x914] ss:$8 sps:$4 sm:$0xff]  }
  0x79   : > { %v12825_v57 = vld [vmem:[%s13958_s18 + $0x200] ss:$8 sps:$4 sm:$0xff]  }
  0x7a   : > { %6782 = vmatpush1.bf16.msra.mxu0 %v12736_v61  ;;  %v12832_v61 = vld [vmem:[%s13958_s18 + $0x210] ss:$8 sps:$4 sm:$0xff]  }
  0x7b   : > { %5711 = vmatpush1.bf16.msra.mxu1 %v12733_v60  ;;  %6783 = vmatprep.subr.bf16.mxu0 %v12750_v1  ;;  %v12829_v60 = vld [vmem:[%s13958_s18 + $0x910] ss:$8 sps:$4 sm:$0xff]   ;;  %v12845_v1 = vld [vmem:[%s13958_s18 + $0x224] ss:$8 sps:$4 sm:$0xff]  }
  0x7c   : > { %5712 = vmatprep.subr.bf16.mxu1 %v12746_v0  ;;  %5622 = vmatmul.mubr.bf16.gmra.mrb[20].mxu1 %v12674_v62  ;;  %v12803_v62 = vld [vmem:[%s16608_s2 + $0x100] ss:$124 sps:$4 sm:$0xff]   ;;  %v12837_v0 = vld [vmem:[%s13958_s18 + $0x924] ss:$8 sps:$4 sm:$0xff]  }
  0x7d   : > { %6693 = vmatmul.mubr.bf16.gmra.mrb[20].mxu0 %v12678_v63  ;;  %5631 = vmatprep.mubr.bf16.mxu1 %v12685_v2  ;;  %v12804_v63 = vld [vmem:[%s16608_s2 + $0x138] ss:$124 sps:$4 sm:$0xff]  }
  0x7e   : > { %6702 = vmatprep.mubr.bf16.mxu0 %v12687_v3  ;;  %6784 = vmatpush1.bf16.msra.mxu0 %v12748_v5  ;;  %v12805_v2 = vld [vmem:[%s16608_s2 + $0x1fc] ss:$124 sps:$4 sm:$0xff]   ;;  %v12807_v3 = vld [vmem:[%s16608_s2 + $0x234] ss:$124 sps:$4 sm:$0xff]   ;;  %v12843_v5 = vld [vmem:[%s13958_s18 + $0x220] ss:$8 sps:$4 sm:$0xff]  }
  0x7f   : > { %5713 = vmatpush1.bf16.msra.mxu1 %v12744_v4  ;;  %6785 = vmatprep.subr.bf16.mxu0 %v12756_v7  ;;  %v12835_v4 = vld [vmem:[%s13958_s18 + $0x920] ss:$8 sps:$4 sm:$0xff]   ;;  %v12852_v7 = vld [vmem:[%s13958_s18 + $0x934] ss:$8 sps:$4 sm:$0xff]  }
  0x80   : > { %5714 = vmatprep.subr.bf16.mxu1 %v12753_v6  ;;  %v12849_v6 = vld [vmem:[%s13958_s18 + $0x234] ss:$8 sps:$4 sm:$0xff]  }
  0x82   : > { %6786 = vmatpush1.bf16.msra.mxu0 %v12754_v9  ;;  %v12850_v9 = vld [vmem:[%s13958_s18 + $0x930] ss:$8 sps:$4 sm:$0xff]  }
  0x83   : > { %5715 = vmatpush1.bf16.msra.mxu1 %v12751_v8  ;;  %6787 = vmatprep.subr.bf16.mxu0 %v12768_v13  ;;  %v12847_v8 = vld [vmem:[%s13958_s18 + $0x230] ss:$8 sps:$4 sm:$0xff]   ;;  %v12864_v13 = vld [vmem:[%s13958_s18 + $0x944] ss:$8 sps:$4 sm:$0xff]  }
  0x84   : > { %5716 = vmatprep.subr.bf16.mxu1 %v12764_v12  ;;  %5632 = vmatmul.mubr.bf16.gmra.mrb[24].mxu1 %v12689_v10  ;;  %v12809_v10 = vld [vmem:[%s16608_s2 + $0x1f8] ss:$124 sps:$4 sm:$0xff]   ;;  %v12860_v12 = vld [vmem:[%s13958_s18 + $0x244] ss:$8 sps:$4 sm:$0xff]  }
  0x85   : > { %6703 = vmatmul.mubr.bf16.gmra.mrb[24].mxu0 %v12693_v11  ;;  %5641 = vmatprep.mubr.bf16.mxu1 %v12703_v14  ;;  %v12810_v11 = vld [vmem:[%s16608_s2 + $0x230] ss:$124 sps:$4 sm:$0xff]  }
  0x86   : > { %6712 = vmatprep.mubr.bf16.mxu0 %v12705_v15  ;;  %6788 = vmatpush1.bf16.msra.mxu0 %v12766_v17  ;;  %v12811_v14 = vld [vmem:[%s16608_s2 + $0x2f4] ss:$124 sps:$4 sm:$0xff]   ;;  %v12813_v15 = vld [vmem:[%s16608_s2 + $0x32c] ss:$124 sps:$4 sm:$0xff]  }
  0x87   : > { %5717 = vmatpush1.bf16.msra.mxu1 %v12762_v16  ;;  %6789 = vmatprep.subr.bf16.mxu0 %v12774_v19  ;;  %v12858_v16 = vld [vmem:[%s13958_s18 + $0x240] ss:$8 sps:$4 sm:$0xff]   ;;  %v12870_v19 = vld [vmem:[%s13958_s18 + $0x954] ss:$8 sps:$4 sm:$0xff]  }
  0x88   : > { %5718 = vmatprep.subr.bf16.mxu1 %v12771_v18  ;;  %v12862_v17 = vld [vmem:[%s13958_s18 + $0x940] ss:$8 sps:$4 sm:$0xff]   ;;  %v12867_v18 = vld [vmem:[%s13958_s18 + $0x254] ss:$8 sps:$4 sm:$0xff]  }
  0x8a   : > { %6790 = vmatpush1.bf16.msra.mxu0 %v12772_v23  ;;  %v12816_v23 = vld [vmem:[%s16608_s2 + $0x328] ss:$124 sps:$4 sm:$0xff]  }
  0x8b   : > { %5719 = vmatpush1.bf16.msra.mxu1 %v12769_v20  ;;  %6791 = vmatprep.subr.bf16.mxu0 %v12786_v25  ;;  %v12865_v20 = vld [vmem:[%s13958_s18 + $0x250] ss:$8 sps:$4 sm:$0xff]   ;;  %v12882_v25 = vld [vmem:[%s13958_s18 + $0x964] ss:$8 sps:$4 sm:$0xff]  }
  0x8c   : > { %5720 = vmatprep.subr.bf16.mxu1 %v12782_v24  ;;  %5642 = vmatmul.mubr.bf16.gmra.mrb[28].mxu1 %v12707_v21  ;;  %v12868_v21 = vld [vmem:[%s13958_s18 + $0x950] ss:$8 sps:$4 sm:$0xff]   ;;  %v12878_v24 = vld [vmem:[%s13958_s18 + $0x264] ss:$8 sps:$4 sm:$0xff]  }
  0x8d   : > { %6713 = vmatmul.mubr.bf16.gmra.mrb[28].mxu0 %v12711_v22  ;;  %5651 = vmatprep.mubr.bf16.mxu1 %v12721_v26  ;;  %v12815_v22 = vld [vmem:[%s16608_s2 + $0x2f0] ss:$124 sps:$4 sm:$0xff]  }
  0x8e   : > { %6722 = vmatprep.mubr.bf16.mxu0 %v12723_v27  ;;  %6792 = vmatpush1.bf16.msra.mxu0 %v12784_v29  ;;  %v12820_v26 = vld [vmem:[%s16608_s2 + $0x3ec] ss:$124 sps:$4 sm:$0xff]   ;;  %v12822_v27 = vld [vmem:[%s16608_s2 + $0x424] ss:$124 sps:$4 sm:$0xff]  }
  0x8f   : > { %5721 = vmatpush1.bf16.msra.mxu1 %v12780_v28  ;;  %6793 = vmatprep.subr.bf16.mxu0 %v12792_v31  ;;  %v12876_v28 = vld [vmem:[%s13958_s18 + $0x260] ss:$8 sps:$4 sm:$0xff]   ;;  %v12888_v31 = vld [vmem:[%s13958_s18 + $0x974] ss:$8 sps:$4 sm:$0xff]  }
  0x90   : > { %5722 = vmatprep.subr.bf16.mxu1 %v12789_v30  ;;  %v12880_v29 = vld [vmem:[%s13958_s18 + $0x960] ss:$8 sps:$4 sm:$0xff]   ;;  %v12885_v30 = vld [vmem:[%s13958_s18 + $0x274] ss:$8 sps:$4 sm:$0xff]  }
  0x92   : > { %6794 = vmatpush1.bf16.msra.mxu0 %v12790_v33  ;;  %v12824_v33 = vld [vmem:[%s16608_s2 + $0x3e8] ss:$124 sps:$4 sm:$0xff]  }
  0x93   : > { %5723 = vmatpush1.bf16.msra.mxu1 %v12787_v32  ;;  %6916 = vmatprep.subr.bf16.mxu0 %v12819_v34  ;;  %v12883_v32 = vld [vmem:[%s13958_s18 + $0x270] ss:$8 sps:$4 sm:$0xff]   ;;  %v12828_v34 = vld [vmem:[%s16608_s2 + $0x420] ss:$124 sps:$4 sm:$0xff]  }
  0x94   : > { %5845 = vmatprep.subr.bf16.mxu1 %v12827_v35  ;;  %5652 = vmatmul.mubr.bf16.gmra.mrb[32].mxu1 %v12725_v36  ;;  %v12886_v35 = vld [vmem:[%s13958_s18 + $0x970] ss:$8 sps:$4 sm:$0xff]   ;;  %v12896_v36 = vld [vmem:[%s13958_s18 + $0x284] ss:$8 sps:$4 sm:$0xff]  }
  0x95   : > { %6723 = vmatmul.mubr.bf16.gmra.mrb[32].mxu0 %v12729_v37  ;;  %5661 = vmatprep.mubr.bf16.mxu1 %v12739_v38  ;;  %v12900_v37 = vld [vmem:[%s13958_s18 + $0x984] ss:$8 sps:$4 sm:$0xff]  }
  0x96   : > { %6732 = vmatprep.mubr.bf16.mxu0 %v12741_v39  ;;  %v12838_v38 = vld [vmem:[%s16608_s2 + $0x4e4] ss:$124 sps:$4 sm:$0xff]   ;;  %v12840_v39 = vld [vmem:[%s16608_s2 + $0x51c] ss:$124 sps:$4 sm:$0xff]  }
  0x9c   : > { %5662 = vmatmul.mubr.bf16.gmra.mrb[36].mxu1 %v12743_v40  ;;  %v12894_v40 = vld [vmem:[%s13958_s18 + $0x280] ss:$8 sps:$4 sm:$0xff]  }
  0x9d   : > { %6733 = vmatmul.mubr.bf16.gmra.mrb[36].mxu0 %v12747_v41  ;;  %5671 = vmatprep.mubr.bf16.mxu1 %v12757_v42  ;;  %v12898_v41 = vld [vmem:[%s13958_s18 + $0x980] ss:$8 sps:$4 sm:$0xff]   ;;  %v12903_v42 = vld [vmem:[%s13958_s18 + $0x294] ss:$8 sps:$4 sm:$0xff]  }
  0x9e   : > { %6742 = vmatprep.mubr.bf16.mxu0 %v12759_v43  ;;  %v12906_v43 = vld [vmem:[%s13958_s18 + $0x994] ss:$8 sps:$4 sm:$0xff]  }
  0xa4   : > { %5672 = vmatmul.mubr.bf16.gmra.mrb[40].mxu1 %v12761_v44  ;;  %v12901_v44 = vld [vmem:[%s13958_s18 + $0x290] ss:$8 sps:$4 sm:$0xff]  }
  0xa5   : > { %6743 = vmatmul.mubr.bf16.gmra.mrb[40].mxu0 %v12765_v45  ;;  %5681 = vmatprep.mubr.bf16.mxu1 %v12775_v46  ;;  %v12904_v45 = vld [vmem:[%s13958_s18 + $0x990] ss:$8 sps:$4 sm:$0xff]   ;;  %v12842_v46 = vld [vmem:[%s16608_s2 + $0x4e0] ss:$124 sps:$4 sm:$0xff]  }
  0xa6   : > { %6752 = vmatprep.mubr.bf16.mxu0 %v12777_v47  ;;  %v12846_v47 = vld [vmem:[%s16608_s2 + $0x518] ss:$124 sps:$4 sm:$0xff]  }
  0xac   : > { %5682 = vmatmul.mubr.bf16.gmra.mrb[44].mxu1 %v12779_v48  ;;  %v12914_v48 = vld [vmem:[%s13958_s18 + $0x2a4] ss:$8 sps:$4 sm:$0xff]  }
  0xad   : > { %6753 = vmatmul.mubr.bf16.gmra.mrb[44].mxu0 %v12783_v49  ;;  %5724 = vmatprep.mubr.bf16.mxu1 %v12795_v50  ;;  %v12918_v49 = vld [vmem:[%s13958_s18 + $0x9a4] ss:$8 sps:$4 sm:$0xff]   ;;  %v12853_v50 = vld [vmem:[%s16608_s2 + $0x5dc] ss:$124 sps:$4 sm:$0xff]  }
  0xae   : > { %6795 = vmatprep.mubr.bf16.mxu0 %v12798_v51  ;;  %v12855_v51 = vld [vmem:[%s16608_s2 + $0x614] ss:$124 sps:$4 sm:$0xff]  }
  0xb4   : > { %5725 = vmatmul.mubr.bf16.vlgmr.msra.gmra.mrb[0].mxu1 %v12793_v52  ;;  %v12912_v52 = vld [vmem:[%s13958_s18 + $0x2a0] ss:$8 sps:$4 sm:$0xff]  }
  0xb5   : > { %6796 = vmatmul.mubr.bf16.vlgmr.msra.gmra.mrb[0].mxu0 %v12796_v53  ;;  %5734 = vmatprep.mubr.bf16.mxu1 %v12799_v54  ;;  %v12916_v53 = vld [vmem:[%s13958_s18 + $0x9a0] ss:$8 sps:$4 sm:$0xff]   ;;  %v12921_v54 = vld [vmem:[%s13958_s18 + $0x2b4] ss:$8 sps:$4 sm:$0xff]  }
  0xb6   : > { %6805 = vmatprep.mubr.bf16.mxu0 %v12801_v55  ;;  %6917 = vmatpush1.bf16.msra.mxu0 %v12817_v56  ;;  %v12924_v55 = vld [vmem:[%s13958_s18 + $0x9b4] ss:$8 sps:$4 sm:$0xff]   ;;  %v12919_v56 = vld [vmem:[%s13958_s18 + $0x2b0] ss:$8 sps:$4 sm:$0xff]  }
  0xb7   : > { %5846 = vmatpush1.bf16.msra.mxu1 %v12825_v57  ;;  %6918 = vmatprep.subr.bf16.mxu0 %v12831_v58  ;;  %v12922_v57 = vld [vmem:[%s13958_s18 + $0x9b0] ss:$8 sps:$4 sm:$0xff]  }
  0xb8   : > { %5847 = vmatprep.subr.bf16.mxu1 %v12834_v59  ;;  %v12857_v58 = vld [vmem:[%s16608_s2 + $0x5d8] ss:$124 sps:$4 sm:$0xff]   ;;  %v12861_v59 = vld [vmem:[%s16608_s2 + $0x610] ss:$124 sps:$4 sm:$0xff]  }
  0xba   : > { %6919 = vmatpush1.bf16.msra.mxu0 %v12829_v60  ;;  %v12932_v60 = vld [vmem:[%s13958_s18 + $0x2c4] ss:$8 sps:$4 sm:$0xff]  }
  0xbb   : > { %5848 = vmatpush1.bf16.msra.mxu1 %v12832_v61  ;;  %6920 = vmatprep.subr.bf16.mxu0 %v12837_v0  ;;  %v12936_v61 = vld [vmem:[%s13958_s18 + $0x9c4] ss:$8 sps:$4 sm:$0xff]   ;;  %v12930_v0 = vld [vmem:[%s13958_s18 + $0x2c0] ss:$8 sps:$4 sm:$0xff]  }
  0xbc   : > { %5849 = vmatprep.subr.bf16.mxu1 %v12845_v1  ;;  %5735 = vmatmul.mubr.bf16.gmra.mrb[4].mxu1 %v12803_v62  ;;  %v12871_v62 = vld [vmem:[%s16608_s2 + $0x6d4] ss:$124 sps:$4 sm:$0xff]   ;;  %v12934_v1 = vld [vmem:[%s13958_s18 + $0x9c0] ss:$8 sps:$4 sm:$0xff]  }
  0xbd   : > { %6806 = vmatmul.mubr.bf16.gmra.mrb[4].mxu0 %v12804_v63  ;;  %5744 = vmatprep.mubr.bf16.mxu1 %v12805_v2  ;;  %v12873_v63 = vld [vmem:[%s16608_s2 + $0x70c] ss:$124 sps:$4 sm:$0xff]   ;;  %v12939_v2 = vld [vmem:[%s13958_s18 + $0x2d4] ss:$8 sps:$4 sm:$0xff]  }
  0xbe   : > { %6815 = vmatprep.mubr.bf16.mxu0 %v12807_v3  ;;  %6921 = vmatpush1.bf16.msra.mxu0 %v12835_v4  ;;  %v12942_v3 = vld [vmem:[%s13958_s18 + $0x9d4] ss:$8 sps:$4 sm:$0xff]   ;;  %v12937_v4 = vld [vmem:[%s13958_s18 + $0x2d0] ss:$8 sps:$4 sm:$0xff]  }
  0xbf   : > { %5850 = vmatpush1.bf16.msra.mxu1 %v12843_v5  ;;  %6922 = vmatprep.subr.bf16.mxu0 %v12852_v7  ;;  %v12875_v5 = vld [vmem:[%s16608_s2 + $0x6d0] ss:$124 sps:$4 sm:$0xff]  }
  0xc0   : > { %5851 = vmatprep.subr.bf16.mxu1 %v12849_v6  ;;  %v12879_v6 = vld [vmem:[%s16608_s2 + $0x708] ss:$124 sps:$4 sm:$0xff]   ;;  %v12940_v7 = vld [vmem:[%s13958_s18 + $0x9d0] ss:$8 sps:$4 sm:$0xff]  }
  0xc2   : > { %6923 = vmatpush1.bf16.msra.mxu0 %v12850_v9  ;;  %v12954_v9 = vld [vmem:[%s13958_s18 + $0x9e4] ss:$8 sps:$4 sm:$0xff]  }
  0xc3   : > { %5852 = vmatpush1.bf16.msra.mxu1 %v12847_v8  ;;  %6924 = vmatprep.subr.bf16.mxu0 %v12864_v13  ;;  %v12950_v8 = vld [vmem:[%s13958_s18 + $0x2e4] ss:$8 sps:$4 sm:$0xff]   ;;  %v12952_v13 = vld [vmem:[%s13958_s18 + $0x9e0] ss:$8 sps:$4 sm:$0xff]  }
  0xc4   : > { %5853 = vmatprep.subr.bf16.mxu1 %v12860_v12  ;;  %5745 = vmatmul.mubr.bf16.gmra.mrb[8].mxu1 %v12809_v10  ;;  %v12889_v10 = vld [vmem:[%s16608_s2 + $0x7cc] ss:$124 sps:$4 sm:$0xff]  }
  0xc5   : > { %6816 = vmatmul.mubr.bf16.gmra.mrb[8].mxu0 %v12810_v11  ;;  %5754 = vmatprep.mubr.bf16.mxu1 %v12811_v14  ;;  %v12891_v11 = vld [vmem:[%s16608_s2 + $0x804] ss:$124 sps:$4 sm:$0xff]   ;;  %v12957_v14 = vld [vmem:[%s13958_s18 + $0x2f4] ss:$8 sps:$4 sm:$0xff]  }
  0xc6   : > { %6825 = vmatprep.mubr.bf16.mxu0 %v12813_v15  ;;  %6925 = vmatpush1.bf16.msra.mxu0 %v12862_v17  ;;  %v12948_v12 = vld [vmem:[%s13958_s18 + $0x2e0] ss:$8 sps:$4 sm:$0xff]   ;;  %v12960_v15 = vld [vmem:[%s13958_s18 + $0x9f4] ss:$8 sps:$4 sm:$0xff]   ;;  %v12958_v17 = vld [vmem:[%s13958_s18 + $0x9f0] ss:$8 sps:$4 sm:$0xff]  }
  0xc7   : > { %5854 = vmatpush1.bf16.msra.mxu1 %v12858_v16  ;;  %6926 = vmatprep.subr.bf16.mxu0 %v12870_v19  ;;  %v12955_v16 = vld [vmem:[%s13958_s18 + $0x2f0] ss:$8 sps:$4 sm:$0xff]   ;;  %v12995_v19 = vld [vmem:[%s13958_s18 + $0x304] ss:$8 sps:$4 sm:$0xff]  }
  0xc8   : > { %5855 = vmatprep.subr.bf16.mxu1 %v12867_v18  ;;  %v12987_v18 = vld [vmem:[%s13958_s18 + $0xa04] ss:$8 sps:$4 sm:$0xff]  }
  0xca   : > { %6927 = vmatpush1.bf16.msra.mxu0 %v12868_v21  ;;  %v12897_v21 = vld [vmem:[%s16608_s2 + $0x800] ss:$124 sps:$4 sm:$0xff]  }
  0xcb   : > { %5856 = vmatpush1.bf16.msra.mxu1 %v12865_v20  ;;  %6928 = vmatprep.subr.bf16.mxu0 %v12882_v25  ;;  %v12893_v20 = vld [vmem:[%s16608_s2 + $0x7c8] ss:$124 sps:$4 sm:$0xff]   ;;  %v12915_v25 = vld [vmem:[%s16608_s2 + $0x8f8] ss:$124 sps:$4 sm:$0xff]  }
  0xcc   : > { %5857 = vmatprep.subr.bf16.mxu1 %v12878_v24  ;;  %5755 = vmatmul.mubr.bf16.gmra.mrb[12].mxu1 %v12815_v22  ;;  %v12907_v22 = vld [vmem:[%s16608_s2 + $0x8c4] ss:$124 sps:$4 sm:$0xff]  }
  0xcd   : > { %6826 = vmatmul.mubr.bf16.gmra.mrb[12].mxu0 %v12816_v23  ;;  %5764 = vmatprep.mubr.bf16.mxu1 %v12820_v26  ;;  %v12909_v23 = vld [vmem:[%s16608_s2 + $0x8fc] ss:$124 sps:$4 sm:$0xff]  }
  0xce   : > { %6835 = vmatprep.mubr.bf16.mxu0 %v12822_v27  ;;  %6929 = vmatpush1.bf16.msra.mxu0 %v12880_v29  ;;  %v12911_v24 = vld [vmem:[%s16608_s2 + $0x8c0] ss:$124 sps:$4 sm:$0xff]   ;;  %v12927_v27 = vld [vmem:[%s16608_s2 + $0x9f4] ss:$124 sps:$4 sm:$0xff]  }
  0xcf   : > { %5858 = vmatpush1.bf16.msra.mxu1 %v12876_v28  ;;  %6930 = vmatprep.subr.bf16.mxu0 %v12888_v31  ;;  %v12925_v26 = vld [vmem:[%s16608_s2 + $0x9bc] ss:$124 sps:$4 sm:$0xff]   ;;  %v12933_v29 = vld [vmem:[%s16608_s2 + $0x9f0] ss:$124 sps:$4 sm:$0xff]  }
  0xd0   : > { %5859 = vmatprep.subr.bf16.mxu1 %v12885_v30  ;;  %v12929_v28 = vld [vmem:[%s16608_s2 + $0x9b8] ss:$124 sps:$4 sm:$0xff]   ;;  %v12945_v31 = vld [vmem:[%s16608_s2 + $0xaec] ss:$124 sps:$4 sm:$0xff]  }
  0xd1   : > { %v12943_v30 = vld [vmem:[%s16608_s2 + $0xab4] ss:$124 sps:$4 sm:$0xff]  }
  0xd2   : > { %6931 = vmatpush1.bf16.msra.mxu0 %v12886_v35  ;;  %v12966_v35 = vld [vmem:[%s16608_s2 + $0x4c] ss:$124 sps:$4 sm:$0xff]  }
  0xd3   : > { %5860 = vmatpush1.bf16.msra.mxu1 %v12883_v32  ;;  %6932 = vmatprep.subr.bf16.mxu0 %v12900_v37  ;;  %v12947_v32 = vld [vmem:[%s16608_s2 + $0xab0] ss:$124 sps:$4 sm:$0xff]   ;;  %v12964_v37 = vld [vmem:[%s16608_s2 + $0x48] ss:$124 sps:$4 sm:$0xff]  }
  0xd4   : > { %5861 = vmatprep.subr.bf16.mxu1 %v12896_v36  ;;  %5765 = vmatmul.mubr.bf16.gmra.mrb[16].mxu1 %v12824_v33  ;;  %v12951_v33 = vld [vmem:[%s16608_s2 + $0xae8] ss:$124 sps:$4 sm:$0xff]   ;;  %v12961_v36 = vld [vmem:[%s16608_s2 + $0x10] ss:$124 sps:$4 sm:$0xff]  }
  0xd5   : > { %6836 = vmatmul.mubr.bf16.gmra.mrb[16].mxu0 %v12828_v34  ;;  %5774 = vmatprep.mubr.bf16.mxu1 %v12838_v38  ;;  %v12963_v34 = vld [vmem:[%s16608_s2 + $0x14] ss:$124 sps:$4 sm:$0xff]   ;;  %v12967_v38 = vld [vmem:[%s16608_s2 + $0x10c] ss:$124 sps:$4 sm:$0xff]  }
  0xd6   : > { %6845 = vmatprep.mubr.bf16.mxu0 %v12840_v39  ;;  %6933 = vmatpush1.bf16.msra.mxu0 %v12898_v41  ;;  %v12969_v39 = vld [vmem:[%s16608_s2 + $0x144] ss:$124 sps:$4 sm:$0xff]  }
  0xd7   : > { %5862 = vmatpush1.bf16.msra.mxu1 %v12894_v40  ;;  %6934 = vmatprep.subr.bf16.mxu0 %v12906_v43  ;;  %v12985_v40 = vld [vmem:[%s13958_s18 + $0xa00] ss:$8 sps:$4 sm:$0xff]   ;;  %v13002_v43 = vld [vmem:[%s13958_s18 + $0x314] ss:$8 sps:$4 sm:$0xff]  }
  0xd8   : > { %5863 = vmatprep.subr.bf16.mxu1 %v12903_v42  ;;  %v12993_v41 = vld [vmem:[%s13958_s18 + $0x300] ss:$8 sps:$4 sm:$0xff]   ;;  %v12999_v42 = vld [vmem:[%s13958_s18 + $0xa14] ss:$8 sps:$4 sm:$0xff]  }
  0xda   : > { %6935 = vmatpush1.bf16.msra.mxu0 %v12904_v45  ;;  %v13000_v45 = vld [vmem:[%s13958_s18 + $0x310] ss:$8 sps:$4 sm:$0xff]  }
  0xdb   : > { %5864 = vmatpush1.bf16.msra.mxu1 %v12901_v44  ;;  %6936 = vmatprep.subr.bf16.mxu0 %v12918_v49  ;;  %v12997_v44 = vld [vmem:[%s13958_s18 + $0xa10] ss:$8 sps:$4 sm:$0xff]   ;;  %v13013_v49 = vld [vmem:[%s13958_s18 + $0x324] ss:$8 sps:$4 sm:$0xff]  }
  0xdc   : > { %5865 = vmatprep.subr.bf16.mxu1 %v12914_v48  ;;  %5775 = vmatmul.mubr.bf16.gmra.mrb[20].mxu1 %v12842_v46  ;;  %v12971_v46 = vld [vmem:[%s16608_s2 + $0x108] ss:$124 sps:$4 sm:$0xff]  }
  0xdd   : > { %6846 = vmatmul.mubr.bf16.gmra.mrb[20].mxu0 %v12846_v47  ;;  %5784 = vmatprep.mubr.bf16.mxu1 %v12853_v50  ;;  %v12972_v47 = vld [vmem:[%s16608_s2 + $0x140] ss:$124 sps:$4 sm:$0xff]   ;;  %v13005_v48 = vld [vmem:[%s13958_s18 + $0xa24] ss:$8 sps:$4 sm:$0xff]  }
  0xde   : > { %6855 = vmatprep.mubr.bf16.mxu0 %v12855_v51  ;;  %6937 = vmatpush1.bf16.msra.mxu0 %v12916_v53  ;;  %v12973_v50 = vld [vmem:[%s16608_s2 + $0x204] ss:$124 sps:$4 sm:$0xff]   ;;  %v12975_v51 = vld [vmem:[%s16608_s2 + $0x23c] ss:$124 sps:$4 sm:$0xff]  }
  0xdf   : > { %5866 = vmatpush1.bf16.msra.mxu1 %v12912_v52  ;;  %6938 = vmatprep.subr.bf16.mxu0 %v12924_v55  ;;  %v13003_v52 = vld [vmem:[%s13958_s18 + $0xa20] ss:$8 sps:$4 sm:$0xff]   ;;  %v13020_v55 = vld [vmem:[%s13958_s18 + $0xa34] ss:$8 sps:$4 sm:$0xff]  }
  0xe0   : > { %5867 = vmatprep.subr.bf16.mxu1 %v12921_v54  ;;  %v13011_v53 = vld [vmem:[%s13958_s18 + $0x320] ss:$8 sps:$4 sm:$0xff]   ;;  %v13017_v54 = vld [vmem:[%s13958_s18 + $0x334] ss:$8 sps:$4 sm:$0xff]  }
  0xe2   : > { %6939 = vmatpush1.bf16.msra.mxu0 %v12922_v57  ;;  %v12977_v57 = vld [vmem:[%s16608_s2 + $0x200] ss:$124 sps:$4 sm:$0xff]  }
  0xe3   : > { %5868 = vmatpush1.bf16.msra.mxu1 %v12919_v56  ;;  %6940 = vmatprep.subr.bf16.mxu0 %v12936_v61  ;;  %v13015_v56 = vld [vmem:[%s13958_s18 + $0x330] ss:$8 sps:$4 sm:$0xff]   ;;  %v13032_v61 = vld [vmem:[%s13958_s18 + $0xa44] ss:$8 sps:$4 sm:$0xff]  }
  0xe4   : > { %5869 = vmatprep.subr.bf16.mxu1 %v12932_v60  ;;  %5785 = vmatmul.mubr.bf16.gmra.mrb[24].mxu1 %v12857_v58  ;;  %v12978_v58 = vld [vmem:[%s16608_s2 + $0x238] ss:$124 sps:$4 sm:$0xff]   ;;  %v13028_v60 = vld [vmem:[%s13958_s18 + $0x344] ss:$8 sps:$4 sm:$0xff]  }
  0xe5   : > { %6856 = vmatmul.mubr.bf16.gmra.mrb[24].mxu0 %v12861_v59  ;;  %5794 = vmatprep.mubr.bf16.mxu1 %v12871_v62  ;;  %v13018_v59 = vld [vmem:[%s13958_s18 + $0xa30] ss:$8 sps:$4 sm:$0xff]  }
  0xe6   : > { %6865 = vmatprep.mubr.bf16.mxu0 %v12873_v63  ;;  %6941 = vmatpush1.bf16.msra.mxu0 %v12934_v1  ;;  %v12979_v62 = vld [vmem:[%s16608_s2 + $0x2fc] ss:$124 sps:$4 sm:$0xff]   ;;  %v12981_v63 = vld [vmem:[%s16608_s2 + $0x334] ss:$124 sps:$4 sm:$0xff]   ;;  %v13030_v1 = vld [vmem:[%s13958_s18 + $0xa40] ss:$8 sps:$4 sm:$0xff]  }
  0xe7   : > { %5870 = vmatpush1.bf16.msra.mxu1 %v12930_v0  ;;  %6942 = vmatprep.subr.bf16.mxu0 %v12942_v3  ;;  %v13026_v0 = vld [vmem:[%s13958_s18 + $0x340] ss:$8 sps:$4 sm:$0xff]   ;;  %v13038_v3 = vld [vmem:[%s13958_s18 + $0xa54] ss:$8 sps:$4 sm:$0xff]  }
  0xe8   : > { %5871 = vmatprep.subr.bf16.mxu1 %v12939_v2  ;;  %v13035_v2 = vld [vmem:[%s13958_s18 + $0x354] ss:$8 sps:$4 sm:$0xff]  }
  0xea   : > { %6943 = vmatpush1.bf16.msra.mxu0 %v12940_v7  ;;  %v12984_v7 = vld [vmem:[%s16608_s2 + $0x330] ss:$124 sps:$4 sm:$0xff]  }
  0xeb   : > { %5872 = vmatpush1.bf16.msra.mxu1 %v12937_v4  ;;  %6944 = vmatprep.subr.bf16.mxu0 %v12954_v9  ;;  %v13033_v4 = vld [vmem:[%s13958_s18 + $0x350] ss:$8 sps:$4 sm:$0xff]   ;;  %v13050_v9 = vld [vmem:[%s13958_s18 + $0xa64] ss:$8 sps:$4 sm:$0xff]  }
  0xec   : > { %5873 = vmatprep.subr.bf16.mxu1 %v12950_v8  ;;  %5795 = vmatmul.mubr.bf16.gmra.mrb[28].mxu1 %v12875_v5  ;;  %v13036_v5 = vld [vmem:[%s13958_s18 + $0xa50] ss:$8 sps:$4 sm:$0xff]   ;;  %v13046_v8 = vld [vmem:[%s13958_s18 + $0x364] ss:$8 sps:$4 sm:$0xff]  }
  0xed   : > { %6866 = vmatmul.mubr.bf16.gmra.mrb[28].mxu0 %v12879_v6  ;;  %5804 = vmatprep.mubr.bf16.mxu1 %v12889_v10  ;;  %v12983_v6 = vld [vmem:[%s16608_s2 + $0x2f8] ss:$124 sps:$4 sm:$0xff]  }
  0xee   : > { %6875 = vmatprep.mubr.bf16.mxu0 %v12891_v11  ;;  %6945 = vmatpush1.bf16.msra.mxu0 %v12952_v13  ;;  %v12988_v10 = vld [vmem:[%s16608_s2 + $0x3f4] ss:$124 sps:$4 sm:$0xff]   ;;  %v12990_v11 = vld [vmem:[%s16608_s2 + $0x42c] ss:$124 sps:$4 sm:$0xff]  }
  0xef   : > { %5874 = vmatpush1.bf16.msra.mxu1 %v12948_v12  ;;  %6946 = vmatprep.subr.bf16.mxu0 %v12960_v15  ;;  %v13044_v12 = vld [vmem:[%s13958_s18 + $0x360] ss:$8 sps:$4 sm:$0xff]   ;;  %v13056_v15 = vld [vmem:[%s13958_s18 + $0xa74] ss:$8 sps:$4 sm:$0xff]  }
  0xf0   : > { %5875 = vmatprep.subr.bf16.mxu1 %v12957_v14  ;;  %v13048_v13 = vld [vmem:[%s13958_s18 + $0xa60] ss:$8 sps:$4 sm:$0xff]   ;;  %v13053_v14 = vld [vmem:[%s13958_s18 + $0x374] ss:$8 sps:$4 sm:$0xff]  }
  0xf2   : > { %6947 = vmatpush1.bf16.msra.mxu0 %v12958_v17  ;;  %v13054_v17 = vld [vmem:[%s13958_s18 + $0xa70] ss:$8 sps:$4 sm:$0xff]  }
  0xf3   : > { %5876 = vmatpush1.bf16.msra.mxu1 %v12955_v16  ;;  %7069 = vmatprep.subr.bf16.mxu0 %v12987_v18  ;;  %v13051_v16 = vld [vmem:[%s13958_s18 + $0x370] ss:$8 sps:$4 sm:$0xff]  }
  0xf4   : > { %5998 = vmatprep.subr.bf16.mxu1 %v12995_v19  ;;  %5805 = vmatmul.mubr.bf16.gmra.mrb[32].mxu1 %v12893_v20  ;;  %v12992_v18 = vld [vmem:[%s16608_s2 + $0x3f0] ss:$124 sps:$4 sm:$0xff]   ;;  %v12996_v19 = vld [vmem:[%s16608_s2 + $0x428] ss:$124 sps:$4 sm:$0xff]  }
  0xf5   : > { %6876 = vmatmul.mubr.bf16.gmra.mrb[32].mxu0 %v12897_v21  ;;  %5814 = vmatprep.mubr.bf16.mxu1 %v12907_v22  ;;  %v13064_v20 = vld [vmem:[%s13958_s18 + $0x384] ss:$8 sps:$4 sm:$0xff]  }
  0xf6   : > { %6885 = vmatprep.mubr.bf16.mxu0 %v12909_v23  ;;  %v13068_v21 = vld [vmem:[%s13958_s18 + $0xa84] ss:$8 sps:$4 sm:$0xff]  }
  0xf7   : > { %v13006_v22 = vld [vmem:[%s16608_s2 + $0x4ec] ss:$124 sps:$4 sm:$0xff]   ;;  %v13008_v23 = vld [vmem:[%s16608_s2 + $0x524] ss:$124 sps:$4 sm:$0xff]  }
  0xfc   : > { %5815 = vmatmul.mubr.bf16.gmra.mrb[36].mxu1 %v12911_v24  ;;  %v13062_v24 = vld [vmem:[%s13958_s18 + $0x380] ss:$8 sps:$4 sm:$0xff]  }
  0xfd   : > { %6886 = vmatmul.mubr.bf16.gmra.mrb[36].mxu0 %v12915_v25  ;;  %5824 = vmatprep.mubr.bf16.mxu1 %v12925_v26  ;;  %v13066_v25 = vld [vmem:[%s13958_s18 + $0xa80] ss:$8 sps:$4 sm:$0xff]   ;;  %v13071_v26 = vld [vmem:[%s13958_s18 + $0x394] ss:$8 sps:$4 sm:$0xff]  }
  0xfe   : > { %6895 = vmatprep.mubr.bf16.mxu0 %v12927_v27  ;;  %v13074_v27 = vld [vmem:[%s13958_s18 + $0xa94] ss:$8 sps:$4 sm:$0xff]  }
 0x104   : > { %5825 = vmatmul.mubr.bf16.gmra.mrb[40].mxu1 %v12929_v28  ;;  %v13069_v28 = vld [vmem:[%s13958_s18 + $0x390] ss:$8 sps:$4 sm:$0xff]  }
 0x105   : > { %6896 = vmatmul.mubr.bf16.gmra.mrb[40].mxu0 %v12933_v29  ;;  %5834 = vmatprep.mubr.bf16.mxu1 %v12943_v30  ;;  %v13072_v29 = vld [vmem:[%s13958_s18 + $0xa90] ss:$8 sps:$4 sm:$0xff]   ;;  %v13010_v30 = vld [vmem:[%s16608_s2 + $0x4e8] ss:$124 sps:$4 sm:$0xff]  }
 0x106   : > { %6905 = vmatprep.mubr.bf16.mxu0 %v12945_v31  ;;  %v13014_v31 = vld [vmem:[%s16608_s2 + $0x520] ss:$124 sps:$4 sm:$0xff]  }
 0x10c   : > { %5835 = vmatmul.mubr.bf16.gmra.mrb[44].mxu1 %v12947_v32  ;;  %v13082_v32 = vld [vmem:[%s13958_s18 + $0x3a4] ss:$8 sps:$4 sm:$0xff]  }
 0x10d   : > { %6906 = vmatmul.mubr.bf16.gmra.mrb[44].mxu0 %v12951_v33  ;;  %5877 = vmatprep.mubr.bf16.mxu1 %v12963_v34  ;;  %v13086_v33 = vld [vmem:[%s13958_s18 + $0xaa4] ss:$8 sps:$4 sm:$0xff]  }
 0x10e   : > { %6948 = vmatprep.mubr.bf16.mxu0 %v12966_v35  ;;  %v13021_v34 = vld [vmem:[%s16608_s2 + $0x5e4] ss:$124 sps:$4 sm:$0xff]   ;;  %v13023_v35 = vld [vmem:[%s16608_s2 + $0x61c] ss:$124 sps:$4 sm:$0xff]  }
 0x114   : > { %5878 = vmatmul.mubr.bf16.vlgmr.msra.gmra.mrb[0].mxu1 %v12961_v36  ;;  %v13080_v36 = vld [vmem:[%s13958_s18 + $0x3a0] ss:$8 sps:$4 sm:$0xff]  }
 0x115   : > { %6949 = vmatmul.mubr.bf16.vlgmr.msra.gmra.mrb[0].mxu0 %v12964_v37  ;;  %5887 = vmatprep.mubr.bf16.mxu1 %v12967_v38  ;;  %v13084_v37 = vld [vmem:[%s13958_s18 + $0xaa0] ss:$8 sps:$4 sm:$0xff]   ;;  %v13089_v38 = vld [vmem:[%s13958_s18 + $0x3b4] ss:$8 sps:$4 sm:$0xff]  }
 0x116   : > { %6958 = vmatprep.mubr.bf16.mxu0 %v12969_v39  ;;  %7070 = vmatpush1.bf16.msra.mxu0 %v12985_v40  ;;  %v13092_v39 = vld [vmem:[%s13958_s18 + $0xab4] ss:$8 sps:$4 sm:$0xff]   ;;  %v13087_v40 = vld [vmem:[%s13958_s18 + $0x3b0] ss:$8 sps:$4 sm:$0xff]  }
 0x117   : > { %5999 = vmatpush1.bf16.msra.mxu1 %v12993_v41  ;;  %7071 = vmatprep.subr.bf16.mxu0 %v12999_v42  ;;  %v13090_v41 = vld [vmem:[%s13958_s18 + $0xab0] ss:$8 sps:$4 sm:$0xff]   ;;  %v13025_v42 = vld [vmem:[%s16608_s2 + $0x5e0] ss:$124 sps:$4 sm:$0xff]  }
 0x118   : > { %6000 = vmatprep.subr.bf16.mxu1 %v13002_v43  ;;  %v13029_v43 = vld [vmem:[%s16608_s2 + $0x618] ss:$124 sps:$4 sm:$0xff]  }
 0x11a   : > { %7072 = vmatpush1.bf16.msra.mxu0 %v12997_v44  ;;  %v13100_v44 = vld [vmem:[%s13958_s18 + $0x3c4] ss:$8 sps:$4 sm:$0xff]  }
 0x11b   : > { %6001 = vmatpush1.bf16.msra.mxu1 %v13000_v45  ;;  %7073 = vmatprep.subr.bf16.mxu0 %v13005_v48  ;;  %v13104_v45 = vld [vmem:[%s13958_s18 + $0xac4] ss:$8 sps:$4 sm:$0xff]   ;;  %v13098_v48 = vld [vmem:[%s13958_s18 + $0x3c0] ss:$8 sps:$4 sm:$0xff]  }
 0x11c   : > { %6002 = vmatprep.subr.bf16.mxu1 %v13013_v49  ;;  %5888 = vmatmul.mubr.bf16.gmra.mrb[4].mxu1 %v12971_v46  ;;  %v13039_v46 = vld [vmem:[%s16608_s2 + $0x6dc] ss:$124 sps:$4 sm:$0xff]   ;;  %v13102_v49 = vld [vmem:[%s13958_s18 + $0xac0] ss:$8 sps:$4 sm:$0xff]  }
 0x11d   : > { %6959 = vmatmul.mubr.bf16.gmra.mrb[4].mxu0 %v12972_v47  ;;  %5897 = vmatprep.mubr.bf16.mxu1 %v12973_v50  ;;  %v13041_v47 = vld [vmem:[%s16608_s2 + $0x714] ss:$124 sps:$4 sm:$0xff]  }
 0x11e   : > { %6968 = vmatprep.mubr.bf16.mxu0 %v12975_v51  ;;  %7074 = vmatpush1.bf16.msra.mxu0 %v13003_v52  ;;  %v13107_v50 = vld [vmem:[%s13958_s18 + $0x3d4] ss:$8 sps:$4 sm:$0xff]   ;;  %v13105_v52 = vld [vmem:[%s13958_s18 + $0x3d0] ss:$8 sps:$4 sm:$0xff]  }
 0x11f   : > { %6003 = vmatpush1.bf16.msra.mxu1 %v13011_v53  ;;  %7075 = vmatprep.subr.bf16.mxu0 %v13020_v55  ;;  %v13110_v51 = vld [vmem:[%s13958_s18 + $0xad4] ss:$8 sps:$4 sm:$0xff]   ;;  %v13108_v53 = vld [vmem:[%s13958_s18 + $0xad0] ss:$8 sps:$4 sm:$0xff]  }
 0x120   : > { %6004 = vmatprep.subr.bf16.mxu1 %v13017_v54  ;;  %v13043_v54 = vld [vmem:[%s16608_s2 + $0x6d8] ss:$124 sps:$4 sm:$0xff]   ;;  %v13047_v55 = vld [vmem:[%s16608_s2 + $0x710] ss:$124 sps:$4 sm:$0xff]  }
 0x122   : > { %7076 = vmatpush1.bf16.msra.mxu0 %v13018_v59  ;;  %v13059_v59 = vld [vmem:[%s16608_s2 + $0x80c] ss:$124 sps:$4 sm:$0xff]  }
 0x123   : > { %6005 = vmatpush1.bf16.msra.mxu1 %v13015_v56  ;;  %7077 = vmatprep.subr.bf16.mxu0 %v13032_v61  ;;  %v13118_v56 = vld [vmem:[%s13958_s18 + $0x3e4] ss:$8 sps:$4 sm:$0xff]   ;;  %v13120_v61 = vld [vmem:[%s13958_s18 + $0xae0] ss:$8 sps:$4 sm:$0xff]  }
 0x124   : > { %6006 = vmatprep.subr.bf16.mxu1 %v13028_v60  ;;  %5898 = vmatmul.mubr.bf16.gmra.mrb[8].mxu1 %v12977_v57  ;;  %v13122_v57 = vld [vmem:[%s13958_s18 + $0xae4] ss:$8 sps:$4 sm:$0xff]   ;;  %v13116_v60 = vld [vmem:[%s13958_s18 + $0x3e0] ss:$8 sps:$4 sm:$0xff]  }
 0x125   : > { %6969 = vmatmul.mubr.bf16.gmra.mrb[8].mxu0 %v12978_v58  ;;  %5907 = vmatprep.mubr.bf16.mxu1 %v12979_v62  ;;  %v13057_v58 = vld [vmem:[%s16608_s2 + $0x7d4] ss:$124 sps:$4 sm:$0xff]  }
 0x126   : > { %6978 = vmatprep.mubr.bf16.mxu0 %v12981_v63  ;;  %7078 = vmatpush1.bf16.msra.mxu0 %v13030_v1  ;;  %v13125_v62 = vld [vmem:[%s13958_s18 + $0x3f4] ss:$8 sps:$4 sm:$0xff]   ;;  %v13126_v1 = vld [vmem:[%s13958_s18 + $0xaf0] ss:$8 sps:$4 sm:$0xff]  }
 0x127   : > { %6007 = vmatpush1.bf16.msra.mxu1 %v13026_v0  ;;  %7079 = vmatprep.subr.bf16.mxu0 %v13038_v3  ;;  %v13128_v63 = vld [vmem:[%s13958_s18 + $0xaf4] ss:$8 sps:$4 sm:$0xff]   ;;  %v13123_v0 = vld [vmem:[%s13958_s18 + $0x3f0] ss:$8 sps:$4 sm:$0xff]   ;;  %v13155_v3 = vld [vmem:[%s13958_s18 + $0xb04] ss:$8 sps:$4 sm:$0xff]  }
 0x128   : > { %6008 = vmatprep.subr.bf16.mxu1 %v13035_v2  ;;  %v13061_v2 = vld [vmem:[%s16608_s2 + $0x7d0] ss:$124 sps:$4 sm:$0xff]  }
 0x12a   : > { %7080 = vmatpush1.bf16.msra.mxu0 %v13036_v5  ;;  %v13065_v5 = vld [vmem:[%s16608_s2 + $0x808] ss:$124 sps:$4 sm:$0xff]  }
 0x12b   : > { %6009 = vmatpush1.bf16.msra.mxu1 %v13033_v4  ;;  %7081 = vmatprep.subr.bf16.mxu0 %v13050_v9  ;;  %v13163_v4 = vld [vmem:[%s13958_s18 + $0x404] ss:$8 sps:$4 sm:$0xff]   ;;  %v13083_v9 = vld [vmem:[%s16608_s2 + $0x900] ss:$124 sps:$4 sm:$0xff]  }
 0x12c   : > { %6010 = vmatprep.subr.bf16.mxu1 %v13046_v8  ;;  %5908 = vmatmul.mubr.bf16.gmra.mrb[12].mxu1 %v12983_v6  ;;  %v13075_v6 = vld [vmem:[%s16608_s2 + $0x8cc] ss:$124 sps:$4 sm:$0xff]  }
 0x12d   : > { %6979 = vmatmul.mubr.bf16.gmra.mrb[12].mxu0 %v12984_v7  ;;  %5917 = vmatprep.mubr.bf16.mxu1 %v12988_v10  ;;  %v13077_v7 = vld [vmem:[%s16608_s2 + $0x904] ss:$124 sps:$4 sm:$0xff]  }
 0x12e   : > { %6988 = vmatprep.mubr.bf16.mxu0 %v12990_v11  ;;  %7082 = vmatpush1.bf16.msra.mxu0 %v13048_v13  ;;  %v13079_v8 = vld [vmem:[%s16608_s2 + $0x8c8] ss:$124 sps:$4 sm:$0xff]   ;;  %v13095_v11 = vld [vmem:[%s16608_s2 + $0x9fc] ss:$124 sps:$4 sm:$0xff]  }
 0x12f   : > { %6011 = vmatpush1.bf16.msra.mxu1 %v13044_v12  ;;  %7083 = vmatprep.subr.bf16.mxu0 %v13056_v15  ;;  %v13093_v10 = vld [vmem:[%s16608_s2 + $0x9c4] ss:$124 sps:$4 sm:$0xff]   ;;  %v13101_v13 = vld [vmem:[%s16608_s2 + $0x9f8] ss:$124 sps:$4 sm:$0xff]  }
 0x130   : > { %6012 = vmatprep.subr.bf16.mxu1 %v13053_v14  ;;  %v13097_v12 = vld [vmem:[%s16608_s2 + $0x9c0] ss:$124 sps:$4 sm:$0xff]   ;;  %v13113_v15 = vld [vmem:[%s16608_s2 + $0xaf4] ss:$124 sps:$4 sm:$0xff]  }
 0x131   : > { %v13111_v14 = vld [vmem:[%s16608_s2 + $0xabc] ss:$124 sps:$4 sm:$0xff]  }
 0x132   : > { %7084 = vmatpush1.bf16.msra.mxu0 %v13054_v17  ;;  %v13119_v17 = vld [vmem:[%s16608_s2 + $0xaf0] ss:$124 sps:$4 sm:$0xff]  }
 0x133   : > { %6013 = vmatpush1.bf16.msra.mxu1 %v13051_v16  ;;  %7085 = vmatprep.subr.bf16.mxu0 %v13068_v21  ;;  %v13115_v16 = vld [vmem:[%s16608_s2 + $0xab8] ss:$124 sps:$4 sm:$0xff]   ;;  %v13132_v21 = vld [vmem:[%s16608_s2 + $0x50] ss:$124 sps:$4 sm:$0xff]  }
 0x134   : > { %6014 = vmatprep.subr.bf16.mxu1 %v13064_v20  ;;  %5918 = vmatmul.mubr.bf16.gmra.mrb[16].mxu1 %v12992_v18  ;;  %v13131_v18 = vld [vmem:[%s16608_s2 + $0x1c] ss:$124 sps:$4 sm:$0xff]  }
 0x135   : > { %6989 = vmatmul.mubr.bf16.gmra.mrb[16].mxu0 %v12996_v19  ;;  %5927 = vmatprep.mubr.bf16.mxu1 %v13006_v22  ;;  %v13134_v19 = vld [vmem:[%s16608_s2 + $0x54] ss:$124 sps:$4 sm:$0xff]  }
 0x136   : > { %6998 = vmatprep.mubr.bf16.mxu0 %v13008_v23  ;;  %7086 = vmatpush1.bf16.msra.mxu0 %v13066_v25  ;;  %v13129_v20 = vld [vmem:[%s16608_s2 + $0x18] ss:$124 sps:$4 sm:$0xff]   ;;  %v13137_v23 = vld [vmem:[%s16608_s2 + $0x14c] ss:$124 sps:$4 sm:$0xff]  }
 0x137   : > { %6015 = vmatpush1.bf16.msra.mxu1 %v13062_v24  ;;  %7087 = vmatprep.subr.bf16.mxu0 %v13074_v27  ;;  %v13135_v22 = vld [vmem:[%s16608_s2 + $0x114] ss:$124 sps:$4 sm:$0xff]   ;;  %v13153_v24 = vld [vmem:[%s13958_s18 + $0xb00] ss:$8 sps:$4 sm:$0xff]  }
 0x138   : > { %6016 = vmatprep.subr.bf16.mxu1 %v13071_v26  ;;  %v13161_v25 = vld [vmem:[%s13958_s18 + $0x400] ss:$8 sps:$4 sm:$0xff]   ;;  %v13167_v26 = vld [vmem:[%s13958_s18 + $0xb14] ss:$8 sps:$4 sm:$0xff]  }
 0x139   : > { %v13170_v27 = vld [vmem:[%s13958_s18 + $0x414] ss:$8 sps:$4 sm:$0xff]  }
 0x13a   : > { %7088 = vmatpush1.bf16.msra.mxu0 %v13072_v29  ;;  %v13139_v29 = vld [vmem:[%s16608_s2 + $0x110] ss:$124 sps:$4 sm:$0xff]  }
 0x13b   : > { %6017 = vmatpush1.bf16.msra.mxu1 %v13069_v28  ;;  %7089 = vmatprep.subr.bf16.mxu0 %v13086_v33  ;;  %v13165_v28 = vld [vmem:[%s13958_s18 + $0xb10] ss:$8 sps:$4 sm:$0xff]   ;;  %v13181_v33 = vld [vmem:[%s13958_s18 + $0x424] ss:$8 sps:$4 sm:$0xff]  }
 0x13c   : > { %6018 = vmatprep.subr.bf16.mxu1 %v13082_v32  ;;  %5928 = vmatmul.mubr.bf16.gmra.mrb[20].mxu1 %v13010_v30  ;;  %v13140_v30 = vld [vmem:[%s16608_s2 + $0x148] ss:$124 sps:$4 sm:$0xff]  }
 0x13d   : > { %6999 = vmatmul.mubr.bf16.gmra.mrb[20].mxu0 %v13014_v31  ;;  %5937 = vmatprep.mubr.bf16.mxu1 %v13021_v34  ;;  %v13168_v31 = vld [vmem:[%s13958_s18 + $0x410] ss:$8 sps:$4 sm:$0xff]   ;;  %v13173_v32 = vld [vmem:[%s13958_s18 + $0xb24] ss:$8 sps:$4 sm:$0xff]  }
 0x13e   : > { %7008 = vmatprep.mubr.bf16.mxu0 %v13023_v35  ;;  %7090 = vmatpush1.bf16.msra.mxu0 %v13084_v37  ;;  %v13141_v34 = vld [vmem:[%s16608_s2 + $0x20c] ss:$124 sps:$4 sm:$0xff]   ;;  %v13143_v35 = vld [vmem:[%s16608_s2 + $0x244] ss:$124 sps:$4 sm:$0xff]  }
 0x13f   : > { %6019 = vmatpush1.bf16.msra.mxu1 %v13080_v36  ;;  %7091 = vmatprep.subr.bf16.mxu0 %v13092_v39  ;;  %v13171_v36 = vld [vmem:[%s13958_s18 + $0xb20] ss:$8 sps:$4 sm:$0xff]   ;;  %v13188_v39 = vld [vmem:[%s13958_s18 + $0xb34] ss:$8 sps:$4 sm:$0xff]  }
 0x140   : > { %6020 = vmatprep.subr.bf16.mxu1 %v13089_v38  ;;  %v13179_v37 = vld [vmem:[%s13958_s18 + $0x420] ss:$8 sps:$4 sm:$0xff]   ;;  %v13185_v38 = vld [vmem:[%s13958_s18 + $0x434] ss:$8 sps:$4 sm:$0xff]  }
 0x142   : > { %7092 = vmatpush1.bf16.msra.mxu0 %v13090_v41  ;;  %v13186_v41 = vld [vmem:[%s13958_s18 + $0xb30] ss:$8 sps:$4 sm:$0xff]  }
 0x143   : > { %6021 = vmatpush1.bf16.msra.mxu1 %v13087_v40  ;;  %7093 = vmatprep.subr.bf16.mxu0 %v13104_v45  ;;  %v13183_v40 = vld [vmem:[%s13958_s18 + $0x430] ss:$8 sps:$4 sm:$0xff]   ;;  %v13200_v45 = vld [vmem:[%s13958_s18 + $0xb44] ss:$8 sps:$4 sm:$0xff]  }
 0x144   : > { %6022 = vmatprep.subr.bf16.mxu1 %v13100_v44  ;;  %5938 = vmatmul.mubr.bf16.gmra.mrb[24].mxu1 %v13025_v42  ;;  %v13196_v42 = vld [vmem:[%s13958_s18 + $0x444] ss:$8 sps:$4 sm:$0xff]   ;;  %v13146_v44 = vld [vmem:[%s16608_s2 + $0x240] ss:$124 sps:$4 sm:$0xff]  }
 0x145   : > { %7009 = vmatmul.mubr.bf16.gmra.mrb[24].mxu0 %v13029_v43  ;;  %5947 = vmatprep.mubr.bf16.mxu1 %v13039_v46  ;;  %v13145_v43 = vld [vmem:[%s16608_s2 + $0x208] ss:$124 sps:$4 sm:$0xff]  }
 0x146   : > { %7018 = vmatprep.mubr.bf16.mxu0 %v13041_v47  ;;  %7094 = vmatpush1.bf16.msra.mxu0 %v13102_v49  ;;  %v13147_v46 = vld [vmem:[%s16608_s2 + $0x304] ss:$124 sps:$4 sm:$0xff]   ;;  %v13149_v47 = vld [vmem:[%s16608_s2 + $0x33c] ss:$124 sps:$4 sm:$0xff]  }
 0x147   : > { %6023 = vmatpush1.bf16.msra.mxu1 %v13098_v48  ;;  %7095 = vmatprep.subr.bf16.mxu0 %v13110_v51  ;;  %v13194_v48 = vld [vmem:[%s13958_s18 + $0x440] ss:$8 sps:$4 sm:$0xff]   ;;  %v13206_v51 = vld [vmem:[%s13958_s18 + $0xb54] ss:$8 sps:$4 sm:$0xff]  }
 0x148   : > { %6024 = vmatprep.subr.bf16.mxu1 %v13107_v50  ;;  %v13198_v49 = vld [vmem:[%s13958_s18 + $0xb40] ss:$8 sps:$4 sm:$0xff]   ;;  %v13203_v50 = vld [vmem:[%s13958_s18 + $0x454] ss:$8 sps:$4 sm:$0xff]  }
 0x14a   : > { %7096 = vmatpush1.bf16.msra.mxu0 %v13108_v53  ;;  %v13204_v53 = vld [vmem:[%s13958_s18 + $0xb50] ss:$8 sps:$4 sm:$0xff]  }
 0x14b   : > { %6025 = vmatpush1.bf16.msra.mxu1 %v13105_v52  ;;  %7097 = vmatprep.subr.bf16.mxu0 %v13122_v57  ;;  %v13201_v52 = vld [vmem:[%s13958_s18 + $0x450] ss:$8 sps:$4 sm:$0xff]   ;;  %v13218_v57 = vld [vmem:[%s13958_s18 + $0xb64] ss:$8 sps:$4 sm:$0xff]  }
 0x14c   : > { %6026 = vmatprep.subr.bf16.mxu1 %v13118_v56  ;;  %5948 = vmatmul.mubr.bf16.gmra.mrb[28].mxu1 %v13043_v54  ;;  %v13214_v54 = vld [vmem:[%s13958_s18 + $0x464] ss:$8 sps:$4 sm:$0xff]   ;;  %v13152_v56 = vld [vmem:[%s16608_s2 + $0x338] ss:$124 sps:$4 sm:$0xff]  }
 0x14d   : > { %7019 = vmatmul.mubr.bf16.gmra.mrb[28].mxu0 %v13047_v55  ;;  %5957 = vmatprep.mubr.bf16.mxu1 %v13057_v58  ;;  %v13151_v55 = vld [vmem:[%s16608_s2 + $0x300] ss:$124 sps:$4 sm:$0xff]  }
 0x14e   : > { %7028 = vmatprep.mubr.bf16.mxu0 %v13059_v59  ;;  %7098 = vmatpush1.bf16.msra.mxu0 %v13120_v61  ;;  %v13156_v58 = vld [vmem:[%s16608_s2 + $0x3fc] ss:$124 sps:$4 sm:$0xff]   ;;  %v13158_v59 = vld [vmem:[%s16608_s2 + $0x434] ss:$124 sps:$4 sm:$0xff]   ;;  %v13216_v61 = vld [vmem:[%s13958_s18 + $0xb60] ss:$8 sps:$4 sm:$0xff]  }
 0x14f   : > { %6027 = vmatpush1.bf16.msra.mxu1 %v13116_v60  ;;  %7099 = vmatprep.subr.bf16.mxu0 %v13128_v63  ;;  %v13212_v60 = vld [vmem:[%s13958_s18 + $0x460] ss:$8 sps:$4 sm:$0xff]   ;;  %v13224_v63 = vld [vmem:[%s13958_s18 + $0xb74] ss:$8 sps:$4 sm:$0xff]  }
 0x150   : > { %6028 = vmatprep.subr.bf16.mxu1 %v13125_v62  ;;  %v13221_v62 = vld [vmem:[%s13958_s18 + $0x474] ss:$8 sps:$4 sm:$0xff]  }
 0x152   : > { %7100 = vmatpush1.bf16.msra.mxu0 %v13126_v1  ;;  %v13222_v1 = vld [vmem:[%s13958_s18 + $0xb70] ss:$8 sps:$4 sm:$0xff]  }
 0x153   : > { %6029 = vmatpush1.bf16.msra.mxu1 %v13123_v0  ;;  %7222 = vmatprep.subr.bf16.mxu0 %v13155_v3  ;;  %v13219_v0 = vld [vmem:[%s13958_s18 + $0x470] ss:$8 sps:$4 sm:$0xff]  }
 0x154   : > { %6151 = vmatprep.subr.bf16.mxu1 %v13163_v4  ;;  %5958 = vmatmul.mubr.bf16.gmra.mrb[32].mxu1 %v13061_v2  ;;  %v13232_v2 = vld [vmem:[%s13958_s18 + $0x484] ss:$8 sps:$4 sm:$0xff]   ;;  %v13160_v3 = vld [vmem:[%s16608_s2 + $0x3f8] ss:$124 sps:$4 sm:$0xff]  }
 0x155   : > { %7029 = vmatmul.mubr.bf16.gmra.mrb[32].mxu0 %v13065_v5  ;;  %5967 = vmatprep.mubr.bf16.mxu1 %v13075_v6  ;;  %v13164_v4 = vld [vmem:[%s16608_s2 + $0x430] ss:$124 sps:$4 sm:$0xff]  }
 0x156   : > { %7038 = vmatprep.mubr.bf16.mxu0 %v13077_v7  ;;  %v13236_v5 = vld [vmem:[%s13958_s18 + $0xb84] ss:$8 sps:$4 sm:$0xff]   ;;  %v13174_v6 = vld [vmem:[%s16608_s2 + $0x4f4] ss:$124 sps:$4 sm:$0xff]  }
 0x157   : > { %v13176_v7 = vld [vmem:[%s16608_s2 + $0x52c] ss:$124 sps:$4 sm:$0xff]  }
 0x15c   : > { %5968 = vmatmul.mubr.bf16.gmra.mrb[36].mxu1 %v13079_v8  ;;  %v13230_v8 = vld [vmem:[%s13958_s18 + $0x480] ss:$8 sps:$4 sm:$0xff]  }
 0x15d   : > { %7039 = vmatmul.mubr.bf16.gmra.mrb[36].mxu0 %v13083_v9  ;;  %5977 = vmatprep.mubr.bf16.mxu1 %v13093_v10  ;;  %v13234_v9 = vld [vmem:[%s13958_s18 + $0xb80] ss:$8 sps:$4 sm:$0xff]   ;;  %v13239_v10 = vld [vmem:[%s13958_s18 + $0x494] ss:$8 sps:$4 sm:$0xff]  }
 0x15e   : > { %7048 = vmatprep.mubr.bf16.mxu0 %v13095_v11  ;;  %v13242_v11 = vld [vmem:[%s13958_s18 + $0xb94] ss:$8 sps:$4 sm:$0xff]  }
 0x164   : > { %5978 = vmatmul.mubr.bf16.gmra.mrb[40].mxu1 %v13097_v12  ;;  %v13237_v12 = vld [vmem:[%s13958_s18 + $0x490] ss:$8 sps:$4 sm:$0xff]  }
 0x165   : > { %7049 = vmatmul.mubr.bf16.gmra.mrb[40].mxu0 %v13101_v13  ;;  %5987 = vmatprep.mubr.bf16.mxu1 %v13111_v14  ;;  %v13240_v13 = vld [vmem:[%s13958_s18 + $0xb90] ss:$8 sps:$4 sm:$0xff]   ;;  %v13250_v14 = vld [vmem:[%s13958_s18 + $0x4a4] ss:$8 sps:$4 sm:$0xff]  }
 0x166   : > { %7058 = vmatprep.mubr.bf16.mxu0 %v13113_v15  ;;  %v13178_v15 = vld [vmem:[%s16608_s2 + $0x4f0] ss:$124 sps:$4 sm:$0xff]  }
 0x16c   : > { %5988 = vmatmul.mubr.bf16.gmra.mrb[44].mxu1 %v13115_v16  ;;  %v13182_v16 = vld [vmem:[%s16608_s2 + $0x528] ss:$124 sps:$4 sm:$0xff]  }
 0x16d   : > { %7059 = vmatmul.mubr.bf16.gmra.mrb[44].mxu0 %v13119_v17  ;;  %6030 = vmatprep.mubr.bf16.mxu1 %v13131_v18  ;;  %v13254_v17 = vld [vmem:[%s13958_s18 + $0xba4] ss:$8 sps:$4 sm:$0xff]  }
 0x16e   : > { %7101 = vmatprep.mubr.bf16.mxu0 %v13134_v19  ;;  %v13189_v18 = vld [vmem:[%s16608_s2 + $0x5ec] ss:$124 sps:$4 sm:$0xff]   ;;  %v13191_v19 = vld [vmem:[%s16608_s2 + $0x624] ss:$124 sps:$4 sm:$0xff]  }
 0x174   : > { %6031 = vmatmul.mubr.bf16.vlgmr.msra.gmra.mrb[0].mxu1 %v13129_v20  ;;  %v13248_v20 = vld [vmem:[%s13958_s18 + $0x4a0] ss:$8 sps:$4 sm:$0xff]  }
 0x175   : > { %7102 = vmatmul.mubr.bf16.vlgmr.msra.gmra.mrb[0].mxu0 %v13132_v21  ;;  %6040 = vmatprep.mubr.bf16.mxu1 %v13135_v22  ;;  %v13252_v21 = vld [vmem:[%s13958_s18 + $0xba0] ss:$8 sps:$4 sm:$0xff]   ;;  %v13257_v22 = vld [vmem:[%s13958_s18 + $0x4b4] ss:$8 sps:$4 sm:$0xff]  }
 0x176   : > { %7111 = vmatprep.mubr.bf16.mxu0 %v13137_v23  ;;  %7223 = vmatpush1.bf16.msra.mxu0 %v13153_v24  ;;  %v13260_v23 = vld [vmem:[%s13958_s18 + $0xbb4] ss:$8 sps:$4 sm:$0xff]   ;;  %v13255_v24 = vld [vmem:[%s13958_s18 + $0x4b0] ss:$8 sps:$4 sm:$0xff]  }
 0x177   : > { %6152 = vmatpush1.bf16.msra.mxu1 %v13161_v25  ;;  %7224 = vmatprep.subr.bf16.mxu0 %v13167_v26  ;;  %v13258_v25 = vld [vmem:[%s13958_s18 + $0xbb0] ss:$8 sps:$4 sm:$0xff]   ;;  %v13268_v26 = vld [vmem:[%s13958_s18 + $0x4c4] ss:$8 sps:$4 sm:$0xff]  }
 0x178   : > { %6153 = vmatprep.subr.bf16.mxu1 %v13170_v27  ;;  %v13193_v27 = vld [vmem:[%s16608_s2 + $0x5e8] ss:$124 sps:$4 sm:$0xff]  }
 0x17a   : > { %7225 = vmatpush1.bf16.msra.mxu0 %v13165_v28  ;;  %v13197_v28 = vld [vmem:[%s16608_s2 + $0x620] ss:$124 sps:$4 sm:$0xff]  }
 0x17b   : > { %6154 = vmatpush1.bf16.msra.mxu1 %v13168_v31  ;;  %7226 = vmatprep.subr.bf16.mxu0 %v13173_v32  ;;  %v13209_v31 = vld [vmem:[%s16608_s2 + $0x71c] ss:$124 sps:$4 sm:$0xff]   ;;  %v13266_v32 = vld [vmem:[%s13958_s18 + $0x4c0] ss:$8 sps:$4 sm:$0xff]  }
 0x17c   : > { %6155 = vmatprep.subr.bf16.mxu1 %v13181_v33  ;;  %6041 = vmatmul.mubr.bf16.gmra.mrb[4].mxu1 %v13139_v29  ;;  %v13272_v29 = vld [vmem:[%s13958_s18 + $0xbc4] ss:$8 sps:$4 sm:$0xff]   ;;  %v13270_v33 = vld [vmem:[%s13958_s18 + $0xbc0] ss:$8 sps:$4 sm:$0xff]  }
 0x17d   : > { %7112 = vmatmul.mubr.bf16.gmra.mrb[4].mxu0 %v13140_v30  ;;  %6050 = vmatprep.mubr.bf16.mxu1 %v13141_v34  ;;  %v13207_v30 = vld [vmem:[%s16608_s2 + $0x6e4] ss:$124 sps:$4 sm:$0xff]   ;;  %v13275_v34 = vld [vmem:[%s13958_s18 + $0x4d4] ss:$8 sps:$4 sm:$0xff]  }
 0x17e   : > { %7121 = vmatprep.mubr.bf16.mxu0 %v13143_v35  ;;  %7227 = vmatpush1.bf16.msra.mxu0 %v13171_v36  ;;  %v13278_v35 = vld [vmem:[%s13958_s18 + $0xbd4] ss:$8 sps:$4 sm:$0xff]   ;;  %v13273_v36 = vld [vmem:[%s13958_s18 + $0x4d0] ss:$8 sps:$4 sm:$0xff]  }
 0x17f   : > { %6156 = vmatpush1.bf16.msra.mxu1 %v13179_v37  ;;  %7228 = vmatprep.subr.bf16.mxu0 %v13188_v39  ;;  %v13276_v37 = vld [vmem:[%s13958_s18 + $0xbd0] ss:$8 sps:$4 sm:$0xff]   ;;  %v13211_v39 = vld [vmem:[%s16608_s2 + $0x6e0] ss:$124 sps:$4 sm:$0xff]  }
 0x180   : > { %6157 = vmatprep.subr.bf16.mxu1 %v13185_v38  ;;  %v13286_v38 = vld [vmem:[%s13958_s18 + $0x4e4] ss:$8 sps:$4 sm:$0xff]  }
 0x182   : > { %7229 = vmatpush1.bf16.msra.mxu0 %v13186_v41  ;;  %v13290_v41 = vld [vmem:[%s13958_s18 + $0xbe4] ss:$8 sps:$4 sm:$0xff]  }
 0x183   : > { %6158 = vmatpush1.bf16.msra.mxu1 %v13183_v40  ;;  %7230 = vmatprep.subr.bf16.mxu0 %v13200_v45  ;;  %v13215_v40 = vld [vmem:[%s16608_s2 + $0x718] ss:$124 sps:$4 sm:$0xff]   ;;  %v13288_v45 = vld [vmem:[%s13958_s18 + $0xbe0] ss:$8 sps:$4 sm:$0xff]  }
 0x184   : > { %6159 = vmatprep.subr.bf16.mxu1 %v13196_v42  ;;  %6051 = vmatmul.mubr.bf16.gmra.mrb[8].mxu1 %v13145_v43  ;;  %v13225_v42 = vld [vmem:[%s16608_s2 + $0x7dc] ss:$124 sps:$4 sm:$0xff]   ;;  %v13227_v43 = vld [vmem:[%s16608_s2 + $0x814] ss:$124 sps:$4 sm:$0xff]  }
 0x185   : > { %7122 = vmatmul.mubr.bf16.gmra.mrb[8].mxu0 %v13146_v44  ;;  %6060 = vmatprep.mubr.bf16.mxu1 %v13147_v46  ;;  %v13284_v44 = vld [vmem:[%s13958_s18 + $0x4e0] ss:$8 sps:$4 sm:$0xff]   ;;  %v13293_v46 = vld [vmem:[%s13958_s18 + $0x4f4] ss:$8 sps:$4 sm:$0xff]  }
 0x186   : > { %7131 = vmatprep.mubr.bf16.mxu0 %v13149_v47  ;;  %7231 = vmatpush1.bf16.msra.mxu0 %v13198_v49  ;;  %v13296_v47 = vld [vmem:[%s13958_s18 + $0xbf4] ss:$8 sps:$4 sm:$0xff]   ;;  %v13294_v49 = vld [vmem:[%s13958_s18 + $0xbf0] ss:$8 sps:$4 sm:$0xff]  }
 0x187   : > { %6160 = vmatpush1.bf16.msra.mxu1 %v13194_v48  ;;  %7232 = vmatprep.subr.bf16.mxu0 %v13206_v51  ;;  %v13291_v48 = vld [vmem:[%s13958_s18 + $0x4f0] ss:$8 sps:$4 sm:$0xff]  }
 0x188   : > { %6161 = vmatprep.subr.bf16.mxu1 %v13203_v50  ;;  %v13229_v50 = vld [vmem:[%s16608_s2 + $0x7d8] ss:$124 sps:$4 sm:$0xff]   ;;  %v13233_v51 = vld [vmem:[%s16608_s2 + $0x810] ss:$124 sps:$4 sm:$0xff]  }
 0x18a   : > { %7233 = vmatpush1.bf16.msra.mxu0 %v13204_v53  ;;  %v13331_v53 = vld [vmem:[%s13958_s18 + $0x504] ss:$8 sps:$4 sm:$0xff]  }
 0x18b   : > { %6162 = vmatpush1.bf16.msra.mxu1 %v13201_v52  ;;  %7234 = vmatprep.subr.bf16.mxu0 %v13218_v57  ;;  %v13323_v52 = vld [vmem:[%s13958_s18 + $0xc04] ss:$8 sps:$4 sm:$0xff]  }
 0x18c   : > { %6163 = vmatprep.subr.bf16.mxu1 %v13214_v54  ;;  %6061 = vmatmul.mubr.bf16.gmra.mrb[12].mxu1 %v13151_v55  ;;  %v13243_v54 = vld [vmem:[%s16608_s2 + $0x8d4] ss:$124 sps:$4 sm:$0xff]   ;;  %v13245_v55 = vld [vmem:[%s16608_s2 + $0x90c] ss:$124 sps:$4 sm:$0xff]  }
 0x18d   : > { %7132 = vmatmul.mubr.bf16.gmra.mrb[12].mxu0 %v13152_v56  ;;  %6070 = vmatprep.mubr.bf16.mxu1 %v13156_v58  ;;  %v13247_v56 = vld [vmem:[%s16608_s2 + $0x8d0] ss:$124 sps:$4 sm:$0xff]   ;;  %v13251_v57 = vld [vmem:[%s16608_s2 + $0x908] ss:$124 sps:$4 sm:$0xff]  }
 0x18e   : > { %7141 = vmatprep.mubr.bf16.mxu0 %v13158_v59  ;;  %7235 = vmatpush1.bf16.msra.mxu0 %v13216_v61  ;;  %v13261_v58 = vld [vmem:[%s16608_s2 + $0x9cc] ss:$124 sps:$4 sm:$0xff]   ;;  %v13263_v59 = vld [vmem:[%s16608_s2 + $0xa04] ss:$124 sps:$4 sm:$0xff]  }
 0x18f   : > { %6164 = vmatpush1.bf16.msra.mxu1 %v13212_v60  ;;  %7236 = vmatprep.subr.bf16.mxu0 %v13224_v63  ;;  %v13265_v60 = vld [vmem:[%s16608_s2 + $0x9c8] ss:$124 sps:$4 sm:$0xff]   ;;  %v13269_v61 = vld [vmem:[%s16608_s2 + $0xa00] ss:$124 sps:$4 sm:$0xff]  }
 0x190   : > { %6165 = vmatprep.subr.bf16.mxu1 %v13221_v62  ;;  %v13279_v62 = vld [vmem:[%s16608_s2 + $0xac4] ss:$124 sps:$4 sm:$0xff]   ;;  %v13281_v63 = vld [vmem:[%s16608_s2 + $0xafc] ss:$124 sps:$4 sm:$0xff]  }
 0x192   : > { %7237 = vmatpush1.bf16.msra.mxu0 %v13222_v1  ;;  %v13287_v1 = vld [vmem:[%s16608_s2 + $0xaf8] ss:$124 sps:$4 sm:$0xff]  }
 0x193   : > { %6166 = vmatpush1.bf16.msra.mxu1 %v13219_v0  ;;  %7238 = vmatprep.subr.bf16.mxu0 %v13236_v5  ;;  %v13283_v0 = vld [vmem:[%s16608_s2 + $0xac0] ss:$124 sps:$4 sm:$0xff]   ;;  %v13300_v5 = vld [vmem:[%s16608_s2 + $0x58] ss:$124 sps:$4 sm:$0xff]  }
 0x194   : > { %6167 = vmatprep.subr.bf16.mxu1 %v13232_v2  ;;  %6071 = vmatmul.mubr.bf16.gmra.mrb[16].mxu1 %v13160_v3  ;;  %v13299_v2 = vld [vmem:[%s16608_s2 + $0x24] ss:$124 sps:$4 sm:$0xff]   ;;  %v13302_v3 = vld [vmem:[%s16608_s2 + $0x5c] ss:$124 sps:$4 sm:$0xff]  }
 0x195   : > { %7142 = vmatmul.mubr.bf16.gmra.mrb[16].mxu0 %v13164_v4  ;;  %6080 = vmatprep.mubr.bf16.mxu1 %v13174_v6  ;;  %v13297_v4 = vld [vmem:[%s16608_s2 + $0x20] ss:$124 sps:$4 sm:$0xff]  }
 0x196   : > { %7151 = vmatprep.mubr.bf16.mxu0 %v13176_v7  ;;  %7239 = vmatpush1.bf16.msra.mxu0 %v13234_v9  ;;  %v13303_v6 = vld [vmem:[%s16608_s2 + $0x11c] ss:$124 sps:$4 sm:$0xff]   ;;  %v13305_v7 = vld [vmem:[%s16608_s2 + $0x154] ss:$124 sps:$4 sm:$0xff]   ;;  %v13329_v9 = vld [vmem:[%s13958_s18 + $0x500] ss:$8 sps:$4 sm:$0xff]  }
 0x197   : > { %6168 = vmatpush1.bf16.msra.mxu1 %v13230_v8  ;;  %7240 = vmatprep.subr.bf16.mxu0 %v13242_v11  ;;  %v13321_v8 = vld [vmem:[%s13958_s18 + $0xc00] ss:$8 sps:$4 sm:$0xff]   ;;  %v13338_v11 = vld [vmem:[%s13958_s18 + $0x514] ss:$8 sps:$4 sm:$0xff]  }
 0x198   : > { %6169 = vmatprep.subr.bf16.mxu1 %v13239_v10  ;;  %v13335_v10 = vld [vmem:[%s13958_s18 + $0xc14] ss:$8 sps:$4 sm:$0xff]  }
 0x19a   : > { %7241 = vmatpush1.bf16.msra.mxu0 %v13240_v13  ;;  %v13307_v13 = vld [vmem:[%s16608_s2 + $0x118] ss:$124 sps:$4 sm:$0xff]  }
 0x19b   : > { %6170 = vmatpush1.bf16.msra.mxu1 %v13237_v12  ;;  %7242 = vmatprep.subr.bf16.mxu0 %v13254_v17  ;;  %v13333_v12 = vld [vmem:[%s13958_s18 + $0xc10] ss:$8 sps:$4 sm:$0xff]   ;;  %v13349_v17 = vld [vmem:[%s13958_s18 + $0x524] ss:$8 sps:$4 sm:$0xff]  }
 0x19c   : > { %6171 = vmatprep.subr.bf16.mxu1 %v13250_v14  ;;  %6081 = vmatmul.mubr.bf16.gmra.mrb[20].mxu1 %v13178_v15  ;;  %v13308_v14 = vld [vmem:[%s16608_s2 + $0x150] ss:$124 sps:$4 sm:$0xff]  }
 0x19d   : > { %7152 = vmatmul.mubr.bf16.gmra.mrb[20].mxu0 %v13182_v16  ;;  %6090 = vmatprep.mubr.bf16.mxu1 %v13189_v18  ;;  %v13336_v15 = vld [vmem:[%s13958_s18 + $0x510] ss:$8 sps:$4 sm:$0xff]   ;;  %v13341_v16 = vld [vmem:[%s13958_s18 + $0xc24] ss:$8 sps:$4 sm:$0xff]  }
 0x19e   : > { %7161 = vmatprep.mubr.bf16.mxu0 %v13191_v19  ;;  %7243 = vmatpush1.bf16.msra.mxu0 %v13252_v21  ;;  %v13309_v18 = vld [vmem:[%s16608_s2 + $0x214] ss:$124 sps:$4 sm:$0xff]   ;;  %v13311_v19 = vld [vmem:[%s16608_s2 + $0x24c] ss:$124 sps:$4 sm:$0xff]  }
 0x19f   : > { %6172 = vmatpush1.bf16.msra.mxu1 %v13248_v20  ;;  %7244 = vmatprep.subr.bf16.mxu0 %v13260_v23  ;;  %v13339_v20 = vld [vmem:[%s13958_s18 + $0xc20] ss:$8 sps:$4 sm:$0xff]   ;;  %v13356_v23 = vld [vmem:[%s13958_s18 + $0xc34] ss:$8 sps:$4 sm:$0xff]  }
 0x1a0   : > { %6173 = vmatprep.subr.bf16.mxu1 %v13257_v22  ;;  %v13347_v21 = vld [vmem:[%s13958_s18 + $0x520] ss:$8 sps:$4 sm:$0xff]   ;;  %v13353_v22 = vld [vmem:[%s13958_s18 + $0x534] ss:$8 sps:$4 sm:$0xff]  }
 0x1a2   : > { %7245 = vmatpush1.bf16.msra.mxu0 %v13258_v25  ;;  %v13354_v25 = vld [vmem:[%s13958_s18 + $0xc30] ss:$8 sps:$4 sm:$0xff]  }
 0x1a3   : > { %6174 = vmatpush1.bf16.msra.mxu1 %v13255_v24  ;;  %7246 = vmatprep.subr.bf16.mxu0 %v13272_v29  ;;  %v13351_v24 = vld [vmem:[%s13958_s18 + $0x530] ss:$8 sps:$4 sm:$0xff]   ;;  %v13368_v29 = vld [vmem:[%s13958_s18 + $0xc44] ss:$8 sps:$4 sm:$0xff]  }
 0x1a4   : > { %6175 = vmatprep.subr.bf16.mxu1 %v13268_v26  ;;  %6091 = vmatmul.mubr.bf16.gmra.mrb[24].mxu1 %v13193_v27  ;;  %v13364_v26 = vld [vmem:[%s13958_s18 + $0x544] ss:$8 sps:$4 sm:$0xff]  }
 0x1a5   : > { %7162 = vmatmul.mubr.bf16.gmra.mrb[24].mxu0 %v13197_v28  ;;  %6100 = vmatprep.mubr.bf16.mxu1 %v13207_v30  ;;  %v13313_v27 = vld [vmem:[%s16608_s2 + $0x210] ss:$124 sps:$4 sm:$0xff]   ;;  %v13314_v28 = vld [vmem:[%s16608_s2 + $0x248] ss:$124 sps:$4 sm:$0xff]  }
 0x1a6   : > { %7171 = vmatprep.mubr.bf16.mxu0 %v13209_v31  ;;  %7247 = vmatpush1.bf16.msra.mxu0 %v13270_v33  ;;  %v13315_v30 = vld [vmem:[%s16608_s2 + $0x30c] ss:$124 sps:$4 sm:$0xff]   ;;  %v13317_v31 = vld [vmem:[%s16608_s2 + $0x344] ss:$124 sps:$4 sm:$0xff]  }
 0x1a7   : > { %6176 = vmatpush1.bf16.msra.mxu1 %v13266_v32  ;;  %7248 = vmatprep.subr.bf16.mxu0 %v13278_v35  ;;  %v13362_v32 = vld [vmem:[%s13958_s18 + $0x540] ss:$8 sps:$4 sm:$0xff]   ;;  %v13374_v35 = vld [vmem:[%s13958_s18 + $0xc54] ss:$8 sps:$4 sm:$0xff]  }
 0x1a8   : > { %6177 = vmatprep.subr.bf16.mxu1 %v13275_v34  ;;  %v13366_v33 = vld [vmem:[%s13958_s18 + $0xc40] ss:$8 sps:$4 sm:$0xff]   ;;  %v13371_v34 = vld [vmem:[%s13958_s18 + $0x554] ss:$8 sps:$4 sm:$0xff]  }
 0x1aa   : > { %7249 = vmatpush1.bf16.msra.mxu0 %v13276_v37  ;;  %v13372_v37 = vld [vmem:[%s13958_s18 + $0xc50] ss:$8 sps:$4 sm:$0xff]  }
 0x1ab   : > { %6178 = vmatpush1.bf16.msra.mxu1 %v13273_v36  ;;  %7250 = vmatprep.subr.bf16.mxu0 %v13290_v41  ;;  %v13369_v36 = vld [vmem:[%s13958_s18 + $0x550] ss:$8 sps:$4 sm:$0xff]   ;;  %v13386_v41 = vld [vmem:[%s13958_s18 + $0xc64] ss:$8 sps:$4 sm:$0xff]  }
 0x1ac   : > { %6179 = vmatprep.subr.bf16.mxu1 %v13286_v38  ;;  %6101 = vmatmul.mubr.bf16.gmra.mrb[28].mxu1 %v13211_v39  ;;  %v13382_v38 = vld [vmem:[%s13958_s18 + $0x564] ss:$8 sps:$4 sm:$0xff]  }
 0x1ad   : > { %7172 = vmatmul.mubr.bf16.gmra.mrb[28].mxu0 %v13215_v40  ;;  %6110 = vmatprep.mubr.bf16.mxu1 %v13225_v42  ;;  %v13319_v39 = vld [vmem:[%s16608_s2 + $0x308] ss:$124 sps:$4 sm:$0xff]   ;;  %v13320_v40 = vld [vmem:[%s16608_s2 + $0x340] ss:$124 sps:$4 sm:$0xff]  }
 0x1ae   : > { %7181 = vmatprep.mubr.bf16.mxu0 %v13227_v43  ;;  %7251 = vmatpush1.bf16.msra.mxu0 %v13288_v45  ;;  %v13324_v42 = vld [vmem:[%s16608_s2 + $0x404] ss:$124 sps:$4 sm:$0xff]   ;;  %v13326_v43 = vld [vmem:[%s16608_s2 + $0x43c] ss:$124 sps:$4 sm:$0xff]  }
 0x1af   : > { %6180 = vmatpush1.bf16.msra.mxu1 %v13284_v44  ;;  %7252 = vmatprep.subr.bf16.mxu0 %v13296_v47  ;;  %v13380_v44 = vld [vmem:[%s13958_s18 + $0x560] ss:$8 sps:$4 sm:$0xff]   ;;  %v13392_v47 = vld [vmem:[%s13958_s18 + $0xc74] ss:$8 sps:$4 sm:$0xff]  }
 0x1b0   : > { %6181 = vmatprep.subr.bf16.mxu1 %v13293_v46  ;;  %v13384_v45 = vld [vmem:[%s13958_s18 + $0xc60] ss:$8 sps:$4 sm:$0xff]   ;;  %v13389_v46 = vld [vmem:[%s13958_s18 + $0x574] ss:$8 sps:$4 sm:$0xff]  }
 0x1b2   : > { %7253 = vmatpush1.bf16.msra.mxu0 %v13294_v49  ;;  %v13390_v49 = vld [vmem:[%s13958_s18 + $0xc70] ss:$8 sps:$4 sm:$0xff]  }
 0x1b3   : > { %6182 = vmatpush1.bf16.msra.mxu1 %v13291_v48  ;;  %7375 = vmatprep.subr.bf16.mxu0 %v13323_v52  ;;  %v13387_v48 = vld [vmem:[%s13958_s18 + $0x570] ss:$8 sps:$4 sm:$0xff]  }
 0x1b4   : > { %6304 = vmatprep.subr.bf16.mxu1 %v13331_v53  ;;  %6111 = vmatmul.mubr.bf16.gmra.mrb[32].mxu1 %v13229_v50  ;;  %v13400_v50 = vld [vmem:[%s13958_s18 + $0x584] ss:$8 sps:$4 sm:$0xff]   ;;  %v13332_v52 = vld [vmem:[%s16608_s2 + $0x438] ss:$124 sps:$4 sm:$0xff]  }
 0x1b5   : > { %7182 = vmatmul.mubr.bf16.gmra.mrb[32].mxu0 %v13233_v51  ;;  %6120 = vmatprep.mubr.bf16.mxu1 %v13243_v54  ;;  %v13328_v51 = vld [vmem:[%s16608_s2 + $0x400] ss:$124 sps:$4 sm:$0xff]   ;;  %v13404_v53 = vld [vmem:[%s13958_s18 + $0xc84] ss:$8 sps:$4 sm:$0xff]  }
 0x1b6   : > { %7191 = vmatprep.mubr.bf16.mxu0 %v13245_v55  ;;  %v13342_v54 = vld [vmem:[%s16608_s2 + $0x4fc] ss:$124 sps:$4 sm:$0xff]   ;;  %v13344_v55 = vld [vmem:[%s16608_s2 + $0x534] ss:$124 sps:$4 sm:$0xff]  }
 0x1bc   : > { %6121 = vmatmul.mubr.bf16.gmra.mrb[36].mxu1 %v13247_v56  ;;  %v13398_v56 = vld [vmem:[%s13958_s18 + $0x580] ss:$8 sps:$4 sm:$0xff]  }
 0x1bd   : > { %7192 = vmatmul.mubr.bf16.gmra.mrb[36].mxu0 %v13251_v57  ;;  %6130 = vmatprep.mubr.bf16.mxu1 %v13261_v58  ;;  %v13402_v57 = vld [vmem:[%s13958_s18 + $0xc80] ss:$8 sps:$4 sm:$0xff]   ;;  %v13407_v58 = vld [vmem:[%s13958_s18 + $0x594] ss:$8 sps:$4 sm:$0xff]  }
 0x1be   : > { %7201 = vmatprep.mubr.bf16.mxu0 %v13263_v59  ;;  %v13410_v59 = vld [vmem:[%s13958_s18 + $0xc94] ss:$8 sps:$4 sm:$0xff]  }
 0x1c4   : > { %6131 = vmatmul.mubr.bf16.gmra.mrb[40].mxu1 %v13265_v60  ;;  %v13405_v60 = vld [vmem:[%s13958_s18 + $0x590] ss:$8 sps:$4 sm:$0xff]  }
 0x1c5   : > { %7202 = vmatmul.mubr.bf16.gmra.mrb[40].mxu0 %v13269_v61  ;;  %6140 = vmatprep.mubr.bf16.mxu1 %v13279_v62  ;;  %v13408_v61 = vld [vmem:[%s13958_s18 + $0xc90] ss:$8 sps:$4 sm:$0xff]   ;;  %v13418_v62 = vld [vmem:[%s13958_s18 + $0x5a4] ss:$8 sps:$4 sm:$0xff]  }
 0x1c6   : > { %7211 = vmatprep.mubr.bf16.mxu0 %v13281_v63  ;;  %v13346_v63 = vld [vmem:[%s16608_s2 + $0x4f8] ss:$124 sps:$4 sm:$0xff]  }
 0x1cc   : > { %6141 = vmatmul.mubr.bf16.gmra.mrb[44].mxu1 %v13283_v0  ;;  %v13350_v0 = vld [vmem:[%s16608_s2 + $0x530] ss:$124 sps:$4 sm:$0xff]  }
 0x1cd   : > { %7212 = vmatmul.mubr.bf16.gmra.mrb[44].mxu0 %v13287_v1  ;;  %6183 = vmatprep.mubr.bf16.mxu1 %v13299_v2  ;;  %v13422_v1 = vld [vmem:[%s13958_s18 + $0xca4] ss:$8 sps:$4 sm:$0xff]   ;;  %v13357_v2 = vld [vmem:[%s16608_s2 + $0x5f4] ss:$124 sps:$4 sm:$0xff]  }
 0x1ce   : > { %7254 = vmatprep.mubr.bf16.mxu0 %v13302_v3  ;;  %v13359_v3 = vld [vmem:[%s16608_s2 + $0x62c] ss:$124 sps:$4 sm:$0xff]  }
 0x1d4   : > { %6184 = vmatmul.mubr.bf16.vlgmr.msra.gmra.mrb[0].mxu1 %v13297_v4  ;;  %v13416_v4 = vld [vmem:[%s13958_s18 + $0x5a0] ss:$8 sps:$4 sm:$0xff]  }
 0x1d5   : > { %7255 = vmatmul.mubr.bf16.vlgmr.msra.gmra.mrb[0].mxu0 %v13300_v5  ;;  %6193 = vmatprep.mubr.bf16.mxu1 %v13303_v6  ;;  %v13420_v5 = vld [vmem:[%s13958_s18 + $0xca0] ss:$8 sps:$4 sm:$0xff]   ;;  %v13425_v6 = vld [vmem:[%s13958_s18 + $0x5b4] ss:$8 sps:$4 sm:$0xff]  }
 0x1d6   : > { %7264 = vmatprep.mubr.bf16.mxu0 %v13305_v7  ;;  %7376 = vmatpush1.bf16.msra.mxu0 %v13321_v8  ;;  %v13428_v7 = vld [vmem:[%s13958_s18 + $0xcb4] ss:$8 sps:$4 sm:$0xff]   ;;  %v13423_v8 = vld [vmem:[%s13958_s18 + $0x5b0] ss:$8 sps:$4 sm:$0xff]  }
 0x1d7   : > { %6305 = vmatpush1.bf16.msra.mxu1 %v13329_v9  ;;  %7377 = vmatprep.subr.bf16.mxu0 %v13335_v10  ;;  %v13426_v9 = vld [vmem:[%s13958_s18 + $0xcb0] ss:$8 sps:$4 sm:$0xff]   ;;  %v13436_v10 = vld [vmem:[%s13958_s18 + $0x5c4] ss:$8 sps:$4 sm:$0xff]  }
 0x1d8   : > { %6306 = vmatprep.subr.bf16.mxu1 %v13338_v11  ;;  %v13361_v11 = vld [vmem:[%s16608_s2 + $0x5f0] ss:$124 sps:$4 sm:$0xff]  }
 0x1da   : > { %7378 = vmatpush1.bf16.msra.mxu0 %v13333_v12  ;;  %v13365_v12 = vld [vmem:[%s16608_s2 + $0x628] ss:$124 sps:$4 sm:$0xff]  }
 0x1db   : > { %6307 = vmatpush1.bf16.msra.mxu1 %v13336_v15  ;;  %7379 = vmatprep.subr.bf16.mxu0 %v13341_v16  ;;  %v13377_v15 = vld [vmem:[%s16608_s2 + $0x724] ss:$124 sps:$4 sm:$0xff]  }
 0x1dc   : > { %6308 = vmatprep.subr.bf16.mxu1 %v13349_v17  ;;  %6194 = vmatmul.mubr.bf16.gmra.mrb[4].mxu1 %v13307_v13  ;;  %v13440_v13 = vld [vmem:[%s13958_s18 + $0xcc4] ss:$8 sps:$4 sm:$0xff]   ;;  %v13434_v16 = vld [vmem:[%s13958_s18 + $0x5c0] ss:$8 sps:$4 sm:$0xff]  }
 0x1dd   : > { %7265 = vmatmul.mubr.bf16.gmra.mrb[4].mxu0 %v13308_v14  ;;  %6203 = vmatprep.mubr.bf16.mxu1 %v13309_v18  ;;  %v13375_v14 = vld [vmem:[%s16608_s2 + $0x6ec] ss:$124 sps:$4 sm:$0xff]   ;;  %v13443_v18 = vld [vmem:[%s13958_s18 + $0x5d4] ss:$8 sps:$4 sm:$0xff]  }
 0x1de   : > { %7274 = vmatprep.mubr.bf16.mxu0 %v13311_v19  ;;  %7380 = vmatpush1.bf16.msra.mxu0 %v13339_v20  ;;  %v13438_v17 = vld [vmem:[%s13958_s18 + $0xcc0] ss:$8 sps:$4 sm:$0xff]   ;;  %v13446_v19 = vld [vmem:[%s13958_s18 + $0xcd4] ss:$8 sps:$4 sm:$0xff]   ;;  %v13441_v20 = vld [vmem:[%s13958_s18 + $0x5d0] ss:$8 sps:$4 sm:$0xff]  }
 0x1df   : > { %6309 = vmatpush1.bf16.msra.mxu1 %v13347_v21  ;;  %7381 = vmatprep.subr.bf16.mxu0 %v13356_v23  ;;  %v13444_v21 = vld [vmem:[%s13958_s18 + $0xcd0] ss:$8 sps:$4 sm:$0xff]   ;;  %v13379_v23 = vld [vmem:[%s16608_s2 + $0x6e8] ss:$124 sps:$4 sm:$0xff]  }
 0x1e0   : > { %6310 = vmatprep.subr.bf16.mxu1 %v13353_v22  ;;  %v13454_v22 = vld [vmem:[%s13958_s18 + $0x5e4] ss:$8 sps:$4 sm:$0xff]  }
 0x1e2   : > { %7382 = vmatpush1.bf16.msra.mxu0 %v13354_v25  ;;  %v13458_v25 = vld [vmem:[%s13958_s18 + $0xce4] ss:$8 sps:$4 sm:$0xff]  }
 0x1e3   : > { %6311 = vmatpush1.bf16.msra.mxu1 %v13351_v24  ;;  %7383 = vmatprep.subr.bf16.mxu0 %v13368_v29  ;;  %v13383_v24 = vld [vmem:[%s16608_s2 + $0x720] ss:$124 sps:$4 sm:$0xff]  }
 0x1e4   : > { %6312 = vmatprep.subr.bf16.mxu1 %v13364_v26  ;;  %6204 = vmatmul.mubr.bf16.gmra.mrb[8].mxu1 %v13313_v27  ;;  %v13393_v26 = vld [vmem:[%s16608_s2 + $0x7e4] ss:$124 sps:$4 sm:$0xff]   ;;  %v13395_v27 = vld [vmem:[%s16608_s2 + $0x81c] ss:$124 sps:$4 sm:$0xff]  }
 0x1e5   : > { %7275 = vmatmul.mubr.bf16.gmra.mrb[8].mxu0 %v13314_v28  ;;  %6213 = vmatprep.mubr.bf16.mxu1 %v13315_v30  ;;  %v13452_v28 = vld [vmem:[%s13958_s18 + $0x5e0] ss:$8 sps:$4 sm:$0xff]   ;;  %v13461_v30 = vld [vmem:[%s13958_s18 + $0x5f4] ss:$8 sps:$4 sm:$0xff]  }
 0x1e6   : > { %7284 = vmatprep.mubr.bf16.mxu0 %v13317_v31  ;;  %7384 = vmatpush1.bf16.msra.mxu0 %v13366_v33  ;;  %v13456_v29 = vld [vmem:[%s13958_s18 + $0xce0] ss:$8 sps:$4 sm:$0xff]   ;;  %v13464_v31 = vld [vmem:[%s13958_s18 + $0xcf4] ss:$8 sps:$4 sm:$0xff]   ;;  %v13462_v33 = vld [vmem:[%s13958_s18 + $0xcf0] ss:$8 sps:$4 sm:$0xff]  }
 0x1e7   : > { %6313 = vmatpush1.bf16.msra.mxu1 %v13362_v32  ;;  %7385 = vmatprep.subr.bf16.mxu0 %v13374_v35  ;;  %v13459_v32 = vld [vmem:[%s13958_s18 + $0x5f0] ss:$8 sps:$4 sm:$0xff]  }
 0x1e8   : > { %6314 = vmatprep.subr.bf16.mxu1 %v13371_v34  ;;  %v13397_v34 = vld [vmem:[%s16608_s2 + $0x7e0] ss:$124 sps:$4 sm:$0xff]   ;;  %v13401_v35 = vld [vmem:[%s16608_s2 + $0x818] ss:$124 sps:$4 sm:$0xff]  }
 0x1ea   : > { %7386 = vmatpush1.bf16.msra.mxu0 %v13372_v37  ;;  %v13499_v37 = vld [vmem:[%s13958_s18 + $0x604] ss:$8 sps:$4 sm:$0xff]  }
 0x1eb   : > { %6315 = vmatpush1.bf16.msra.mxu1 %v13369_v36  ;;  %7387 = vmatprep.subr.bf16.mxu0 %v13386_v41  ;;  %v13491_v36 = vld [vmem:[%s13958_s18 + $0xd04] ss:$8 sps:$4 sm:$0xff]  }
 0x1ec   : > { %6316 = vmatprep.subr.bf16.mxu1 %v13382_v38  ;;  %6214 = vmatmul.mubr.bf16.gmra.mrb[12].mxu1 %v13319_v39  ;;  %v13411_v38 = vld [vmem:[%s16608_s2 + $0x8dc] ss:$124 sps:$4 sm:$0xff]   ;;  %v13413_v39 = vld [vmem:[%s16608_s2 + $0x914] ss:$124 sps:$4 sm:$0xff]  }
 0x1ed   : > { %7285 = vmatmul.mubr.bf16.gmra.mrb[12].mxu0 %v13320_v40  ;;  %6223 = vmatprep.mubr.bf16.mxu1 %v13324_v42  ;;  %v13415_v40 = vld [vmem:[%s16608_s2 + $0x8d8] ss:$124 sps:$4 sm:$0xff]   ;;  %v13419_v41 = vld [vmem:[%s16608_s2 + $0x910] ss:$124 sps:$4 sm:$0xff]  }
 0x1ee   : > { %7294 = vmatprep.mubr.bf16.mxu0 %v13326_v43  ;;  %7388 = vmatpush1.bf16.msra.mxu0 %v13384_v45  ;;  %v13429_v42 = vld [vmem:[%s16608_s2 + $0x9d4] ss:$124 sps:$4 sm:$0xff]   ;;  %v13431_v43 = vld [vmem:[%s16608_s2 + $0xa0c] ss:$124 sps:$4 sm:$0xff]  }
 0x1ef   : > { %6317 = vmatpush1.bf16.msra.mxu1 %v13380_v44  ;;  %7389 = vmatprep.subr.bf16.mxu0 %v13392_v47  ;;  %v13433_v44 = vld [vmem:[%s16608_s2 + $0x9d0] ss:$124 sps:$4 sm:$0xff]   ;;  %v13437_v45 = vld [vmem:[%s16608_s2 + $0xa08] ss:$124 sps:$4 sm:$0xff]  }
 0x1f0   : > { %6318 = vmatprep.subr.bf16.mxu1 %v13389_v46  ;;  %v13447_v46 = vld [vmem:[%s16608_s2 + $0xacc] ss:$124 sps:$4 sm:$0xff]   ;;  %v13449_v47 = vld [vmem:[%s16608_s2 + $0xb04] ss:$124 sps:$4 sm:$0xff]  }
 0x1f2   : > { %7390 = vmatpush1.bf16.msra.mxu0 %v13390_v49  ;;  %v13455_v49 = vld [vmem:[%s16608_s2 + $0xb00] ss:$124 sps:$4 sm:$0xff]  }
 0x1f3   : > { %6319 = vmatpush1.bf16.msra.mxu1 %v13387_v48  ;;  %7391 = vmatprep.subr.bf16.mxu0 %v13404_v53  ;;  %v13451_v48 = vld [vmem:[%s16608_s2 + $0xac8] ss:$124 sps:$4 sm:$0xff]   ;;  %v13468_v53 = vld [vmem:[%s16608_s2 + $0x60] ss:$124 sps:$4 sm:$0xff]  }
 0x1f4   : > { %6320 = vmatprep.subr.bf16.mxu1 %v13400_v50  ;;  %6224 = vmatmul.mubr.bf16.gmra.mrb[16].mxu1 %v13328_v51  ;;  %v13467_v50 = vld [vmem:[%s16608_s2 + $0x2c] ss:$124 sps:$4 sm:$0xff]   ;;  %v13470_v51 = vld [vmem:[%s16608_s2 + $0x64] ss:$124 sps:$4 sm:$0xff]  }
 0x1f5   : > { %7295 = vmatmul.mubr.bf16.gmra.mrb[16].mxu0 %v13332_v52  ;;  %6233 = vmatprep.mubr.bf16.mxu1 %v13342_v54  ;;  %v13465_v52 = vld [vmem:[%s16608_s2 + $0x28] ss:$124 sps:$4 sm:$0xff]  }
 0x1f6   : > { %7304 = vmatprep.mubr.bf16.mxu0 %v13344_v55  ;;  %7392 = vmatpush1.bf16.msra.mxu0 %v13402_v57  ;;  %v13471_v54 = vld [vmem:[%s16608_s2 + $0x124] ss:$124 sps:$4 sm:$0xff]   ;;  %v13473_v55 = vld [vmem:[%s16608_s2 + $0x15c] ss:$124 sps:$4 sm:$0xff]  }
 0x1f7   : > { %6321 = vmatpush1.bf16.msra.mxu1 %v13398_v56  ;;  %7393 = vmatprep.subr.bf16.mxu0 %v13410_v59  ;;  %v13489_v56 = vld [vmem:[%s13958_s18 + $0xd00] ss:$8 sps:$4 sm:$0xff]   ;;  %v13506_v59 = vld [vmem:[%s13958_s18 + $0x614] ss:$8 sps:$4 sm:$0xff]  }
 0x1f8   : > { %6322 = vmatprep.subr.bf16.mxu1 %v13407_v58  ;;  %v13497_v57 = vld [vmem:[%s13958_s18 + $0x600] ss:$8 sps:$4 sm:$0xff]   ;;  %v13503_v58 = vld [vmem:[%s13958_s18 + $0xd14] ss:$8 sps:$4 sm:$0xff]  }
 0x1fa   : > { %7394 = vmatpush1.bf16.msra.mxu0 %v13408_v61  ;;  %v13504_v61 = vld [vmem:[%s13958_s18 + $0x610] ss:$8 sps:$4 sm:$0xff]  }
 0x1fb   : > { %6323 = vmatpush1.bf16.msra.mxu1 %v13405_v60  ;;  %7395 = vmatprep.subr.bf16.mxu0 %v13422_v1  ;;  %v13501_v60 = vld [vmem:[%s13958_s18 + $0xd10] ss:$8 sps:$4 sm:$0xff]  }
 0x1fc   : > { %6324 = vmatprep.subr.bf16.mxu1 %v13418_v62  ;;  %6234 = vmatmul.mubr.bf16.gmra.mrb[20].mxu1 %v13346_v63  ;;  %v13509_v62 = vld [vmem:[%s13958_s18 + $0xd24] ss:$8 sps:$4 sm:$0xff]   ;;  %v13476_v1 = vld [vmem:[%s16608_s2 + $0x158] ss:$124 sps:$4 sm:$0xff]  }
 0x1fd   : > { %7305 = vmatmul.mubr.bf16.gmra.mrb[20].mxu0 %v13350_v0  ;;  %6243 = vmatprep.mubr.bf16.mxu1 %v13357_v2  ;;  %v13517_v63 = vld [vmem:[%s13958_s18 + $0x624] ss:$8 sps:$4 sm:$0xff]   ;;  %v13475_v0 = vld [vmem:[%s16608_s2 + $0x120] ss:$124 sps:$4 sm:$0xff]  }
 0x1fe   : > { %7314 = vmatprep.mubr.bf16.mxu0 %v13359_v3  ;;  %7396 = vmatpush1.bf16.msra.mxu0 %v13420_v5  ;;  %v13477_v2 = vld [vmem:[%s16608_s2 + $0x21c] ss:$124 sps:$4 sm:$0xff]   ;;  %v13479_v3 = vld [vmem:[%s16608_s2 + $0x254] ss:$124 sps:$4 sm:$0xff]   ;;  %v13515_v5 = vld [vmem:[%s13958_s18 + $0x620] ss:$8 sps:$4 sm:$0xff]  }
 0x1ff   : > { %6325 = vmatpush1.bf16.msra.mxu1 %v13416_v4  ;;  %7397 = vmatprep.subr.bf16.mxu0 %v13428_v7  ;;  %v13507_v4 = vld [vmem:[%s13958_s18 + $0xd20] ss:$8 sps:$4 sm:$0xff]   ;;  %v13524_v7 = vld [vmem:[%s13958_s18 + $0xd34] ss:$8 sps:$4 sm:$0xff]  }
 0x200   : > { %6326 = vmatprep.subr.bf16.mxu1 %v13425_v6  ;;  %v13521_v6 = vld [vmem:[%s13958_s18 + $0x634] ss:$8 sps:$4 sm:$0xff]  }
 0x202   : > { %7398 = vmatpush1.bf16.msra.mxu0 %v13426_v9  ;;  %v13522_v9 = vld [vmem:[%s13958_s18 + $0xd30] ss:$8 sps:$4 sm:$0xff]  }
 0x203   : > { %6327 = vmatpush1.bf16.msra.mxu1 %v13423_v8  ;;  %7399 = vmatprep.subr.bf16.mxu0 %v13440_v13  ;;  %v13519_v8 = vld [vmem:[%s13958_s18 + $0x630] ss:$8 sps:$4 sm:$0xff]  }
 0x204   : > { %6328 = vmatprep.subr.bf16.mxu1 %v13436_v10  ;;  %6244 = vmatmul.mubr.bf16.gmra.mrb[24].mxu1 %v13361_v11  ;;  %v13532_v10 = vld [vmem:[%s13958_s18 + $0x644] ss:$8 sps:$4 sm:$0xff]  }
 0x205   : > { %7315 = vmatmul.mubr.bf16.gmra.mrb[24].mxu0 %v13365_v12  ;;  %6253 = vmatprep.mubr.bf16.mxu1 %v13375_v14  ;;  %v13536_v11 = vld [vmem:[%s13958_s18 + $0xd44] ss:$8 sps:$4 sm:$0xff]   ;;  %v13481_v12 = vld [vmem:[%s16608_s2 + $0x218] ss:$124 sps:$4 sm:$0xff]  }
 0x206   : > { %7324 = vmatprep.mubr.bf16.mxu0 %v13377_v15  ;;  %7400 = vmatpush1.bf16.msra.mxu0 %v13438_v17  ;;  %v13482_v13 = vld [vmem:[%s16608_s2 + $0x250] ss:$124 sps:$4 sm:$0xff]   ;;  %v13534_v17 = vld [vmem:[%s13958_s18 + $0xd40] ss:$8 sps:$4 sm:$0xff]  }
 0x207   : > { %6329 = vmatpush1.bf16.msra.mxu1 %v13434_v16  ;;  %7401 = vmatprep.subr.bf16.mxu0 %v13446_v19  ;;  %v13483_v14 = vld [vmem:[%s16608_s2 + $0x314] ss:$124 sps:$4 sm:$0xff]   ;;  %v13485_v15 = vld [vmem:[%s16608_s2 + $0x34c] ss:$124 sps:$4 sm:$0xff]  }
 0x208   : > { %6330 = vmatprep.subr.bf16.mxu1 %v13443_v18  ;;  %v13530_v16 = vld [vmem:[%s13958_s18 + $0x640] ss:$8 sps:$4 sm:$0xff]   ;;  %v13539_v18 = vld [vmem:[%s13958_s18 + $0x654] ss:$8 sps:$4 sm:$0xff]  }
 0x209   : > { %v13542_v19 = vld [vmem:[%s13958_s18 + $0xd54] ss:$8 sps:$4 sm:$0xff]  }
 0x20a   : > { %7402 = vmatpush1.bf16.msra.mxu0 %v13444_v21  ;;  %v13540_v21 = vld [vmem:[%s13958_s18 + $0xd50] ss:$8 sps:$4 sm:$0xff]  }
 0x20b   : > { %6331 = vmatpush1.bf16.msra.mxu1 %v13441_v20  ;;  %7403 = vmatprep.subr.bf16.mxu0 %v13458_v25  ;;  %v13537_v20 = vld [vmem:[%s13958_s18 + $0x650] ss:$8 sps:$4 sm:$0xff]   ;;  %v13488_v25 = vld [vmem:[%s16608_s2 + $0x348] ss:$124 sps:$4 sm:$0xff]  }
 0x20c   : > { %6332 = vmatprep.subr.bf16.mxu1 %v13454_v22  ;;  %6254 = vmatmul.mubr.bf16.gmra.mrb[28].mxu1 %v13379_v23  ;;  %v13550_v22 = vld [vmem:[%s13958_s18 + $0x664] ss:$8 sps:$4 sm:$0xff]  }
 0x20d   : > { %7325 = vmatmul.mubr.bf16.gmra.mrb[28].mxu0 %v13383_v24  ;;  %6263 = vmatprep.mubr.bf16.mxu1 %v13393_v26  ;;  %v13554_v23 = vld [vmem:[%s13958_s18 + $0xd64] ss:$8 sps:$4 sm:$0xff]  }
 0x20e   : > { %7334 = vmatprep.mubr.bf16.mxu0 %v13395_v27  ;;  %7404 = vmatpush1.bf16.msra.mxu0 %v13456_v29  ;;  %v13487_v24 = vld [vmem:[%s16608_s2 + $0x310] ss:$124 sps:$4 sm:$0xff]   ;;  %v13494_v27 = vld [vmem:[%s16608_s2 + $0x444] ss:$124 sps:$4 sm:$0xff]  }
 0x20f   : > { %6333 = vmatpush1.bf16.msra.mxu1 %v13452_v28  ;;  %7405 = vmatprep.subr.bf16.mxu0 %v13464_v31  ;;  %v13492_v26 = vld [vmem:[%s16608_s2 + $0x40c] ss:$124 sps:$4 sm:$0xff]   ;;  %v13560_v31 = vld [vmem:[%s13958_s18 + $0xd74] ss:$8 sps:$4 sm:$0xff]  }
 0x210   : > { %6334 = vmatprep.subr.bf16.mxu1 %v13461_v30  ;;  %v13548_v28 = vld [vmem:[%s13958_s18 + $0x660] ss:$8 sps:$4 sm:$0xff]   ;;  %v13557_v30 = vld [vmem:[%s13958_s18 + $0x674] ss:$8 sps:$4 sm:$0xff]  }
 0x211   : > { %v13552_v29 = vld [vmem:[%s13958_s18 + $0xd60] ss:$8 sps:$4 sm:$0xff]  }
 0x212   : > { %7406 = vmatpush1.bf16.msra.mxu0 %v13462_v33  ;;  %v13558_v33 = vld [vmem:[%s13958_s18 + $0xd70] ss:$8 sps:$4 sm:$0xff]  }
 0x213   : > { %6335 = vmatpush1.bf16.msra.mxu1 %v13459_v32  ;;  %7528 = vmatprep.subr.bf16.mxu0 %v13491_v36  ;;  %v13555_v32 = vld [vmem:[%s13958_s18 + $0x670] ss:$8 sps:$4 sm:$0xff]   ;;  %v13496_v36 = vld [vmem:[%s16608_s2 + $0x408] ss:$124 sps:$4 sm:$0xff]  }
 0x214   : > { %6457 = vmatprep.subr.bf16.mxu1 %v13499_v37  ;;  %6264 = vmatmul.mubr.bf16.gmra.mrb[32].mxu1 %v13397_v34  ;;  %v13568_v34 = vld [vmem:[%s13958_s18 + $0x684] ss:$8 sps:$4 sm:$0xff]   ;;  %v13500_v37 = vld [vmem:[%s16608_s2 + $0x440] ss:$124 sps:$4 sm:$0xff]  }
 0x215   : > { %7335 = vmatmul.mubr.bf16.gmra.mrb[32].mxu0 %v13401_v35  ;;  %6273 = vmatprep.mubr.bf16.mxu1 %v13411_v38  ;;  %v13572_v35 = vld [vmem:[%s13958_s18 + $0xd84] ss:$8 sps:$4 sm:$0xff]  }
 0x216   : > { %7344 = vmatprep.mubr.bf16.mxu0 %v13413_v39  ;;  %v13510_v38 = vld [vmem:[%s16608_s2 + $0x504] ss:$124 sps:$4 sm:$0xff]   ;;  %v13512_v39 = vld [vmem:[%s16608_s2 + $0x53c] ss:$124 sps:$4 sm:$0xff]  }
 0x21c   : > { %6274 = vmatmul.mubr.bf16.gmra.mrb[36].mxu1 %v13415_v40  ;;  %v13566_v40 = vld [vmem:[%s13958_s18 + $0x680] ss:$8 sps:$4 sm:$0xff]  }
 0x21d   : > { %7345 = vmatmul.mubr.bf16.gmra.mrb[36].mxu0 %v13419_v41  ;;  %6283 = vmatprep.mubr.bf16.mxu1 %v13429_v42  ;;  %v13570_v41 = vld [vmem:[%s13958_s18 + $0xd80] ss:$8 sps:$4 sm:$0xff]   ;;  %v13575_v42 = vld [vmem:[%s13958_s18 + $0x694] ss:$8 sps:$4 sm:$0xff]  }
 0x21e   : > { %7354 = vmatprep.mubr.bf16.mxu0 %v13431_v43  ;;  %v13578_v43 = vld [vmem:[%s13958_s18 + $0xd94] ss:$8 sps:$4 sm:$0xff]  }
 0x224   : > { %6284 = vmatmul.mubr.bf16.gmra.mrb[40].mxu1 %v13433_v44  ;;  %v13573_v44 = vld [vmem:[%s13958_s18 + $0x690] ss:$8 sps:$4 sm:$0xff]  }
 0x225   : > { %7355 = vmatmul.mubr.bf16.gmra.mrb[40].mxu0 %v13437_v45  ;;  %6293 = vmatprep.mubr.bf16.mxu1 %v13447_v46  ;;  %v13576_v45 = vld [vmem:[%s13958_s18 + $0xd90] ss:$8 sps:$4 sm:$0xff]   ;;  %v13586_v46 = vld [vmem:[%s13958_s18 + $0x6a4] ss:$8 sps:$4 sm:$0xff]  }
 0x226   : > { %7364 = vmatprep.mubr.bf16.mxu0 %v13449_v47  ;;  %v13590_v47 = vld [vmem:[%s13958_s18 + $0xda4] ss:$8 sps:$4 sm:$0xff]  }
 0x22c   : > { %6294 = vmatmul.mubr.bf16.gmra.mrb[44].mxu1 %v13451_v48  ;;  %v13514_v48 = vld [vmem:[%s16608_s2 + $0x500] ss:$124 sps:$4 sm:$0xff]  }
 0x22d   : > { %7365 = vmatmul.mubr.bf16.gmra.mrb[44].mxu0 %v13455_v49  ;;  %6336 = vmatprep.mubr.bf16.mxu1 %v13467_v50  ;;  %v13518_v49 = vld [vmem:[%s16608_s2 + $0x538] ss:$124 sps:$4 sm:$0xff]  }
 0x22e   : > { %7407 = vmatprep.mubr.bf16.mxu0 %v13470_v51  ;;  %v13525_v50 = vld [vmem:[%s16608_s2 + $0x5fc] ss:$124 sps:$4 sm:$0xff]   ;;  %v13527_v51 = vld [vmem:[%s16608_s2 + $0x634] ss:$124 sps:$4 sm:$0xff]  }
 0x234   : > { %6337 = vmatmul.mubr.bf16.vlgmr.msra.gmra.mrb[0].mxu1 %v13465_v52  ;;  %v13584_v52 = vld [vmem:[%s13958_s18 + $0x6a0] ss:$8 sps:$4 sm:$0xff]  }
 0x235   : > { %7408 = vmatmul.mubr.bf16.vlgmr.msra.gmra.mrb[0].mxu0 %v13468_v53  ;;  %6346 = vmatprep.mubr.bf16.mxu1 %v13471_v54  ;;  %v13588_v53 = vld [vmem:[%s13958_s18 + $0xda0] ss:$8 sps:$4 sm:$0xff]   ;;  %v13593_v54 = vld [vmem:[%s13958_s18 + $0x6b4] ss:$8 sps:$4 sm:$0xff]  }
 0x236   : > { %7417 = vmatprep.mubr.bf16.mxu0 %v13473_v55  ;;  %7529 = vmatpush1.bf16.msra.mxu0 %v13489_v56  ;;  %v13596_v55 = vld [vmem:[%s13958_s18 + $0xdb4] ss:$8 sps:$4 sm:$0xff]   ;;  %v13591_v56 = vld [vmem:[%s13958_s18 + $0x6b0] ss:$8 sps:$4 sm:$0xff]  }
 0x237   : > { %6458 = vmatpush1.bf16.msra.mxu1 %v13497_v57  ;;  %7530 = vmatprep.subr.bf16.mxu0 %v13503_v58  ;;  %v13594_v57 = vld [vmem:[%s13958_s18 + $0xdb0] ss:$8 sps:$4 sm:$0xff]   ;;  %v13604_v58 = vld [vmem:[%s13958_s18 + $0x6c4] ss:$8 sps:$4 sm:$0xff]  }
 0x238   : > { %6459 = vmatprep.subr.bf16.mxu1 %v13506_v59  ;;  %v13608_v59 = vld [vmem:[%s13958_s18 + $0xdc4] ss:$8 sps:$4 sm:$0xff]  }
 0x23a   : > { %7531 = vmatpush1.bf16.msra.mxu0 %v13501_v60  ;;  %v13529_v60 = vld [vmem:[%s16608_s2 + $0x5f8] ss:$124 sps:$4 sm:$0xff]  }
 0x23b   : > { %6460 = vmatpush1.bf16.msra.mxu1 %v13504_v61  ;;  %7532 = vmatprep.subr.bf16.mxu0 %v13509_v62  ;;  %v13533_v61 = vld [vmem:[%s16608_s2 + $0x630] ss:$124 sps:$4 sm:$0xff]  }
 0x23c   : > { %6461 = vmatprep.subr.bf16.mxu1 %v13517_v63  ;;  %6347 = vmatmul.mubr.bf16.gmra.mrb[4].mxu1 %v13475_v0  ;;  %v13543_v62 = vld [vmem:[%s16608_s2 + $0x6f4] ss:$124 sps:$4 sm:$0xff]   ;;  %v13545_v63 = vld [vmem:[%s16608_s2 + $0x72c] ss:$124 sps:$4 sm:$0xff]  }
 0x23d   : > { %7418 = vmatmul.mubr.bf16.gmra.mrb[4].mxu0 %v13476_v1  ;;  %6356 = vmatprep.mubr.bf16.mxu1 %v13477_v2  ;;  %v13602_v0 = vld [vmem:[%s13958_s18 + $0x6c0] ss:$8 sps:$4 sm:$0xff]   ;;  %v13611_v2 = vld [vmem:[%s13958_s18 + $0x6d4] ss:$8 sps:$4 sm:$0xff]  }
 0x23e   : > { %7427 = vmatprep.mubr.bf16.mxu0 %v13479_v3  ;;  %7533 = vmatpush1.bf16.msra.mxu0 %v13507_v4  ;;  %v13606_v1 = vld [vmem:[%s13958_s18 + $0xdc0] ss:$8 sps:$4 sm:$0xff]   ;;  %v13614_v3 = vld [vmem:[%s13958_s18 + $0xdd4] ss:$8 sps:$4 sm:$0xff]   ;;  %v13609_v4 = vld [vmem:[%s13958_s18 + $0x6d0] ss:$8 sps:$4 sm:$0xff]  }
 0x23f   : > { %6462 = vmatpush1.bf16.msra.mxu1 %v13515_v5  ;;  %7534 = vmatprep.subr.bf16.mxu0 %v13524_v7  ;;  %v13612_v5 = vld [vmem:[%s13958_s18 + $0xdd0] ss:$8 sps:$4 sm:$0xff]   ;;  %v13626_v7 = vld [vmem:[%s13958_s18 + $0xde4] ss:$8 sps:$4 sm:$0xff]  }
 0x240   : > { %6463 = vmatprep.subr.bf16.mxu1 %v13521_v6  ;;  %v13622_v6 = vld [vmem:[%s13958_s18 + $0x6e4] ss:$8 sps:$4 sm:$0xff]  }
 0x242   : > { %7535 = vmatpush1.bf16.msra.mxu0 %v13522_v9  ;;  %v13551_v9 = vld [vmem:[%s16608_s2 + $0x728] ss:$124 sps:$4 sm:$0xff]  }
 0x243   : > { %6464 = vmatpush1.bf16.msra.mxu1 %v13519_v8  ;;  %7536 = vmatprep.subr.bf16.mxu0 %v13536_v11  ;;  %v13547_v8 = vld [vmem:[%s16608_s2 + $0x6f0] ss:$124 sps:$4 sm:$0xff]   ;;  %v13563_v11 = vld [vmem:[%s16608_s2 + $0x824] ss:$124 sps:$4 sm:$0xff]  }
 0x244   : > { %6465 = vmatprep.subr.bf16.mxu1 %v13532_v10  ;;  %6357 = vmatmul.mubr.bf16.gmra.mrb[8].mxu1 %v13481_v12  ;;  %v13561_v10 = vld [vmem:[%s16608_s2 + $0x7ec] ss:$124 sps:$4 sm:$0xff]  }
 0x245   : > { %7428 = vmatmul.mubr.bf16.gmra.mrb[8].mxu0 %v13482_v13  ;;  %6366 = vmatprep.mubr.bf16.mxu1 %v13483_v14  ;;  %v13620_v12 = vld [vmem:[%s13958_s18 + $0x6e0] ss:$8 sps:$4 sm:$0xff]   ;;  %v13629_v14 = vld [vmem:[%s13958_s18 + $0x6f4] ss:$8 sps:$4 sm:$0xff]  }
 0x246   : > { %7437 = vmatprep.mubr.bf16.mxu0 %v13485_v15  ;;  %7537 = vmatpush1.bf16.msra.mxu0 %v13534_v17  ;;  %v13624_v13 = vld [vmem:[%s13958_s18 + $0xde0] ss:$8 sps:$4 sm:$0xff]   ;;  %v13632_v15 = vld [vmem:[%s13958_s18 + $0xdf4] ss:$8 sps:$4 sm:$0xff]   ;;  %v13630_v17 = vld [vmem:[%s13958_s18 + $0xdf0] ss:$8 sps:$4 sm:$0xff]  }
 0x247   : > { %6466 = vmatpush1.bf16.msra.mxu1 %v13530_v16  ;;  %7538 = vmatprep.subr.bf16.mxu0 %v13542_v19  ;;  %v13627_v16 = vld [vmem:[%s13958_s18 + $0x6f0] ss:$8 sps:$4 sm:$0xff]   ;;  %v13565_v19 = vld [vmem:[%s16608_s2 + $0x7e8] ss:$124 sps:$4 sm:$0xff]  }
 0x248   : > { %6467 = vmatprep.subr.bf16.mxu1 %v13539_v18  ;;  %v13659_v18 = vld [vmem:[%s13958_s18 + $0xe04] ss:$8 sps:$4 sm:$0xff]  }
 0x24a   : > { %7539 = vmatpush1.bf16.msra.mxu0 %v13540_v21  ;;  %v13579_v21 = vld [vmem:[%s16608_s2 + $0x8e4] ss:$124 sps:$4 sm:$0xff]  }
 0x24b   : > { %6468 = vmatpush1.bf16.msra.mxu1 %v13537_v20  ;;  %7540 = vmatprep.subr.bf16.mxu0 %v13554_v23  ;;  %v13569_v20 = vld [vmem:[%s16608_s2 + $0x820] ss:$124 sps:$4 sm:$0xff]  }
 0x24c   : > { %6469 = vmatprep.subr.bf16.mxu1 %v13550_v22  ;;  %6367 = vmatmul.mubr.bf16.gmra.mrb[12].mxu1 %v13487_v24  ;;  %v13581_v22 = vld [vmem:[%s16608_s2 + $0x91c] ss:$124 sps:$4 sm:$0xff]  }
 0x24d   : > { %7438 = vmatmul.mubr.bf16.gmra.mrb[12].mxu0 %v13488_v25  ;;  %6376 = vmatprep.mubr.bf16.mxu1 %v13492_v26  ;;  %v13583_v23 = vld [vmem:[%s16608_s2 + $0x8e0] ss:$124 sps:$4 sm:$0xff]   ;;  %v13587_v24 = vld [vmem:[%s16608_s2 + $0x918] ss:$124 sps:$4 sm:$0xff]  }
 0x24e   : > { %7447 = vmatprep.mubr.bf16.mxu0 %v13494_v27  ;;  %7541 = vmatpush1.bf16.msra.mxu0 %v13552_v29  ;;  %v13597_v25 = vld [vmem:[%s16608_s2 + $0x9dc] ss:$124 sps:$4 sm:$0xff]   ;;  %v13599_v26 = vld [vmem:[%s16608_s2 + $0xa14] ss:$124 sps:$4 sm:$0xff]  }
 0x24f   : > { %6470 = vmatpush1.bf16.msra.mxu1 %v13548_v28  ;;  %7542 = vmatprep.subr.bf16.mxu0 %v13560_v31  ;;  %v13601_v27 = vld [vmem:[%s16608_s2 + $0x9d8] ss:$124 sps:$4 sm:$0xff]   ;;  %v13605_v28 = vld [vmem:[%s16608_s2 + $0xa10] ss:$124 sps:$4 sm:$0xff]  }
 0x250   : > { %6471 = vmatprep.subr.bf16.mxu1 %v13557_v30  ;;  %v13615_v29 = vld [vmem:[%s16608_s2 + $0xad4] ss:$124 sps:$4 sm:$0xff]   ;;  %v13617_v30 = vld [vmem:[%s16608_s2 + $0xb0c] ss:$124 sps:$4 sm:$0xff]  }
 0x251   : > { %v13619_v31 = vld [vmem:[%s16608_s2 + $0xad0] ss:$124 sps:$4 sm:$0xff]  }
 0x252   : > { %7543 = vmatpush1.bf16.msra.mxu0 %v13558_v33  ;;  %v13635_v33 = vld [vmem:[%s16608_s2 + $0x34] ss:$124 sps:$4 sm:$0xff]  }
 0x253   : > { %6472 = vmatpush1.bf16.msra.mxu1 %v13555_v32  ;;  %7544 = vmatprep.subr.bf16.mxu0 %v13572_v35  ;;  %v13623_v32 = vld [vmem:[%s16608_s2 + $0xb08] ss:$124 sps:$4 sm:$0xff]   ;;  %v13633_v35 = vld [vmem:[%s16608_s2 + $0x30] ss:$124 sps:$4 sm:$0xff]  }
 0x254   : > { %6473 = vmatprep.subr.bf16.mxu1 %v13568_v34  ;;  %6377 = vmatmul.mubr.bf16.gmra.mrb[16].mxu1 %v13496_v36  ;;  %v13638_v34 = vld [vmem:[%s16608_s2 + $0x6c] ss:$124 sps:$4 sm:$0xff]  }
 0x255   : > { %7448 = vmatmul.mubr.bf16.gmra.mrb[16].mxu0 %v13500_v37  ;;  %6386 = vmatprep.mubr.bf16.mxu1 %v13510_v38  ;;  %v13636_v36 = vld [vmem:[%s16608_s2 + $0x68] ss:$124 sps:$4 sm:$0xff]  }
 0x256   : > { %7457 = vmatprep.mubr.bf16.mxu0 %v13512_v39  ;;  %7545 = vmatpush1.bf16.msra.mxu0 %v13570_v41  ;;  %v13639_v37 = vld [vmem:[%s16608_s2 + $0x12c] ss:$124 sps:$4 sm:$0xff]   ;;  %v13641_v38 = vld [vmem:[%s16608_s2 + $0x164] ss:$124 sps:$4 sm:$0xff]   ;;  %v13666_v41 = vld [vmem:[%s13958_s18 + $0xe10] ss:$8 sps:$4 sm:$0xff]  }
 0x257   : > { %6474 = vmatpush1.bf16.msra.mxu1 %v13566_v40  ;;  %7546 = vmatprep.subr.bf16.mxu0 %v13578_v43  ;;  %v13657_v39 = vld [vmem:[%s13958_s18 + $0xe00] ss:$8 sps:$4 sm:$0xff]   ;;  %v13668_v40 = vld [vmem:[%s13958_s18 + $0xe14] ss:$8 sps:$4 sm:$0xff]  }
 0x258   : > { %6475 = vmatprep.subr.bf16.mxu1 %v13575_v42  ;;  %v13671_v42 = vld [vmem:[%s13958_s18 + $0xe24] ss:$8 sps:$4 sm:$0xff]  }
 0x259   : > { %v13643_v43 = vld [vmem:[%s16608_s2 + $0x128] ss:$124 sps:$4 sm:$0xff]  }
 0x25a   : > { %7547 = vmatpush1.bf16.msra.mxu0 %v13576_v45  ;;  %v13645_v45 = vld [vmem:[%s16608_s2 + $0x224] ss:$124 sps:$4 sm:$0xff]  }
 0x25b   : > { %6476 = vmatpush1.bf16.msra.mxu1 %v13573_v44  ;;  %7548 = vmatprep.subr.bf16.mxu0 %v13590_v47  ;;  %v13644_v44 = vld [vmem:[%s16608_s2 + $0x160] ss:$124 sps:$4 sm:$0xff]  }
 0x25c   : > { %6477 = vmatprep.subr.bf16.mxu1 %v13586_v46  ;;  %6387 = vmatmul.mubr.bf16.gmra.mrb[20].mxu1 %v13514_v48  ;;  %v13647_v46 = vld [vmem:[%s16608_s2 + $0x25c] ss:$124 sps:$4 sm:$0xff]   ;;  %v13669_v47 = vld [vmem:[%s13958_s18 + $0xe20] ss:$8 sps:$4 sm:$0xff]  }
 0x25d   : > { %7458 = vmatmul.mubr.bf16.gmra.mrb[20].mxu0 %v13518_v49  ;;  %6396 = vmatprep.mubr.bf16.mxu1 %v13525_v50  ;;  %v13680_v48 = vld [vmem:[%s13958_s18 + $0xe34] ss:$8 sps:$4 sm:$0xff]   ;;  %v13678_v49 = vld [vmem:[%s13958_s18 + $0xe30] ss:$8 sps:$4 sm:$0xff]   ;;  %v13689_v50 = vld [vmem:[%s13958_s18 + $0xe44] ss:$8 sps:$4 sm:$0xff]  }
 0x25e   : > { %7467 = vmatprep.mubr.bf16.mxu0 %v13527_v51  ;;  %7549 = vmatpush1.bf16.msra.mxu0 %v13588_v53  ;;  %v13649_v51 = vld [vmem:[%s16608_s2 + $0x220] ss:$124 sps:$4 sm:$0xff]  }
 0x25f   : > { %6478 = vmatpush1.bf16.msra.mxu1 %v13584_v52  ;;  %7550 = vmatprep.subr.bf16.mxu0 %v13596_v55  ;;  %v13650_v52 = vld [vmem:[%s16608_s2 + $0x258] ss:$124 sps:$4 sm:$0xff]   ;;  %v13687_v55 = vld [vmem:[%s13958_s18 + $0xe40] ss:$8 sps:$4 sm:$0xff]  }
 0x260   : > { %6479 = vmatprep.subr.bf16.mxu1 %v13593_v54  ;;  %v13651_v53 = vld [vmem:[%s16608_s2 + $0x31c] ss:$124 sps:$4 sm:$0xff]   ;;  %v13653_v54 = vld [vmem:[%s16608_s2 + $0x354] ss:$124 sps:$4 sm:$0xff]  }
 0x262   : > { %7551 = vmatpush1.bf16.msra.mxu0 %v13594_v57  ;;  %v13690_v57 = vld [vmem:[%s13958_s18 + $0xe50] ss:$8 sps:$4 sm:$0xff]  }
 0x263   : > { %6480 = vmatpush1.bf16.msra.mxu1 %v13591_v56  ;;  %7552 = vmatprep.subr.bf16.mxu0 %v13608_v59  ;;  %v13692_v56 = vld [vmem:[%s13958_s18 + $0xe54] ss:$8 sps:$4 sm:$0xff]  }
 0x264   : > { %6481 = vmatprep.subr.bf16.mxu1 %v13604_v58  ;;  %6397 = vmatmul.mubr.bf16.gmra.mrb[24].mxu1 %v13529_v60  ;;  %v13701_v58 = vld [vmem:[%s13958_s18 + $0xe64] ss:$8 sps:$4 sm:$0xff]   ;;  %v13655_v59 = vld [vmem:[%s16608_s2 + $0x318] ss:$124 sps:$4 sm:$0xff]  }
 0x265   : > { %7468 = vmatmul.mubr.bf16.gmra.mrb[24].mxu0 %v13533_v61  ;;  %6406 = vmatprep.mubr.bf16.mxu1 %v13543_v62  ;;  %v13656_v60 = vld [vmem:[%s16608_s2 + $0x350] ss:$124 sps:$4 sm:$0xff]   ;;  %v13883_v61 = vmov 0  }
 0x266   : > { %7477 = vmatprep.mubr.bf16.mxu0 %v13545_v63  ;;  %7553 = vmatpush1.bf16.msra.mxu0 %v13606_v1  ;;  %v13660_v62 = vld [vmem:[%s16608_s2 + $0x414] ss:$124 sps:$4 sm:$0xff]   ;;  %v13662_v63 = vld [vmem:[%s16608_s2 + $0x44c] ss:$124 sps:$4 sm:$0xff]  }
 0x267   : > { %6482 = vmatpush1.bf16.msra.mxu1 %v13602_v0  ;;  %7554 = vmatprep.subr.bf16.mxu0 %v13614_v3  ;;  %v13699_v0 = vld [vmem:[%s13958_s18 + $0xe60] ss:$8 sps:$4 sm:$0xff]   ;;  %v13704_v1 = vld [vmem:[%s13958_s18 + $0xe74] ss:$8 sps:$4 sm:$0xff]   ;;  %v13713_v3 = vld [vmem:[%s13958_s18 + $0xe84] ss:$8 sps:$4 sm:$0xff]  }
 0x268   : > { %6483 = vmatprep.subr.bf16.mxu1 %v13611_v2  ;;  %12527 = vset.pattern.permute.xlu0 %v13883_v61  ;;  %v13702_v2 = vld [vmem:[%s13958_s18 + $0xe70] ss:$8 sps:$4 sm:$0xff]  }
 0x269   : > { %12528 = vset.pattern.permute.xlu1 %v13883_v61 }
 0x26a   : > { %7555 = vmatpush1.bf16.msra.mxu0 %v13612_v5  ;;  %v13665_v5 = vld [vmem:[%s16608_s2 + $0x448] ss:$124 sps:$4 sm:$0xff]  }
 0x26b   : > { %6484 = vmatpush1.bf16.msra.mxu1 %v13609_v4  ;;  %7556 = vmatprep.subr.bf16.mxu0 %v13626_v7  ;;  %v13664_v4 = vld [vmem:[%s16608_s2 + $0x410] ss:$124 sps:$4 sm:$0xff]   ;;  %v13674_v7 = vld [vmem:[%s16608_s2 + $0x544] ss:$124 sps:$4 sm:$0xff]  }
 0x26c   : > { %6485 = vmatprep.subr.bf16.mxu1 %v13622_v6  ;;  %6407 = vmatmul.mubr.bf16.gmra.mrb[28].mxu1 %v13547_v8  ;;  %v13672_v6 = vld [vmem:[%s16608_s2 + $0x50c] ss:$124 sps:$4 sm:$0xff]  }
 0x26d   : > { %7478 = vmatmul.mubr.bf16.gmra.mrb[28].mxu0 %v13551_v9  ;;  %6416 = vmatprep.mubr.bf16.mxu1 %v13561_v10  ;;  %v13711_v8 = vld [vmem:[%s13958_s18 + $0xe80] ss:$8 sps:$4 sm:$0xff]   ;;  %v13716_v9 = vld [vmem:[%s13958_s18 + $0xe94] ss:$8 sps:$4 sm:$0xff]   ;;  %v13714_v10 = vld [vmem:[%s13958_s18 + $0xe90] ss:$8 sps:$4 sm:$0xff]  }
 0x26e   : > { %7487 = vmatprep.mubr.bf16.mxu0 %v13563_v11  ;;  %7557 = vmatpush1.bf16.msra.mxu0 %v13624_v13  ;;  %v13725_v11 = vld [vmem:[%s13958_s18 + $0xea4] ss:$8 sps:$4 sm:$0xff]   ;;  %v13677_v13 = vld [vmem:[%s16608_s2 + $0x540] ss:$124 sps:$4 sm:$0xff]  }
 0x26f   : > { %6486 = vmatpush1.bf16.msra.mxu1 %v13620_v12  ;;  %7558 = vmatprep.subr.bf16.mxu0 %v13632_v15  ;;  %v13676_v12 = vld [vmem:[%s16608_s2 + $0x508] ss:$124 sps:$4 sm:$0xff]   ;;  %v13683_v15 = vld [vmem:[%s16608_s2 + $0x63c] ss:$124 sps:$4 sm:$0xff]  }
 0x270   : > { %6487 = vmatprep.subr.bf16.mxu1 %v13629_v14  ;;  %v13681_v14 = vld [vmem:[%s16608_s2 + $0x604] ss:$124 sps:$4 sm:$0xff]  }
 0x272   : > { %7559 = vmatpush1.bf16.msra.mxu0 %v13630_v17  ;;  %v13728_v17 = vld [vmem:[%s13958_s18 + $0xeb4] ss:$8 sps:$4 sm:$0xff]  }
 0x273   : > { %6488 = vmatpush1.bf16.msra.mxu1 %v13627_v16  ;;  %7681 = vmatprep.subr.bf16.mxu0 %v13659_v18  ;;  %v13723_v16 = vld [vmem:[%s13958_s18 + $0xea0] ss:$8 sps:$4 sm:$0xff]  }
 0x274   : > { %11761 = vmatprep.subr.bf16.mxu1 %v13659_v18  ;;  %6417 = vmatmul.mubr.bf16.gmra.mrb[32].mxu1 %v13565_v19  ;;  %v13726_v18 = vld [vmem:[%s13958_s18 + $0xeb0] ss:$8 sps:$4 sm:$0xff]   ;;  %v13737_v19 = vld [vmem:[%s13958_s18 + $0xec4] ss:$8 sps:$4 sm:$0xff]  }
 0x275   : > { %7488 = vmatmul.mubr.bf16.gmra.mrb[32].mxu0 %v13569_v20  ;;  %6426 = vmatprep.mubr.bf16.mxu1 %v13579_v21  ;;  %v13685_v20 = vld [vmem:[%s16608_s2 + $0x600] ss:$124 sps:$4 sm:$0xff]   ;;  %v13686_v21 = vld [vmem:[%s16608_s2 + $0x638] ss:$124 sps:$4 sm:$0xff]  }
 0x276   : > { %7497 = vmatprep.mubr.bf16.mxu0 %v13581_v22  ;;  %v13693_v22 = vld [vmem:[%s16608_s2 + $0x6fc] ss:$124 sps:$4 sm:$0xff]  }
 0x27c   : > { %6427 = vmatmul.mubr.bf16.gmra.mrb[36].mxu1 %v13583_v23  ;;  %v13695_v23 = vld [vmem:[%s16608_s2 + $0x734] ss:$124 sps:$4 sm:$0xff]  }
 0x27d   : > { %7498 = vmatmul.mubr.bf16.gmra.mrb[36].mxu0 %v13587_v24  ;;  %6436 = vmatprep.mubr.bf16.mxu1 %v13597_v25  ;;  %v13735_v24 = vld [vmem:[%s13958_s18 + $0xec0] ss:$8 sps:$4 sm:$0xff]   ;;  %v13740_v25 = vld [vmem:[%s13958_s18 + $0xed4] ss:$8 sps:$4 sm:$0xff]  }
 0x27e   : > { %7507 = vmatprep.mubr.bf16.mxu0 %v13599_v26  ;;  %v13738_v26 = vld [vmem:[%s13958_s18 + $0xed0] ss:$8 sps:$4 sm:$0xff]  }
 0x284   : > { %6437 = vmatmul.mubr.bf16.gmra.mrb[40].mxu1 %v13601_v27  ;;  %v13749_v27 = vld [vmem:[%s13958_s18 + $0xee4] ss:$8 sps:$4 sm:$0xff]  }
 0x285   : > { %7508 = vmatmul.mubr.bf16.gmra.mrb[40].mxu0 %v13605_v28  ;;  %6446 = vmatprep.mubr.bf16.mxu1 %v13615_v29  ;;  %v13697_v28 = vld [vmem:[%s16608_s2 + $0x6f8] ss:$124 sps:$4 sm:$0xff]   ;;  %v13698_v29 = vld [vmem:[%s16608_s2 + $0x730] ss:$124 sps:$4 sm:$0xff]  }
 0x286   : > { %7517 = vmatprep.mubr.bf16.mxu0 %v13617_v30  ;;  %v13705_v30 = vld [vmem:[%s16608_s2 + $0x7f4] ss:$124 sps:$4 sm:$0xff]  }
 0x28c   : > { %6447 = vmatmul.mubr.bf16.gmra.mrb[44].mxu1 %v13619_v31  ;;  %v13707_v31 = vld [vmem:[%s16608_s2 + $0x82c] ss:$124 sps:$4 sm:$0xff]  }
 0x28d   : > { %7518 = vmatmul.mubr.bf16.gmra.mrb[44].mxu0 %v13623_v32  ;;  %6489 = vmatprep.mubr.bf16.mxu1 %v13635_v33  ;;  %v13747_v32 = vld [vmem:[%s13958_s18 + $0xee0] ss:$8 sps:$4 sm:$0xff]   ;;  %v13752_v33 = vld [vmem:[%s13958_s18 + $0xef4] ss:$8 sps:$4 sm:$0xff]  }
 0x28e   : > { %7560 = vmatprep.mubr.bf16.mxu0 %v13638_v34  ;;  %v13750_v34 = vld [vmem:[%s13958_s18 + $0xef0] ss:$8 sps:$4 sm:$0xff]  }
 0x294   : > { %6490 = vmatmul.mubr.bf16.vlgmr.msra.gmra.mrb[0].mxu1 %v13633_v35  ;;  %v13779_v35 = vld [vmem:[%s13958_s18 + $0xf04] ss:$8 sps:$4 sm:$0xff]  }
 0x295   : > { %7561 = vmatmul.mubr.bf16.vlgmr.msra.gmra.mrb[0].mxu0 %v13636_v36  ;;  %6499 = vmatprep.mubr.bf16.mxu1 %v13639_v37  ;;  %v13709_v36 = vld [vmem:[%s16608_s2 + $0x7f0] ss:$124 sps:$4 sm:$0xff]   ;;  %v13710_v37 = vld [vmem:[%s16608_s2 + $0x828] ss:$124 sps:$4 sm:$0xff]  }
 0x296   : > { %7570 = vmatprep.mubr.bf16.mxu0 %v13641_v38  ;;  %7682 = vmatpush1.bf16.msra.mxu0 %v13657_v39  ;;  %v13717_v38 = vld [vmem:[%s16608_s2 + $0x8ec] ss:$124 sps:$4 sm:$0xff]  }
 0x297   : > { %11777 = vmatpush1.bf16.msra.mxu1 %v13657_v39  ;;  %7683 = vmatprep.subr.bf16.mxu0 %v13668_v40  ;;  %v13719_v39 = vld [vmem:[%s16608_s2 + $0x924] ss:$124 sps:$4 sm:$0xff]  }
 0x298   : > { %11762 = vmatprep.subr.bf16.mxu1 %v13668_v40  ;;  %v13721_v40 = vld [vmem:[%s16608_s2 + $0x8e8] ss:$124 sps:$4 sm:$0xff]  }
 0x29a   : > { %7684 = vmatpush1.bf16.msra.mxu0 %v13666_v41 }
 0x29b   : > { %11778 = vmatpush1.bf16.msra.mxu1 %v13666_v41  ;;  %7685 = vmatprep.subr.bf16.mxu0 %v13671_v42  ;;  %v13722_v41 = vld [vmem:[%s16608_s2 + $0x920] ss:$124 sps:$4 sm:$0xff]  }
 0x29c   : > { %11763 = vmatprep.subr.bf16.mxu1 %v13671_v42  ;;  %6500 = vmatmul.mubr.bf16.gmra.mrb[4].mxu1 %v13643_v43  ;;  %v13729_v42 = vld [vmem:[%s16608_s2 + $0x9e4] ss:$124 sps:$4 sm:$0xff]   ;;  %v13731_v43 = vld [vmem:[%s16608_s2 + $0xa1c] ss:$124 sps:$4 sm:$0xff]  }
 0x29d   : > { %7571 = vmatmul.mubr.bf16.gmra.mrb[4].mxu0 %v13644_v44  ;;  %6509 = vmatprep.mubr.bf16.mxu1 %v13645_v45  ;;  %v13733_v44 = vld [vmem:[%s16608_s2 + $0x9e0] ss:$124 sps:$4 sm:$0xff]   ;;  %v13734_v45 = vld [vmem:[%s16608_s2 + $0xa18] ss:$124 sps:$4 sm:$0xff]  }
 0x29e   : > { %7580 = vmatprep.mubr.bf16.mxu0 %v13647_v46  ;;  %7686 = vmatpush1.bf16.msra.mxu0 %v13669_v47  ;;  %v13741_v46 = vld [vmem:[%s16608_s2 + $0xadc] ss:$124 sps:$4 sm:$0xff]  }
 0x29f   : > { %11779 = vmatpush1.bf16.msra.mxu1 %v13669_v47  ;;  %7687 = vmatprep.subr.bf16.mxu0 %v13680_v48  ;;  %v13743_v47 = vld [vmem:[%s16608_s2 + $0xb14] ss:$124 sps:$4 sm:$0xff]  }
 0x2a0   : > { %11764 = vmatprep.subr.bf16.mxu1 %v13680_v48  ;;  %v13745_v48 = vld [vmem:[%s16608_s2 + $0xad8] ss:$124 sps:$4 sm:$0xff]  }
 0x2a2   : > { %7688 = vmatpush1.bf16.msra.mxu0 %v13678_v49 }
 0x2a3   : > { %11780 = vmatpush1.bf16.msra.mxu1 %v13678_v49  ;;  %7689 = vmatprep.subr.bf16.mxu0 %v13689_v50  ;;  %v13746_v49 = vld [vmem:[%s16608_s2 + $0xb10] ss:$124 sps:$4 sm:$0xff]  }
 0x2a4   : > { %11765 = vmatprep.subr.bf16.mxu1 %v13689_v50  ;;  %6510 = vmatmul.mubr.bf16.gmra.mrb[8].mxu1 %v13649_v51  ;;  %v13755_v50 = vld [vmem:[%s16608_s2 + $0x74] ss:$124 sps:$4 sm:$0xff]   ;;  %v13758_v51 = vld [vmem:[%s16608_s2 + $0x73c] ss:$124 sps:$4 sm:$0xff]  }
 0x2a5   : > { %7581 = vmatmul.mubr.bf16.gmra.mrb[8].mxu0 %v13650_v52  ;;  %6519 = vmatprep.mubr.bf16.mxu1 %v13651_v53  ;;  %v13753_v52 = vld [vmem:[%s16608_s2 + $0x70] ss:$124 sps:$4 sm:$0xff]   ;;  %v13756_v53 = vld [vmem:[%s16608_s2 + $0x738] ss:$124 sps:$4 sm:$0xff]  }
 0x2a6   : > { %7590 = vmatprep.mubr.bf16.mxu0 %v13653_v54  ;;  %7690 = vmatpush1.bf16.msra.mxu0 %v13687_v55  ;;  %v13759_v54 = vld [vmem:[%s16608_s2 + $0x16c] ss:$124 sps:$4 sm:$0xff]  }
 0x2a7   : > { %11781 = vmatpush1.bf16.msra.mxu1 %v13687_v55  ;;  %7691 = vmatprep.subr.bf16.mxu0 %v13692_v56  ;;  %v13761_v55 = vld [vmem:[%s16608_s2 + $0x834] ss:$124 sps:$4 sm:$0xff]  }
 0x2a8   : > { %11766 = vmatprep.subr.bf16.mxu1 %v13692_v56  ;;  %v13777_v56 = vld [vmem:[%s13958_s18 + $0xf00] ss:$8 sps:$4 sm:$0xff]  }
 0x2aa   : > { %7692 = vmatpush1.bf16.msra.mxu0 %v13690_v57 }
 0x2ab   : > { %11782 = vmatpush1.bf16.msra.mxu1 %v13690_v57  ;;  %7693 = vmatprep.subr.bf16.mxu0 %v13701_v58  ;;  %v13794_v57 = vld [vmem:[%s13958_s18 + $0xf14] ss:$8 sps:$4 sm:$0xff]  }
 0x2ac   : > { %11767 = vmatprep.subr.bf16.mxu1 %v13701_v58  ;;  %6520 = vmatmul.mubr.bf16.gmra.mrb[12].mxu1 %v13655_v59  ;;  %v13792_v58 = vld [vmem:[%s13958_s18 + $0xf10] ss:$8 sps:$4 sm:$0xff]   ;;  %v13763_v59 = vld [vmem:[%s16608_s2 + $0x168] ss:$124 sps:$4 sm:$0xff]  }
 0x2ad   : > { %7591 = vmatmul.mubr.bf16.gmra.mrb[12].mxu0 %v13656_v60  ;;  %6529 = vmatprep.mubr.bf16.mxu1 %v13660_v62  ;;  %v13764_v60 = vld [vmem:[%s16608_s2 + $0x830] ss:$124 sps:$4 sm:$0xff]   ;;  %v13765_v62 = vld [vmem:[%s16608_s2 + $0x264] ss:$124 sps:$4 sm:$0xff]  }
 0x2ae   : > { %7600 = vmatprep.mubr.bf16.mxu0 %v13662_v63  ;;  %7694 = vmatpush1.bf16.msra.mxu0 %v13699_v0  ;;  %v13767_v63 = vld [vmem:[%s16608_s2 + $0x92c] ss:$124 sps:$4 sm:$0xff]  }
 0x2af   : > { %11783 = vmatpush1.bf16.msra.mxu1 %v13699_v0  ;;  %7695 = vmatprep.subr.bf16.mxu0 %v13704_v1  ;;  %v7987_v0 = vld [vmem:[%s16609_s3] sm:$0xff] }
 0x2b0   : > { %11768 = vmatprep.subr.bf16.mxu1 %v13704_v1  ;;  %7993 = vperm.xlu0 %12527, %v7987_v0   ;;  %v13769_v1 = vld [vmem:[%s16608_s2 + $0x260] ss:$124 sps:$4 sm:$0xff]  }
 0x2b2   : > { %7696 = vmatpush1.bf16.msra.mxu0 %v13702_v2 }
 0x2b3   : > { %11784 = vmatpush1.bf16.msra.mxu1 %v13702_v2  ;;  %7697 = vmatprep.subr.bf16.mxu0 %v13713_v3  ;;  %v13770_v2 = vld [vmem:[%s16608_s2 + $0x928] ss:$124 sps:$4 sm:$0xff]  }
 0x2b4   : > { %11769 = vmatprep.subr.bf16.mxu1 %v13713_v3  ;;  %6530 = vmatmul.mubr.bf16.gmra.mrb[16].mxu1 %v13664_v4  ;;  %v7988_v3 = vld [vmem:[%s16609_s3 + $0x8] sm:$0xff]  ;;  %v13771_v4 = vld [vmem:[%s16608_s2 + $0x35c] ss:$124 sps:$4 sm:$0xff]  }
 0x2b5   : > { %7601 = vmatmul.mubr.bf16.gmra.mrb[16].mxu0 %v13665_v5  ;;  %6539 = vmatprep.mubr.bf16.mxu1 %v13672_v6  ;;  %v13773_v5 = vld [vmem:[%s16608_s2 + $0xa24] ss:$124 sps:$4 sm:$0xff]   ;;  %v7989_v6 = vld [vmem:[%s16609_s3 + $0x10] sm:$0xff] }
 0x2b6   : > { %7610 = vmatprep.mubr.bf16.mxu0 %v13674_v7  ;;  %7698 = vmatpush1.bf16.msra.mxu0 %v13711_v8  ;;  %v13775_v7 = vld [vmem:[%s16608_s2 + $0x358] ss:$124 sps:$4 sm:$0xff]  }
 0x2b7   : > { %11785 = vmatpush1.bf16.msra.mxu1 %v13711_v8  ;;  %7699 = vmatprep.subr.bf16.mxu0 %v13716_v9  ;;  %v13776_v8 = vld [vmem:[%s16608_s2 + $0xa20] ss:$124 sps:$4 sm:$0xff]  }
 0x2b8   : > { %11770 = vmatprep.subr.bf16.mxu1 %v13716_v9  ;;  %7998 = vperm.xlu0 %12527, %v7988_v3   ;;  %v13780_v9 = vld [vmem:[%s16608_s2 + $0x454] ss:$124 sps:$4 sm:$0xff]  }
 0x2b9   : > { %8003 = vperm.xlu1 %12528, %v7989_v6  }
 0x2ba   : > { %7700 = vmatpush1.bf16.msra.mxu0 %v13714_v10 }
 0x2bb   : > { %11786 = vmatpush1.bf16.msra.mxu1 %v13714_v10  ;;  %7701 = vmatprep.subr.bf16.mxu0 %v13725_v11  ;;  %v13782_v10 = vld [vmem:[%s16608_s2 + $0xb1c] ss:$124 sps:$4 sm:$0xff]  }
 0x2bc   : > { %11771 = vmatprep.subr.bf16.mxu1 %v13725_v11  ;;  %6540 = vmatmul.mubr.bf16.gmra.mrb[20].mxu1 %v13676_v12  ;;  %v7990_v11 = vld [vmem:[%s16609_s3 + $0x18] sm:$0xff]  ;;  %v13784_v12 = vld [vmem:[%s16608_s2 + $0x450] ss:$124 sps:$4 sm:$0xff]  }
 0x2bd   : > { %7611 = vmatmul.mubr.bf16.gmra.mrb[20].mxu0 %v13677_v13  ;;  %6549 = vmatprep.mubr.bf16.mxu1 %v13681_v14  ;;  %v13785_v13 = vld [vmem:[%s16608_s2 + $0xb18] ss:$124 sps:$4 sm:$0xff]   ;;  %v13786_v14 = vld [vmem:[%s16608_s2 + $0x54c] ss:$124 sps:$4 sm:$0xff]  }
 0x2be   : > { %7620 = vmatprep.mubr.bf16.mxu0 %v13683_v15  ;;  %7702 = vmatpush1.bf16.msra.mxu0 %v13723_v16  ;;  %v13788_v15 = vld [vmem:[%s16608_s2 + $0x548] ss:$124 sps:$4 sm:$0xff]  }
 0x2bf   : > { %11787 = vmatpush1.bf16.msra.mxu1 %v13723_v16  ;;  %7703 = vmatprep.subr.bf16.mxu0 %v13728_v17  ;;  %v13789_v16 = vld [vmem:[%s16608_s2 + $0x644] ss:$124 sps:$4 sm:$0xff]  }
 0x2c0   : > { %11772 = vmatprep.subr.bf16.mxu1 %v13728_v17  ;;  %8008 = vperm.xlu1 %12528, %v7990_v11   ;;  %v13791_v17 = vld [vmem:[%s16608_s2 + $0x640] ss:$124 sps:$4 sm:$0xff]  }
 0x2c2   : > { %7704 = vmatpush1.bf16.msra.mxu0 %v13726_v18 }
 0x2c3   : > { %11788 = vmatpush1.bf16.msra.mxu1 %v13726_v18  ;;  %7705 = vmatprep.subr.bf16.mxu0 %v13737_v19  ;;  %v13795_v18 = vld [vmem:[%s16608_s2 + $0x78] ss:$124 sps:$4 sm:$0xff]  }
 0x2c4   : > { %11773 = vmatprep.subr.bf16.mxu1 %v13737_v19  ;;  %6550 = vmatmul.mubr.bf16.gmra.mrb[24].mxu1 %v13685_v20  ;;  %v13796_v19 = vld [vmem:[%s16608_s2 + $0x170] ss:$124 sps:$4 sm:$0xff]   ;;  %v13797_v20 = vld [vmem:[%s16608_s2 + $0x268] ss:$124 sps:$4 sm:$0xff]  }
 0x2c5   : > { %7621 = vmatmul.mubr.bf16.gmra.mrb[24].mxu0 %v13686_v21  ;;  %6559 = vmatprep.mubr.bf16.mxu1 %v13693_v22  ;;  %v13798_v21 = vld [vmem:[%s16608_s2 + $0x360] ss:$124 sps:$4 sm:$0xff]   ;;  %v13799_v22 = vld [vmem:[%s16608_s2 + $0x458] ss:$124 sps:$4 sm:$0xff]  }
 0x2c6   : > { %7630 = vmatprep.mubr.bf16.mxu0 %v13695_v23  ;;  %7706 = vmatpush1.bf16.msra.mxu0 %v13735_v24  ;;  %v13800_v23 = vld [vmem:[%s16608_s2 + $0x550] ss:$124 sps:$4 sm:$0xff]  }
 0x2c7   : > { %11789 = vmatpush1.bf16.msra.mxu1 %v13735_v24  ;;  %7707 = vmatprep.subr.bf16.mxu0 %v13740_v25  ;;  %v13801_v24 = vld [vmem:[%s16608_s2 + $0x648] ss:$124 sps:$4 sm:$0xff]  }
 0x2c8   : > { %11774 = vmatprep.subr.bf16.mxu1 %v13740_v25  ;;  %v13802_v25 = vld [vmem:[%s16608_s2 + $0x740] ss:$124 sps:$4 sm:$0xff]  }
 0x2ca   : > { %7708 = vmatpush1.bf16.msra.mxu0 %v13738_v26 }
 0x2cb   : > { %11790 = vmatpush1.bf16.msra.mxu1 %v13738_v26  ;;  %7709 = vmatprep.subr.bf16.mxu0 %v13749_v27 }
 0x2cc   : > { %11775 = vmatprep.subr.bf16.mxu1 %v13749_v27  ;;  %6560 = vmatmul.mubr.bf16.gmra.mrb[28].mxu1 %v13697_v28  ;;  %v13803_v28 = vld [vmem:[%s16608_s2 + $0x838] ss:$124 sps:$4 sm:$0xff]  }
 0x2cd   : > { %7631 = vmatmul.mubr.bf16.gmra.mrb[28].mxu0 %v13698_v29  ;;  %6569 = vmatprep.mubr.bf16.mxu1 %v13705_v30 }
 0x2ce   : > { %7640 = vmatprep.mubr.bf16.mxu0 %v13707_v31  ;;  %7710 = vmatpush1.bf16.msra.mxu0 %v13747_v32 }
 0x2cf   : > { %11791 = vmatpush1.bf16.msra.mxu1 %v13747_v32  ;;  %7711 = vmatprep.subr.bf16.mxu0 %v13752_v33 }
 0x2d0   : > { %11776 = vmatprep.subr.bf16.mxu1 %v13752_v33  ;;  %v13804_v33 = vld [vmem:[%s16608_s2 + $0x930] ss:$124 sps:$4 sm:$0xff]  }
 0x2d2   : > { %7712 = vmatpush1.bf16.msra.mxu0 %v13750_v34 }
 0x2d3   : > { %11792 = vmatpush1.bf16.msra.mxu1 %v13750_v34  ;;  %7834 = vmatprep.subr.bf16.mxu0 %v13779_v35 }
 0x2d4   : > { %6570 = vmatmul.mubr.bf16.gmra.mrb[32].mxu1 %v13709_v36 }
 0x2d5   : > { %7641 = vmatmul.mubr.bf16.gmra.mrb[32].mxu0 %v13710_v37  ;;  %6579 = vmatprep.mubr.bf16.mxu1 %v13717_v38  ;;  %v13805_v38 = vld [vmem:[%s16608_s2 + $0xa28] ss:$124 sps:$4 sm:$0xff]  }
 0x2d6   : > { %7650 = vmatprep.mubr.bf16.mxu0 %v13719_v39 }
 0x2dc   : > { %6580 = vmatmul.mubr.bf16.gmra.mrb[36].mxu1 %v13721_v40 }
 0x2dd   : > { %7651 = vmatmul.mubr.bf16.gmra.mrb[36].mxu0 %v13722_v41  ;;  %6589 = vmatprep.mubr.bf16.mxu1 %v13729_v42 }
 0x2de   : > { %7660 = vmatprep.mubr.bf16.mxu0 %v13731_v43  ;;  %v13806_v43 = vld [vmem:[%s16608_s2 + $0xb20] ss:$124 sps:$4 sm:$0xff]  }
 0x2e4   : > { %6590 = vmatmul.mubr.bf16.gmra.mrb[40].mxu1 %v13733_v44 }
 0x2e5   : > { %7661 = vmatmul.mubr.bf16.gmra.mrb[40].mxu0 %v13734_v45  ;;  %6599 = vmatprep.mubr.bf16.mxu1 %v13741_v46 }
 0x2e6   : > { %7670 = vmatprep.mubr.bf16.mxu0 %v13743_v47 }
 0x2ec   : > { %6600 = vmatmul.mubr.bf16.gmra.mrb[44].mxu1 %v13745_v48 }
 0x2ed   : > { %7671 = vmatmul.mubr.bf16.gmra.mrb[44].mxu0 %v13746_v49  ;;  %7783 = vmatprep.mubr.bf16.mxu1 %v13758_v51 }
 0x2ee   : > { %7713 = vmatprep.mubr.bf16.mxu0 %v13755_v50 }
 0x2f4   : > { %7784 = vmatmul.mubr.bf16.vlgmr.msra.gmra.mrb[48].mxu1 %v13756_v53 }
 0x2f5   : > { %7714 = vmatmul.mubr.bf16.vlgmr.msra.gmra.mrb[0].mxu0 %v13753_v52  ;;  %7793 = vmatprep.mubr.bf16.mxu1 %v13761_v55 }
 0x2f6   : > { %7723 = vmatprep.mubr.bf16.mxu0 %v13759_v54  ;;  %7835 = vmatpush1.bf16.msra.mxu0 %v13777_v56 }
 0x2f7   : > { %7836 = vmatprep.subr.bf16.mxu0 %v13794_v57 }
 0x2fa   : > { %7837 = vmatpush1.bf16.msra.mxu0 %v13792_v58 }
 0x2fc   : > { %7794 = vmatmul.mubr.bf16.gmra.mrb[52].mxu1 %v13764_v60 }
 0x2fd   : > { %7724 = vmatmul.mubr.bf16.gmra.mrb[4].mxu0 %v13763_v59  ;;  %7803 = vmatprep.mubr.bf16.mxu1 %v13767_v63 }
 0x2fe   : > { %7733 = vmatprep.mubr.bf16.mxu0 %v13765_v62 }
 0x304   : > { %7804 = vmatmul.mubr.bf16.gmra.mrb[56].mxu1 %v13770_v2 }
 0x305   : > { %7734 = vmatmul.mubr.bf16.gmra.mrb[8].mxu0 %v13769_v1  ;;  %7813 = vmatprep.mubr.bf16.mxu1 %v13773_v5 }
 0x306   : > { %7743 = vmatprep.mubr.bf16.mxu0 %v13771_v4 }
 0x30c   : > { %7814 = vmatmul.mubr.bf16.gmra.mrb[60].mxu1 %v13776_v8 }
 0x30d   : > { %7744 = vmatmul.mubr.bf16.gmra.mrb[12].mxu0 %v13775_v7  ;;  %7823 = vmatprep.mubr.bf16.mxu1 %v13782_v10 }
 0x30e   : > { %7753 = vmatprep.mubr.bf16.mxu0 %v13780_v9 }
 0x314   : > { %7824 = vmatmul.mubr.bf16.gmra.mrb[64].mxu1 %v13785_v13 }
 0x315   : > { %7754 = vmatmul.mubr.bf16.gmra.mrb[16].mxu0 %v13784_v12 }
 0x316   : > { %7763 = vmatprep.mubr.bf16.mxu0 %v13786_v14 }
 0x31d   : > { %7764 = vmatmul.mubr.bf16.gmra.mrb[20].mxu0 %v13788_v15 }
 0x31e   : > { %7773 = vmatprep.mubr.bf16.mxu0 %v13789_v16 }
 0x325   : > { %7774 = vmatmul.mubr.bf16.gmra.mrb[24].mxu0 %v13791_v17 }
 0x326   : > { %7866 = vmatprep.mubr.bf16.mxu0 %v13883_v61 }
 0x32d   : > { %11272 = vmatmul.mubr.msk.bf16.vlgmr.msra.gmra.mrb[0].mxu0 %vm5502_vm0, %v13795_v18 }
 0x32e   : > { %7876 = vmatprep.mubr.bf16.mxu0 %v13883_v61 }
 0x335   : > { %11273 = vmatmul.mubr.msk.bf16.gmra.mrb[4].mxu0 %vm5502_vm0, %v13796_v19 }
 0x336   : > { %7886 = vmatprep.mubr.bf16.mxu0 %v13883_v61 }
 0x33d   : > { %11274 = vmatmul.mubr.msk.bf16.gmra.mrb[8].mxu0 %vm5502_vm0, %v13797_v20 }
 0x33e   : > { %7896 = vmatprep.mubr.bf16.mxu0 %v13883_v61 }
 0x345   : > { %11275 = vmatmul.mubr.msk.bf16.gmra.mrb[12].mxu0 %vm5502_vm0, %v13798_v21 }
 0x346   : > { %7906 = vmatprep.mubr.bf16.mxu0 %v13883_v61 }
 0x34d   : > { %11276 = vmatmul.mubr.msk.bf16.gmra.mrb[16].mxu0 %vm5502_vm0, %v13799_v22 }
 0x34e   : > { %7916 = vmatprep.mubr.bf16.mxu0 %v13883_v61 }
 0x355   : > { %11277 = vmatmul.mubr.msk.bf16.gmra.mrb[20].mxu0 %vm5502_vm0, %v13800_v23 }
 0x356   : > { %7926 = vmatprep.mubr.bf16.mxu0 %v13883_v61 }
 0x35d   : > { %11278 = vmatmul.mubr.msk.bf16.gmra.mrb[24].mxu0 %vm5502_vm0, %v13801_v24 }
 0x35e   : > { %7936 = vmatprep.mubr.bf16.mxu0 %v13883_v61 }
 0x365   : > { %11279 = vmatmul.mubr.msk.bf16.gmra.mrb[48].mxu0 %vm5502_vm0, %v13802_v25 }
 0x366   : > { %7946 = vmatprep.mubr.bf16.mxu0 %v13883_v61 }
 0x367   : > { %v15573_v26 = vpop.f32.mrb[0].mxu1 }
 0x368   : > { %v15575_v27 = vpop.f32.mrb[1].mxu1 }
 0x369   : > { %v15580_v29 = vpop.f32.mrb[2].mxu1 }
 0x36a   : > { %v15582_v30 = vpop.f32.mrb[3].mxu1 }
 0x36d   : > { %11280 = vmatmul.mubr.msk.bf16.gmra.mrb[52].mxu0 %vm5502_vm0, %v13803_v28 }
 0x36e   : > { %7956 = vmatprep.mubr.bf16.mxu0 %v13883_v61 }
 0x36f   : > { %v15586_v31 = vpop.f32.mrb[4].mxu1 }
 0x370   : > { %v15588_v32 = vpop.f32.mrb[5].mxu1 }
 0x371   : > { %v15593_v34 = vpop.f32.mrb[6].mxu1 }
 0x372   : > { %v15595_v35 = vpop.f32.mrb[7].mxu1 }
 0x375   : > { %11281 = vmatmul.mubr.msk.bf16.gmra.mrb[56].mxu0 %vm5502_vm0, %v13804_v33 }
 0x376   : > { %7966 = vmatprep.mubr.bf16.mxu0 %v13883_v61 }
 0x377   : > { %v15599_v36 = vpop.f32.mrb[8].mxu1 }
 0x378   : > { %v15601_v37 = vpop.f32.mrb[9].mxu1 }
 0x379   : > { %v15606_v39 = vpop.f32.mrb[10].mxu1 }
 0x37a   : > { %v15608_v40 = vpop.f32.mrb[11].mxu1 }
 0x37d   : > { %11282 = vmatmul.mubr.msk.bf16.gmra.mrb[60].mxu0 %vm5502_vm0, %v13805_v38 }
 0x37e   : > { %7976 = vmatprep.mubr.bf16.mxu0 %v13883_v61 }
 0x37f   : > { %v15612_v41 = vpop.f32.mrb[12].mxu1 }
 0x380   : > { %v15614_v42 = vpop.f32.mrb[13].mxu1 }
 0x381   : > { %v15619_v44 = vpop.f32.mrb[14].mxu1 }
 0x382   : > { %v15621_v45 = vpop.f32.mrb[15].mxu1 }
 0x385   : > { %11283 = vmatmul.mubr.msk.bf16.gmra.mrb[64].mxu0 %vm5502_vm0, %v13806_v43 }
 0x387   : > { %v15624_v46 = vpop.f32.mrb[16].mxu1 }
 0x388   : > { %v15626_v47 = vpop.f32.mrb[17].mxu1 }
 0x389   : > { %v15628_v48 = vpop.f32.mrb[18].mxu1 }
 0x38a   : > { %v15630_v61 = vpop.f32.mrb[19].mxu1 }
 0x38f   : > { %v15632_v49 = vpop.f32.mrb[20].mxu1 }
 0x390   : > { %v15634_v50 = vpop.f32.mrb[21].mxu1 }
 0x391   : > { %v15636_v51 = vpop.f32.mrb[22].mxu1 }
 0x392   : > { %v15638_v52 = vpop.f32.mrb[23].mxu1 }
 0x397   : > { %v15640_v53 = vpop.f32.mrb[24].mxu1 }
 0x398   : > { %v15642_v54 = vpop.f32.mrb[25].mxu1 }
 0x399   : > { %v15644_v55 = vpop.f32.mrb[26].mxu1 }
 0x39a   : > { %v15646_v56 = vpop.f32.mrb[27].mxu1 }
 0x39f   : > { %v6561_v57 = vpop.f32.mrb[28].mxu1 }
 0x3a0   : > { %v7632_v58 = vpop.f32.mrb[28].mxu0  ;;  %v6563_v60 = vpop.f32.mrb[29].mxu1 }
 0x3a1   : > { %v11821_v59 = vadd.f32 %v7632_v58, %v6561_v57  ;;  %v7634_v62 = vpop.f32.mrb[29].mxu0  ;;  %v6565_v0 = vpop.f32.mrb[30].mxu1 }
 0x3a2   : > { %v11824_v63 = vadd.f32 %v7634_v62, %v6563_v60  ;;  %v7636_v1 = vpop.f32.mrb[30].mxu0  ;;  %v6567_v3 = vpop.f32.mrb[31].mxu1 }
 0x3a3   : > { %v11827_v2 = vadd.f32 %v7636_v1, %v6565_v0  ;;  %v7638_v4 = vpop.f32.mrb[31].mxu0 }
 0x3a4   : > { %v11830_v5 = vadd.f32 %v7638_v4, %v6567_v3 }
 0x3a7   : > { %v6571_v6 = vpop.f32.mrb[32].mxu1 }
 0x3a8   : > { %v7642_v7 = vpop.f32.mrb[32].mxu0  ;;  %v6573_v9 = vpop.f32.mrb[33].mxu1 }
 0x3a9   : > { %v11833_v8 = vadd.f32 %v7642_v7, %v6571_v6  ;;  %v7644_v10 = vpop.f32.mrb[33].mxu0  ;;  %v6575_v12 = vpop.f32.mrb[34].mxu1 }
 0x3aa   : > { %v11836_v11 = vadd.f32 %v7644_v10, %v6573_v9  ;;  %v7646_v13 = vpop.f32.mrb[34].mxu0  ;;  %v6577_v15 = vpop.f32.mrb[35].mxu1 }
 0x3ab   : > { %v11839_v14 = vadd.f32 %v7646_v13, %v6575_v12  ;;  %v7648_v16 = vpop.f32.mrb[35].mxu0 }
 0x3ac   : > { %v11842_v17 = vadd.f32 %v7648_v16, %v6577_v15 }
 0x3af   : > { %v6581_v18 = vpop.f32.mrb[36].mxu1 }
 0x3b0   : > { %v7652_v19 = vpop.f32.mrb[36].mxu0  ;;  %v6583_v21 = vpop.f32.mrb[37].mxu1 }
 0x3b1   : > { %v11845_v20 = vadd.f32 %v7652_v19, %v6581_v18  ;;  %v7654_v22 = vpop.f32.mrb[37].mxu0  ;;  %v6585_v24 = vpop.f32.mrb[38].mxu1 }
 0x3b2   : > { %v11848_v23 = vadd.f32 %v7654_v22, %v6583_v21  ;;  %v7656_v25 = vpop.f32.mrb[38].mxu0  ;;  %v6587_v33 = vpop.f32.mrb[39].mxu1 }
 0x3b3   : > { %v11851_v28 = vadd.f32 %v7656_v25, %v6585_v24  ;;  %v7658_v38 = vpop.f32.mrb[39].mxu0 }
 0x3b4   : > { %v11854_v43 = vadd.f32 %v7658_v38, %v6587_v33 }
 0x3b7   : > { %v6591_v57 = vpop.f32.mrb[40].mxu1 }
 0x3b8   : > { %v7662_v58 = vpop.f32.mrb[40].mxu0  ;;  %v6593_v62 = vpop.f32.mrb[41].mxu1 }
 0x3b9   : > { %v11857_v60 = vadd.f32 %v7662_v58, %v6591_v57  ;;  %v7664_v0 = vpop.f32.mrb[41].mxu0  ;;  %v6595_v3 = vpop.f32.mrb[42].mxu1 }
 0x3ba   : > { %v11860_v1 = vadd.f32 %v7664_v0, %v6593_v62  ;;  %v7666_v4 = vpop.f32.mrb[42].mxu0  ;;  %v6597_v7 = vpop.f32.mrb[43].mxu1 }
 0x3bb   : > { %v11863_v6 = vadd.f32 %v7666_v4, %v6595_v3  ;;  %v7668_v9 = vpop.f32.mrb[43].mxu0 }
 0x3bc   : > { %v11866_v10 = vadd.f32 %v7668_v9, %v6597_v7 }
 0x3bf   : > { %v6601_v12 = vpop.f32.mrb[44].mxu1 }
 0x3c0   : > { %v7672_v13 = vpop.f32.mrb[44].mxu0  ;;  %v6603_v16 = vpop.f32.mrb[45].mxu1 }
 0x3c1   : > { %v11869_v15 = vadd.f32 %v7672_v13, %v6601_v12  ;;  %v7674_v18 = vpop.f32.mrb[45].mxu0  ;;  %v6605_v21 = vpop.f32.mrb[46].mxu1 }
 0x3c2   : > { %v11872_v19 = vadd.f32 %v7674_v18, %v6603_v16  ;;  %v7676_v22 = vpop.f32.mrb[46].mxu0  ;;  %v6607_v25 = vpop.f32.mrb[47].mxu1 }
 0x3c3   : > { %v11875_v24 = vadd.f32 %v7676_v22, %v6605_v21  ;;  %v7678_v33 = vpop.f32.mrb[47].mxu0 }
 0x3c4   : > { %v11878_v38 = vadd.f32 %v7678_v33, %v6607_v25 }
 0x3c7   : > { %v7785_v57 = vpop.f32.mrb[48].mxu1 }
 0x3c8   : > { %v15648_v58 = vadd.f32 %v11821_v59, %v7785_v57  ;;  %v7787_v62 = vpop.f32.mrb[49].mxu1 }
 0x3c9   : > { %v15650_v0 = vadd.f32 %v11824_v63, %v7787_v62  ;;  %v7789_v3 = vpop.f32.mrb[50].mxu1 }
 0x3ca   : > { %v15652_v4 = vadd.f32 %v11827_v2, %v7789_v3  ;;  %v7791_v7 = vpop.f32.mrb[51].mxu1 }
 0x3cb   : > { %v15654_v9 = vadd.f32 %v11830_v5, %v7791_v7 }
 0x3cf   : > { %v7795_v12 = vpop.f32.mrb[52].mxu1 }
 0x3d0   : > { %v15656_v13 = vadd.f32 %v11833_v8, %v7795_v12  ;;  %v7797_v16 = vpop.f32.mrb[53].mxu1 }
 0x3d1   : > { %v15658_v18 = vadd.f32 %v11836_v11, %v7797_v16  ;;  %v7799_v21 = vpop.f32.mrb[54].mxu1 }
 0x3d2   : > { %v15660_v22 = vadd.f32 %v11839_v14, %v7799_v21  ;;  %v7801_v59 = vpop.f32.mrb[55].mxu1 }
 0x3d3   : > { %v15662_v25 = vadd.f32 %v11842_v17, %v7801_v59 }
 0x3d7   : > { %v7805_v63 = vpop.f32.mrb[56].mxu1 }
 0x3d8   : > { %v15664_v33 = vadd.f32 %v11845_v20, %v7805_v63  ;;  %v7807_v2 = vpop.f32.mrb[57].mxu1 }
 0x3d9   : > { %v15666_v57 = vadd.f32 %v11848_v23, %v7807_v2  ;;  %v7809_v5 = vpop.f32.mrb[58].mxu1 }
 0x3da   : > { %v15668_v62 = vadd.f32 %v11851_v28, %v7809_v5  ;;  %v7811_v8 = vpop.f32.mrb[59].mxu1 }
 0x3db   : > { %v15670_v3 = vadd.f32 %v11854_v43, %v7811_v8 }
 0x3df   : > { %v7815_v11 = vpop.f32.mrb[60].mxu1 }
 0x3e0   : > { %v15672_v7 = vadd.f32 %v11857_v60, %v7815_v11  ;;  %v7817_v14 = vpop.f32.mrb[61].mxu1 }
 0x3e1   : > { %v15674_v12 = vadd.f32 %v11860_v1, %v7817_v14  ;;  %v7819_v17 = vpop.f32.mrb[62].mxu1  ;;  %v7994_v1 = vpop.permute.xlu0 %7993 }
 0x3e2   : > { %v15676_v16 = vadd.f32 %v11863_v6, %v7819_v17  ;;  %v7821_v20 = vpop.f32.mrb[63].mxu1 }
 0x3e3   : > { %v15678_v21 = vadd.f32 %v11866_v10, %v7821_v20 }
 0x3e5   : > { %v7999_v14 = vpop.permute.xlu0 %7998 }
 0x3e7   : > { %v7825_v23 = vpop.f32.mrb[64].mxu1 }
 0x3e8   : > { %v15680_v59 = vadd.f32 %v11869_v15, %v7825_v23  ;;  %v7827_v28 = vpop.f32.mrb[65].mxu1 }
 0x3e9   : > { %v15682_v63 = vadd.f32 %v11872_v19, %v7827_v28  ;;  %v7829_v43 = vpop.f32.mrb[66].mxu1  ;;  %v8004_v28 = vpop.permute.xlu1 %8003 }
 0x3ea   : > { %v15684_v2 = vadd.f32 %v11875_v24, %v7829_v43  ;;  %v7831_v60 = vpop.f32.mrb[67].mxu1 }
 0x3eb   : > { %v15686_v5 = vadd.f32 %v11878_v38, %v7831_v60 }
 0x3ed   : > { %16636 = vst [vmem:[#allocation2_spill] sm:$0xff] %v15686_v5 }
 0x400   : > { %v7868_v8 = vpop.f32.mrb[0].mxu0 }
 0x401   : > { %v11793_v6 = vadd.f32 %v7868_v8, %v15573_v26  ;;  %v7870_v11 = vpop.f32.mrb[1].mxu0 }
 0x402   : > { %v11794_v10 = vadd.f32 %v7870_v11, %v15575_v27  ;;  %v7872_v17 = vpop.f32.mrb[2].mxu0 }
 0x403   : > { %v8011_v15 = vadd.f32 %v11793_v6, %v7994_v1  ;;  %v11795_v20 = vadd.f32 %v7872_v17, %v15580_v29  ;;  %v7874_v19 = vpop.f32.mrb[3].mxu0 }
 0x404   : > { %v8012_v23 = vadd.f32 %v11794_v10, %v7994_v1  ;;  %v11796_v24 = vadd.f32 %v7874_v19, %v15582_v30 }
 0x405   : > { %v8013_v43 = vadd.f32 %v11795_v20, %v7999_v14  ;;  %vm8019_vm1 = vcmp.gt.f32.partialorder %v8011_v15, 0.0  ;;  %v8027_v38 = vmul.f32 0.2, %v8011_v15 }
 0x406   : > { %v8014_v60 = vadd.f32 %v11796_v24, %v7999_v14  ;;  %vm8020_vm2 = vcmp.gt.f32.partialorder %v8012_v23, 0.0  ;;  %v8028_v5 = vmul.f32 0.2, %v8012_v23 }
 0x407   : > { %v15692_v26 = vsel %vm8019_vm1, %v8011_v15, %v8027_v38  ;;  %vm8021_vm3 = vcmp.gt.f32.partialorder %v8013_v43, 0.0  ;;  %v8029_v8 = vmul.f32 0.2, %v8013_v43  ;;  %v8009_v15 = vpop.permute.xlu1 %8008 }
 0x408   : > { %v7878_v27 = vpop.f32.mrb[4].mxu0  ;;  %v15694_v11 = vsel %vm8020_vm2, %v8012_v23, %v8028_v5  ;;  %vm8022_vm4 = vcmp.gt.f32.partialorder %v8014_v60, 0.0  ;;  %v8030_v29 = vmul.f32 0.2, %v8014_v60 }
 0x409   : > { %v11797_v1 = vadd.f32 %v7878_v27, %v15586_v31  ;;  %v7880_v6 = vpop.f32.mrb[5].mxu0  ;;  %v8043_v30 = vadd.f32 %v15694_v11, %v15692_v26  ;;  %v15699_v10 = vsel %vm8021_vm3, %v8013_v43, %v8029_v8 }
 0x40a   : > { %v11798_v14 = vadd.f32 %v7880_v6, %v15588_v32  ;;  %v7882_v17 = vpop.f32.mrb[6].mxu0  ;;  %v15702_v20 = vsel %vm8022_vm4, %v8014_v60, %v8030_v29 }
 0x40b   : > { %v8015_v19 = vadd.f32 %v11797_v1, %v8004_v28  ;;  %v11799_v5 = vadd.f32 %v7882_v17, %v15593_v34  ;;  %v7884_v23 = vpop.f32.mrb[7].mxu0  ;;  %8044 = vadd.xlane.f32.xlu0 %v8043_v30  ;;  %v8046_v31 = vadd.f32 %v15702_v20, %v15699_v10 }
 0x40c   : > { %v8016_v24 = vadd.f32 %v11798_v14, %v8004_v28  ;;  %v11800_v38 = vadd.f32 %v7884_v23, %v15595_v35 }
 0x40d   : > { %v8017_v27 = vadd.f32 %v11799_v5, %v8009_v15  ;;  %8047 = vadd.xlane.f32.xlu1 %v8046_v31  ;;  %vm8023_vm5 = vcmp.gt.f32.partialorder %v8015_v19, 0.0  ;;  %v8031_v43 = vmul.f32 0.2, %v8015_v19 }
 0x40e   : > { %v8018_v32 = vadd.f32 %v11800_v38, %v8009_v15  ;;  %vm8024_vm6 = vcmp.gt.f32.partialorder %v8016_v24, 0.0  ;;  %v8032_v8 = vmul.f32 0.2, %v8016_v24 }
 0x40f   : > { %v15708_v60 = vsel %vm8023_vm5, %v8015_v19, %v8031_v43  ;;  %vm8025_vm7 = vcmp.gt.f32.partialorder %v8017_v27, 0.0  ;;  %v8033_v29 = vmul.f32 0.2, %v8017_v27 }
 0x410   : > { %v7888_v34 = vpop.f32.mrb[8].mxu0  ;;  %v15710_v1 = vsel %vm8024_vm6, %v8016_v24, %v8032_v8  ;;  %vm8026_vm8 = vcmp.gt.f32.partialorder %v8018_v32, 0.0  ;;  %v8034_v6 = vmul.f32 0.2, %v8018_v32 }
 0x411   : > { %v15713_v28 = vadd.f32 %v7888_v34, %v15599_v36  ;;  %v7890_v35 = vpop.f32.mrb[9].mxu0  ;;  %v8049_v30 = vadd.f32 %v15710_v1, %v15708_v60  ;;  %v15720_v15 = vsel %vm8025_vm7, %v8017_v27, %v8033_v29 }
 0x412   : > { %v15718_v14 = vadd.f32 %v7890_v35, %v15601_v37  ;;  %v7892_v17 = vpop.f32.mrb[10].mxu0  ;;  %v15722_v19 = vsel %vm8026_vm8, %v8018_v32, %v8034_v6 }
 0x413   : > { %v15725_v5 = vadd.f32 %v7892_v17, %v15606_v39  ;;  %v7894_v23 = vpop.f32.mrb[11].mxu0  ;;  %8050 = vadd.xlane.f32.xlu0 %v8049_v30  ;;  %v8052_v31 = vadd.f32 %v15722_v19, %v15720_v15 }
 0x414   : > { %v15728_v36 = vadd.f32 %v7894_v23, %v15608_v40 }
 0x417   : > { %8053 = vadd.xlane.f32.xlu0 %v8052_v31 }
 0x418   : > { %v7898_v24 = vpop.f32.mrb[12].mxu0 }
 0x419   : > { %v15733_v37 = vadd.f32 %v7898_v24, %v15612_v41  ;;  %v7900_v38 = vpop.f32.mrb[13].mxu0 }
 0x41a   : > { %v15736_v27 = vadd.f32 %v7900_v38, %v15614_v42  ;;  %v7902_v43 = vpop.f32.mrb[14].mxu0 }
 0x41b   : > { %v15739_v39 = vadd.f32 %v7902_v43, %v15619_v44  ;;  %v7904_v32 = vpop.f32.mrb[15].mxu0 }
 0x41c   : > { %v15742_v40 = vadd.f32 %v7904_v32, %v15621_v45  ;;  %v15759_v45 = vld [vmem:[%s16612_s6] sm:$0xff] }
 0x41d   : > { %11480 = vmatprep.mubr.msk.f32.mxu1 %vm5502_vm0, %v15759_v45 }
 0x420   : > { %v7908_v8 = vpop.f32.mrb[16].mxu0 }
 0x421   : > { %v15745_v29 = vadd.f32 %v7908_v8, %v15624_v46  ;;  %v7910_v34 = vpop.f32.mrb[17].mxu0 }
 0x422   : > { %v15748_v41 = vadd.f32 %v7910_v34, %v15626_v47  ;;  %v7912_v6 = vpop.f32.mrb[18].mxu0 }
 0x423   : > { %v15751_v42 = vadd.f32 %v7912_v6, %v15628_v48  ;;  %v7914_v35 = vpop.f32.mrb[19].mxu0 }
 0x424   : > { %v15754_v44 = vadd.f32 %v7914_v35, %v15630_v61 }
 0x428   : > { %v7918_v30 = vpop.f32.mrb[20].mxu0 }
 0x429   : > { %v15762_v46 = vadd.f32 %v7918_v30, %v15632_v49  ;;  %v7920_v17 = vpop.f32.mrb[21].mxu0 }
 0x42a   : > { %v15767_v47 = vadd.f32 %v7920_v17, %v15634_v50  ;;  %v7922_v48 = vpop.f32.mrb[22].mxu0 }
 0x42b   : > { %v15770_v61 = vadd.f32 %v7922_v48, %v15636_v51  ;;  %v7924_v23 = vpop.f32.mrb[23].mxu0 }
 0x42c   : > { %v15773_v31 = vadd.f32 %v7924_v23, %v15638_v52 }
 0x430   : > { %v7928_v24 = vpop.f32.mrb[24].mxu0 }
 0x431   : > { %v15776_v38 = vadd.f32 %v7928_v24, %v15640_v53  ;;  %v7930_v49 = vpop.f32.mrb[25].mxu0 }
 0x432   : > { %v15779_v43 = vadd.f32 %v7930_v49, %v15642_v54  ;;  %v7932_v32 = vpop.f32.mrb[26].mxu0 }
 0x433   : > { %v15782_v50 = vadd.f32 %v7932_v32, %v15644_v55  ;;  %v7934_v8 = vpop.f32.mrb[27].mxu0 }
 0x434   : > { %v15785_v51 = vadd.f32 %v7934_v8, %v15646_v56 }
 0x438   : > { %v7938_v34 = vpop.f32.mrb[48].mxu0 }
 0x439   : > { %v15788_v52 = vadd.f32 %v15648_v58, %v7938_v34  ;;  %v7940_v6 = vpop.f32.mrb[49].mxu0 }
 0x43a   : > { %v15791_v53 = vadd.f32 %v15650_v0, %v7940_v6  ;;  %v7942_v35 = vpop.f32.mrb[50].mxu0 }
 0x43b   : > { %v15794_v54 = vadd.f32 %v15652_v4, %v7942_v35  ;;  %v7944_v30 = vpop.f32.mrb[51].mxu0 }
 0x43c   : > { %v15797_v55 = vadd.f32 %v15654_v9, %v7944_v30 }
 0x440   : > { %v7948_v17 = vpop.f32.mrb[52].mxu0 }
 0x441   : > { %v15800_v56 = vadd.f32 %v15656_v13, %v7948_v17  ;;  %v7950_v48 = vpop.f32.mrb[53].mxu0 }
 0x442   : > { %v15803_v58 = vadd.f32 %v15658_v18, %v7950_v48  ;;  %v7952_v23 = vpop.f32.mrb[54].mxu0 }
 0x443   : > { %v15806_v0 = vadd.f32 %v15660_v22, %v7952_v23  ;;  %v7954_v24 = vpop.f32.mrb[55].mxu0 }
 0x444   : > { %v15809_v4 = vadd.f32 %v15662_v25, %v7954_v24 }
 0x448   : > { %v7958_v49 = vpop.f32.mrb[56].mxu0 }
 0x449   : > { %v15812_v9 = vadd.f32 %v15664_v33, %v7958_v49  ;;  %v7960_v32 = vpop.f32.mrb[57].mxu0 }
 0x44a   : > { %v15815_v13 = vadd.f32 %v15666_v57, %v7960_v32  ;;  %v7962_v8 = vpop.f32.mrb[58].mxu0  ;;  %v16637_v32 = vld [vmem:[#allocation2_spill] sm:$0xff] }
 0x44b   : > { %v15818_v18 = vadd.f32 %v15668_v62, %v7962_v8  ;;  %v7964_v34 = vpop.f32.mrb[59].mxu0 }
 0x44c   : > { %v15821_v22 = vadd.f32 %v15670_v3, %v7964_v34 }
 0x450   : > { %v7968_v6 = vpop.f32.mrb[60].mxu0 }
 0x451   : > { %v15824_v25 = vadd.f32 %v15672_v7, %v7968_v6  ;;  %v7970_v35 = vpop.f32.mrb[61].mxu0 }
 0x452   : > { %v15827_v33 = vadd.f32 %v15674_v12, %v7970_v35  ;;  %v7972_v30 = vpop.f32.mrb[62].mxu0 }
 0x453   : > { %v15830_v57 = vadd.f32 %v15676_v16, %v7972_v30  ;;  %v7974_v17 = vpop.f32.mrb[63].mxu0  ;;  %v15864_v30 = vld [vmem:[%s16612_s6 + $0x18] sm:$0xff] }
 0x454   : > { %v15833_v62 = vadd.f32 %v15678_v21, %v7974_v17 }
 0x458   : > { %v7978_v48 = vpop.f32.mrb[64].mxu0 }
 0x459   : > { %v15836_v3 = vadd.f32 %v15680_v59, %v7978_v48  ;;  %v7980_v23 = vpop.f32.mrb[65].mxu0 }
 0x45a   : > { %v15839_v7 = vadd.f32 %v15682_v63, %v7980_v23  ;;  %v7982_v24 = vpop.f32.mrb[66].mxu0  ;;  %v15850_v63 = vld [vmem:[%s16612_s6 + $0x8] sm:$0xff]  ;;  %v11292_v23 = vld [vmem:[%s16609_s3 + $0x20] sm:$0xff] }
 0x45b   : > { %v15842_v12 = vadd.f32 %v15684_v2, %v7982_v24  ;;  %v7984_v49 = vpop.f32.mrb[67].mxu0  ;;  %v15855_v2 = vld [vmem:[%s16612_s6 + $0x10] sm:$0xff] }
 0x45c   : > { %v15845_v16 = vadd.f32 %v16637_v32, %v7984_v49  ;;  %v11294_v32 = vld [vmem:[%s16609_s3 + $0x30] sm:$0xff] }
 0x498   : > { %v8045_v8 = vpop.xlane.xlu0 %8044 }
 0x49a   : > { %v8048_v34 = vpop.xlane.xlu1 %8047 }
 0x49b   : > { %v11659_v21 = vpack.c.bf16 %v8048_v34, %v8045_v8  ;;  %v11293_v8 = vld [vmem:[%s16609_s3 + $0x28] sm:$0xff]  ;;  %v11295_v34 = vld [vmem:[%s16609_s3 + $0x38] sm:$0xff] }
 0x49d   : > { %11660 = vmatprep.subr.bf16.mxu1 %v11659_v21 }
 0x49e   : > { %11662 = vmatpush3.bf16.msra.mxu1 %v11659_v21 }
 0x4a0   : > { %v8051_v6 = vpop.xlane.xlu0 %8050 }
 0x4a4   : > { %v8054_v59 = vpop.xlane.xlu0 %8053 }
 0x4a5   : > { %v11663_v35 = vpack.c.bf16 %v8054_v59, %v8051_v6 }
 0x4a7   : > { %11664 = vmatprep.subr.bf16.mxu1 %v11663_v35 }
 0x4a8   : > { %11666 = vmatpush3.bf16.msra.mxu1 %v11663_v35 }
 0x4ab   : > { %11481 = vmatmul.mubr.msk.f32.vlgmr.msra.gmra.mrb[68].mxu1 %vm5502_vm0, %v15850_v63 }
 0x4ac   : > { %11483 = vmatprep.mubr.msk.f32.mxu1 %vm5502_vm0, %v15855_v2 }
 0x4af   : > { %11484 = vmatmul.mubr.msk.f32.gmra.mrb[70].mxu1 %vm5502_vm0, %v15864_v30 }
 0x4b0   : > { %11494 = vmatprep.mubr.msk.f32.mxu1 %vm5502_vm0, %v15759_v45 }
 0x57e   : > { %v11482_v17 = vpop.f32.mrb[68].mxu1 }
 0x57f   : > { %8163 = vperm.xlu0 %12527, %v11482_v17   ;;  %v8137_v48 = vpop.f32.mrb[69].mxu1 }
 0x580   : > { %8158 = vperm.xlu1 %12528, %v8137_v48  }
 0x582   : > { %v11485_v24 = vpop.f32.mrb[70].mxu1 }
 0x583   : > { %8336 = vperm.xlu0 %12527, %v11292_v23   ;;  %v8147_v49 = vpop.f32.mrb[71].mxu1 }
 0x584   : > { %8173 = vperm.xlu1 %12528, %v11485_v24  }
 0x587   : > { %8346 = vperm.xlu0 %12527, %v11294_v32  }
 0x588   : > { %8168 = vperm.xlu1 %12528, %v8147_v49  }
 0x58c   : > { %8341 = vperm.xlu1 %12528, %v11293_v8  }
 0x590   : > { %8351 = vperm.xlu1 %12528, %v11295_v34  }
 0x5fe   : > { %v8164_v21 = vpop.permute.xlu0 %8163 }
 0x5ff   : > { %v15883_v6 = vsub.f32 %v15699_v10, %v8164_v21  ;;  %v15886_v59 = vsub.f32 %v15702_v20, %v8164_v21  ;;  %v8159_v35 = vpop.permute.xlu1 %8158 }
 0x600   : > { %v15889_v17 = vsub.f32 %v15692_v26, %v8159_v35  ;;  %v15892_v48 = vsub.f32 %v15694_v11, %v8159_v35 }
 0x601   : > { %16638 = vst [vmem:[#allocation2_spill] sm:$0xff] %v15883_v6  ;;  %16639 = vst [vmem:[#allocation3_spill] sm:$0xff] %v15886_v59  ;;  %v8186_v23 = vmul.f32 %v15883_v6, %v15883_v6  ;;  %v8187_v24 = vmul.f32 %v15886_v59, %v15886_v59 }
 0x602   : > { %16640 = vst [vmem:[#allocation4_spill] sm:$0xff] %v15889_v17  ;;  %v8337_v49 = vpop.permute.xlu0 %8336  ;;  %v8184_v10 = vmul.f32 %v15889_v17, %v15889_v17  ;;  %v8185_v20 = vmul.f32 %v15892_v48, %v15892_v48 }
 0x603   : > { %v8354_v32 = vadd.f32 %v15713_v28, %v8337_v49  ;;  %v8355_v26 = vadd.f32 %v15718_v14, %v8337_v49  ;;  %v8174_v8 = vpop.permute.xlu1 %8173  ;;  %v8195_v11 = vadd.f32 %v8187_v24, %v8186_v23 }
 0x604   : > { %v15905_v34 = vsub.f32 %v15720_v15, %v8174_v8  ;;  %v15908_v21 = vsub.f32 %v15722_v19, %v8174_v8  ;;  %v8192_v35 = vadd.f32 %v8185_v20, %v8184_v10 }
 0x605   : > { %8196 = vadd.xlane.f32.xlu1 %v8195_v11  ;;  %vm8362_vm9 = vcmp.gt.f32.partialorder %v8354_v32, 0.0  ;;  %vm8363_vm10 = vcmp.gt.f32.partialorder %v8355_v26, 0.0  ;;  %v8370_v17 = vmul.f32 0.2, %v8354_v32  ;;  %v8371_v59 = vmul.f32 0.2, %v8355_v26 }
 0x606   : > { %16641 = vst [vmem:[#allocation5_spill] sm:$0xff] %v15905_v34  ;;  %16642 = vst [vmem:[#allocation6_spill] sm:$0xff] %v15908_v21  ;;  %v8347_v6 = vpop.permute.xlu0 %8346  ;;  %8193 = vadd.xlane.f32.xlu0 %v8192_v35  ;;  %v8190_v28 = vmul.f32 %v15905_v34, %v15905_v34  ;;  %v8191_v14 = vmul.f32 %v15908_v21, %v15908_v21 }
 0x607   : > { %v8358_v15 = vadd.f32 %v15733_v37, %v8347_v6  ;;  %v8359_v23 = vadd.f32 %v15736_v27, %v8347_v6  ;;  %v8169_v19 = vpop.permute.xlu1 %8168  ;;  %v15916_v24 = vsel %vm8362_vm9, %v8354_v32, %v8370_v17  ;;  %v15918_v49 = vsel %vm8363_vm10, %v8355_v26, %v8371_v59 }
 0x608   : > { %v15921_v10 = vsub.f32 %v15708_v60, %v8169_v19  ;;  %v15924_v20 = vsub.f32 %v15710_v1, %v8169_v19  ;;  %v8201_v8 = vadd.f32 %v8191_v14, %v8190_v28  ;;  %v8386_v11 = vadd.f32 %v15918_v49, %v15916_v24 }
 0x609   : > { %vm8366_vm11 = vcmp.gt.f32.partialorder %v8358_v15, 0.0  ;;  %vm8367_vm12 = vcmp.gt.f32.partialorder %v8359_v23, 0.0  ;;  %v8374_v37 = vmul.f32 0.2, %v8358_v15  ;;  %v8375_v35 = vmul.f32 0.2, %v8359_v23 }
 0x60a   : > { %16643 = vst [vmem:[#allocation7_spill] sm:$0xff] %v15921_v10  ;;  %16644 = vst [vmem:[#allocation8_spill] sm:$0xff] %v15924_v20  ;;  %8202 = vadd.xlane.f32.xlu0 %v8201_v8  ;;  %8387 = vadd.xlane.f32.xlu1 %v8386_v11  ;;  %v8188_v27 = vmul.f32 %v15921_v10, %v15921_v10  ;;  %v8189_v60 = vmul.f32 %v15924_v20, %v15924_v20 }
 0x60b   : > { %v8342_v6 = vpop.permute.xlu1 %8341  ;;  %v15932_v59 = vsel %vm8366_vm11, %v8358_v15, %v8374_v37  ;;  %v15934_v1 = vsel %vm8367_vm12, %v8359_v23, %v8375_v35 }
 0x60c   : > { %v8356_v17 = vadd.f32 %v15725_v5, %v8342_v6  ;;  %v8357_v32 = vadd.f32 %v15728_v36, %v8342_v6  ;;  %v8392_v26 = vadd.f32 %v15934_v1, %v15932_v59  ;;  %v8198_v28 = vadd.f32 %v8189_v60, %v8188_v27 }
 0x60e   : > { %8393 = vadd.xlane.f32.xlu1 %v8392_v26  ;;  %8199 = vadd.xlane.f32.xlu0 %v8198_v28  ;;  %vm8364_vm13 = vcmp.gt.f32.partialorder %v8356_v17, 0.0  ;;  %vm8365_vm14 = vcmp.gt.f32.partialorder %v8357_v32, 0.0  ;;  %v8372_v14 = vmul.f32 0.2, %v8356_v17  ;;  %v8373_v19 = vmul.f32 0.2, %v8357_v32 }
 0x60f   : > { %v8352_v8 = vpop.permute.xlu1 %8351 }
 0x610   : > { %v8360_v15 = vadd.f32 %v15739_v39, %v8352_v8  ;;  %v8361_v23 = vadd.f32 %v15742_v40, %v8352_v8  ;;  %v8380_v11 = vsel %vm8364_vm13, %v8356_v17, %v8372_v14  ;;  %v8381_v37 = vsel %vm8365_vm14, %v8357_v32, %v8373_v19 }
 0x611   : > { %v8389_v5 = vadd.f32 %v8381_v37, %v8380_v11 }
 0x612   : > { %vm8368_vm15 = vcmp.gt.f32.partialorder %v8360_v15, 0.0  ;;  %vm8369_vm1 = vcmp.gt.f32.partialorder %v8361_v23, 0.0  ;;  %v8376_v36 = vmul.f32 0.2, %v8360_v15  ;;  %v8377_v35 = vmul.f32 0.2, %v8361_v23 }
 0x613   : > { %8390 = vadd.xlane.f32.xlu0 %v8389_v5 }
 0x614   : > { %v15942_v27 = vsel %vm8368_vm15, %v8360_v15, %v8376_v36  ;;  %v15944_v60 = vsel %vm8369_vm1, %v8361_v23, %v8377_v35 }
 0x615   : > { %v8395_v6 = vadd.f32 %v15944_v60, %v15942_v27 }
 0x617   : > { %8396 = vadd.xlane.f32.xlu0 %v8395_v6 }
 0x692   : > { %v8197_v26 = vpop.xlane.xlu1 %8196 }
 0x693   : > { %v8194_v39 = vpop.xlane.xlu0 %8193 }
 0x694   : > { %v11667_v28 = vpack.c.bf16 %v8197_v26, %v8194_v39 }
 0x696   : > { %11668 = vmatprep.subr.bf16.mxu1 %v11667_v28 }
 0x697   : > { %v8203_v40 = vpop.xlane.xlu0 %8202  ;;  %11670 = vmatpush3.bf16.msra.mxu1 %v11667_v28  ;;  %v8388_v14 = vpop.xlane.xlu1 %8387 }
 0x69b   : > { %v8200_v17 = vpop.xlane.xlu0 %8199  ;;  %v8394_v15 = vpop.xlane.xlu1 %8393 }
 0x69c   : > { %v11671_v32 = vpack.c.bf16 %v8203_v40, %v8200_v17  ;;  %v11304_v40 = vld [vmem:[%s16609_s3 + $0x40] sm:$0xff] }
 0x69e   : > { %11672 = vmatprep.subr.bf16.mxu1 %v11671_v32 }
 0x69f   : > { %11674 = vmatpush3.bf16.msra.mxu1 %v11671_v32 }
 0x6a0   : > { %v8391_v19 = vpop.xlane.xlu0 %8390 }
 0x6a1   : > { %v11675_v8 = vpack.c.bf16 %v8391_v19, %v8388_v14  ;;  %v11306_v14 = vld [vmem:[%s16609_s3 + $0x50] sm:$0xff]  ;;  %v11305_v19 = vld [vmem:[%s16609_s3 + $0x48] sm:$0xff] }
 0x6a2   : > { %11495 = vmatmul.mubr.msk.f32.vlgmr.msra.gmra.mrb[72].mxu1 %vm5502_vm0, %v15850_v63 }
 0x6a3   : > { %11676 = vmatprep.subr.bf16.mxu1 %v11675_v8  ;;  %11497 = vmatprep.mubr.msk.f32.mxu1 %vm5502_vm0, %v15855_v2 }
 0x6a4   : > { %v8397_v23 = vpop.xlane.xlu0 %8396  ;;  %11678 = vmatpush3.bf16.msra.mxu1 %v11675_v8  ;;  %v11307_v8 = vld [vmem:[%s16609_s3 + $0x58] sm:$0xff] }
 0x6a5   : > { %v11679_v5 = vpack.c.bf16 %v8397_v23, %v8394_v15 }
 0x6a6   : > { %11498 = vmatmul.mubr.msk.f32.gmra.mrb[74].mxu1 %vm5502_vm0, %v15864_v30 }
 0x6a7   : > { %11680 = vmatprep.subr.bf16.mxu1 %v11679_v5  ;;  %11508 = vmatprep.mubr.msk.f32.mxu1 %vm5502_vm0, %v15759_v45 }
 0x6a8   : > { %11682 = vmatpush3.bf16.msra.mxu1 %v11679_v5 }
 0x6ab   : > { %11509 = vmatmul.mubr.msk.f32.vlgmr.msra.gmra.mrb[76].mxu1 %vm5502_vm0, %v15850_v63 }
 0x6ac   : > { %11511 = vmatprep.mubr.msk.f32.mxu1 %vm5502_vm0, %v15855_v2 }
 0x6af   : > { %11512 = vmatmul.mubr.msk.f32.gmra.mrb[78].mxu1 %vm5502_vm0, %v15864_v30 }
 0x6b0   : > { %11522 = vmatprep.mubr.msk.f32.mxu1 %vm5502_vm0, %v15759_v45 }
 0x775   : > { %v15964_v36 = vpop.f32.mrb[72].mxu1 }
 0x776   : > { %v15966_v35 = vpop.f32.mrb[73].mxu1 }
 0x779   : > { %v15968_v6 = vpop.f32.mrb[74].mxu1 }
 0x77a   : > { %v15970_v26 = vpop.f32.mrb[75].mxu1 }
 0x77e   : > { %v11510_v39 = vpop.f32.mrb[76].mxu1 }
 0x77f   : > { %8490 = vperm.xlu0 %12527, %v11510_v39   ;;  %v8464_v28 = vpop.f32.mrb[77].mxu1 }
 0x780   : > { %8485 = vperm.xlu1 %12528, %v8464_v28  }
 0x782   : > { %v11513_v17 = vpop.f32.mrb[78].mxu1 }
 0x783   : > { %8663 = vperm.xlu0 %12527, %v11304_v40   ;;  %v8474_v32 = vpop.f32.mrb[79].mxu1 }
 0x784   : > { %8500 = vperm.xlu1 %12528, %v11513_v17  }
 0x787   : > { %8673 = vperm.xlu0 %12527, %v11306_v14  }
 0x788   : > { %8495 = vperm.xlu1 %12528, %v8474_v32  }
 0x78c   : > { %8668 = vperm.xlu1 %12528, %v11305_v19  }
 0x790   : > { %8678 = vperm.xlu1 %12528, %v11307_v8  }
 0x7fe   : > { %v8491_v15 = vpop.permute.xlu0 %8490 }
 0x7ff   : > { %v15984_v23 = vsub.f32 %v8380_v11, %v8491_v15  ;;  %v15986_v5 = vsub.f32 %v8381_v37, %v8491_v15  ;;  %v8486_v39 = vpop.permute.xlu1 %8485 }
 0x800   : > { %v15989_v28 = vsub.f32 %v15916_v24, %v8486_v39  ;;  %v15992_v40 = vsub.f32 %v15918_v49, %v8486_v39 }
 0x801   : > { %v8513_v17 = vmul.f32 %v15984_v23, %v15984_v23  ;;  %v8514_v32 = vmul.f32 %v15986_v5, %v15986_v5 }
 0x802   : > { %v8664_v14 = vpop.permute.xlu0 %8663  ;;  %v8511_v11 = vmul.f32 %v15989_v28, %v15989_v28  ;;  %v8512_v37 = vmul.f32 %v15992_v40, %v15992_v40 }
 0x803   : > { %v8681_v19 = vadd.f32 %v15745_v29, %v8664_v14  ;;  %v8682_v24 = vadd.f32 %v15748_v41, %v8664_v14  ;;  %v8501_v8 = vpop.permute.xlu1 %8500  ;;  %v8522_v49 = vadd.f32 %v8514_v32, %v8513_v17 }
 0x804   : > { %v16005_v15 = vsub.f32 %v15942_v27, %v8501_v8  ;;  %v16008_v39 = vsub.f32 %v15944_v60, %v8501_v8  ;;  %v8519_v20 = vadd.f32 %v8512_v37, %v8511_v11 }
 0x805   : > { %8523 = vadd.xlane.f32.xlu1 %v8522_v49  ;;  %vm8689_vm2 = vcmp.gt.f32.partialorder %v8681_v19, 0.0  ;;  %vm8690_vm3 = vcmp.gt.f32.partialorder %v8682_v24, 0.0  ;;  %v8697_v10 = vmul.f32 0.2, %v8681_v19  ;;  %v8698_v21 = vmul.f32 0.2, %v8682_v24 }
 0x806   : > { %16645 = vst [vmem:[#allocation9_spill] sm:$0xff] %v16005_v15  ;;  %16646 = vst [vmem:[#allocation10_spill] sm:$0xff] %v16008_v39  ;;  %v8674_v34 = vpop.permute.xlu0 %8673  ;;  %8520 = vadd.xlane.f32.xlu0 %v8519_v20  ;;  %v8517_v29 = vmul.f32 %v16005_v15, %v16005_v15  ;;  %v8518_v41 = vmul.f32 %v16008_v39, %v16008_v39 }
 0x807   : > { %v8685_v27 = vadd.f32 %v15762_v46, %v8674_v34  ;;  %v8686_v17 = vadd.f32 %v15767_v47, %v8674_v34  ;;  %v8496_v60 = vpop.permute.xlu1 %8495  ;;  %v16016_v32 = vsel %vm8689_vm2, %v8681_v19, %v8697_v10  ;;  %v16018_v14 = vsel %vm8690_vm3, %v8682_v24, %v8698_v21 }
 0x808   : > { %v16021_v11 = vsub.f32 %v15932_v59, %v8496_v60  ;;  %v16024_v20 = vsub.f32 %v15934_v1, %v8496_v60  ;;  %v8528_v37 = vadd.f32 %v8518_v41, %v8517_v29  ;;  %v8713_v8 = vadd.f32 %v16018_v14, %v16016_v32 }
 0x809   : > { %vm8693_vm4 = vcmp.gt.f32.partialorder %v8685_v27, 0.0  ;;  %vm8694_vm5 = vcmp.gt.f32.partialorder %v8686_v17, 0.0  ;;  %v8701_v46 = vmul.f32 0.2, %v8685_v27  ;;  %v8702_v49 = vmul.f32 0.2, %v8686_v17 }
 0x80a   : > { %16647 = vst [vmem:[#allocation11_spill] sm:$0xff] %v16021_v11  ;;  %16648 = vst [vmem:[#allocation12_spill] sm:$0xff] %v16024_v20  ;;  %8529 = vadd.xlane.f32.xlu0 %v8528_v37  ;;  %8714 = vadd.xlane.f32.xlu1 %v8713_v8  ;;  %v8515_v47 = vmul.f32 %v16021_v11, %v16021_v11  ;;  %v8516_v34 = vmul.f32 %v16024_v20, %v16024_v20 }
 0x80b   : > { %v8669_v21 = vpop.permute.xlu1 %8668  ;;  %v16032_v10 = vsel %vm8693_vm4, %v8685_v27, %v8701_v46  ;;  %v16034_v59 = vsel %vm8694_vm5, %v8686_v17, %v8702_v49 }
 0x80c   : > { %v8683_v1 = vadd.f32 %v15751_v42, %v8669_v21  ;;  %v8684_v19 = vadd.f32 %v15754_v44, %v8669_v21  ;;  %v8719_v24 = vadd.f32 %v16034_v59, %v16032_v10  ;;  %v8525_v29 = vadd.f32 %v8516_v34, %v8515_v47 }
 0x80e   : > { %8720 = vadd.xlane.f32.xlu1 %v8719_v24  ;;  %8526 = vadd.xlane.f32.xlu0 %v8525_v29  ;;  %vm8691_vm6 = vcmp.gt.f32.partialorder %v8683_v1, 0.0  ;;  %vm8692_vm7 = vcmp.gt.f32.partialorder %v8684_v19, 0.0  ;;  %v8699_v41 = vmul.f32 0.2, %v8683_v1  ;;  %v8700_v60 = vmul.f32 0.2, %v8684_v19 }
 0x80f   : > { %v8679_v37 = vpop.permute.xlu1 %8678 }
 0x810   : > { %v8687_v27 = vadd.f32 %v15770_v61, %v8679_v37  ;;  %v8688_v17 = vadd.f32 %v15773_v31, %v8679_v37  ;;  %v8707_v8 = vsel %vm8691_vm6, %v8683_v1, %v8699_v41  ;;  %v8708_v46 = vsel %vm8692_vm7, %v8684_v19, %v8700_v60 }
 0x811   : > { %v8716_v42 = vadd.f32 %v8708_v46, %v8707_v8 }
 0x812   : > { %vm8695_vm8 = vcmp.gt.f32.partialorder %v8687_v27, 0.0  ;;  %vm8696_vm9 = vcmp.gt.f32.partialorder %v8688_v17, 0.0  ;;  %v8703_v44 = vmul.f32 0.2, %v8687_v27  ;;  %v8704_v49 = vmul.f32 0.2, %v8688_v17 }
 0x813   : > { %8717 = vadd.xlane.f32.xlu0 %v8716_v42 }
 0x814   : > { %v16042_v47 = vsel %vm8695_vm8, %v8687_v27, %v8703_v44  ;;  %v16044_v34 = vsel %vm8696_vm9, %v8688_v17, %v8704_v49 }
 0x815   : > { %v8722_v21 = vadd.f32 %v16044_v34, %v16042_v47 }
 0x817   : > { %8723 = vadd.xlane.f32.xlu0 %v8722_v21 }
 0x892   : > { %v8524_v24 = vpop.xlane.xlu1 %8523 }
 0x893   : > { %v8521_v61 = vpop.xlane.xlu0 %8520 }
 0x894   : > { %v11683_v29 = vpack.c.bf16 %v8524_v24, %v8521_v61 }
 0x896   : > { %11684 = vmatprep.subr.bf16.mxu1 %v11683_v29 }
 0x897   : > { %v8530_v31 = vpop.xlane.xlu0 %8529  ;;  %11686 = vmatpush3.bf16.msra.mxu1 %v11683_v29  ;;  %v8715_v41 = vpop.xlane.xlu1 %8714 }
 0x89b   : > { %v8527_v1 = vpop.xlane.xlu0 %8526  ;;  %v8721_v27 = vpop.xlane.xlu1 %8720 }
 0x89c   : > { %v11687_v19 = vpack.c.bf16 %v8530_v31, %v8527_v1  ;;  %v11316_v31 = vld [vmem:[%s16609_s3 + $0x60] sm:$0xff] }
 0x89e   : > { %11688 = vmatprep.subr.bf16.mxu1 %v11687_v19 }
 0x89f   : > { %11690 = vmatpush3.bf16.msra.mxu1 %v11687_v19 }
 0x8a0   : > { %v8718_v60 = vpop.xlane.xlu0 %8717 }
 0x8a1   : > { %v11691_v37 = vpack.c.bf16 %v8718_v60, %v8715_v41  ;;  %v11318_v41 = vld [vmem:[%s16609_s3 + $0x70] sm:$0xff]  ;;  %v11317_v60 = vld [vmem:[%s16609_s3 + $0x68] sm:$0xff] }
 0x8a2   : > { %11523 = vmatmul.mubr.msk.f32.vlgmr.msra.gmra.mrb[80].mxu1 %vm5502_vm0, %v15850_v63 }
 0x8a3   : > { %11692 = vmatprep.subr.bf16.mxu1 %v11691_v37  ;;  %11525 = vmatprep.mubr.msk.f32.mxu1 %vm5502_vm0, %v15855_v2 }
 0x8a4   : > { %v8724_v17 = vpop.xlane.xlu0 %8723  ;;  %11694 = vmatpush3.bf16.msra.mxu1 %v11691_v37  ;;  %v11319_v37 = vld [vmem:[%s16609_s3 + $0x78] sm:$0xff] }
 0x8a5   : > { %v11695_v42 = vpack.c.bf16 %v8724_v17, %v8721_v27 }
 0x8a6   : > { %11526 = vmatmul.mubr.msk.f32.gmra.mrb[82].mxu1 %vm5502_vm0, %v15864_v30 }
 0x8a7   : > { %11696 = vmatprep.subr.bf16.mxu1 %v11695_v42  ;;  %11536 = vmatprep.mubr.msk.f32.mxu1 %vm5502_vm0, %v15759_v45 }
 0x8a8   : > { %11698 = vmatpush3.bf16.msra.mxu1 %v11695_v42 }
 0x8ab   : > { %11537 = vmatmul.mubr.msk.f32.vlgmr.msra.gmra.mrb[84].mxu1 %vm5502_vm0, %v15850_v63 }
 0x8ac   : > { %11539 = vmatprep.mubr.msk.f32.mxu1 %vm5502_vm0, %v15855_v2 }
 0x8af   : > { %11540 = vmatmul.mubr.msk.f32.gmra.mrb[86].mxu1 %vm5502_vm0, %v15864_v30 }
 0x8b0   : > { %11550 = vmatprep.mubr.msk.f32.mxu1 %vm5502_vm0, %v15759_v45 }
 0x975   : > { %v16064_v44 = vpop.f32.mrb[80].mxu1 }
 0x976   : > { %v16066_v49 = vpop.f32.mrb[81].mxu1 }
 0x979   : > { %v16068_v21 = vpop.f32.mrb[82].mxu1 }
 0x97a   : > { %v16070_v24 = vpop.f32.mrb[83].mxu1 }
 0x97e   : > { %v11538_v61 = vpop.f32.mrb[84].mxu1 }
 0x97f   : > { %8817 = vperm.xlu0 %12527, %v11538_v61   ;;  %v8791_v29 = vpop.f32.mrb[85].mxu1 }
 0x980   : > { %8812 = vperm.xlu1 %12528, %v8791_v29  }
 0x982   : > { %v11541_v1 = vpop.f32.mrb[86].mxu1 }
 0x983   : > { %8990 = vperm.xlu0 %12527, %v11316_v31   ;;  %v8801_v19 = vpop.f32.mrb[87].mxu1 }
 0x984   : > { %8827 = vperm.xlu1 %12528, %v11541_v1  }
 0x987   : > { %9000 = vperm.xlu0 %12527, %v11318_v41  }
 0x988   : > { %8822 = vperm.xlu1 %12528, %v8801_v19  }
 0x98c   : > { %8995 = vperm.xlu1 %12528, %v11317_v60  }
 0x990   : > { %9005 = vperm.xlu1 %12528, %v11319_v37  }
 0x9fe   : > { %v8818_v27 = vpop.permute.xlu0 %8817 }
 0x9ff   : > { %v16084_v17 = vsub.f32 %v8707_v8, %v8818_v27  ;;  %v16086_v42 = vsub.f32 %v8708_v46, %v8818_v27  ;;  %v8813_v61 = vpop.permute.xlu1 %8812 }
 0xa00   : > { %v16089_v29 = vsub.f32 %v16016_v32, %v8813_v61  ;;  %v16092_v31 = vsub.f32 %v16018_v14, %v8813_v61 }
 0xa01   : > { %v8840_v1 = vmul.f32 %v16084_v17, %v16084_v17  ;;  %v8841_v19 = vmul.f32 %v16086_v42, %v16086_v42 }
 0xa02   : > { %v8991_v41 = vpop.permute.xlu0 %8990  ;;  %v8838_v8 = vmul.f32 %v16089_v29, %v16089_v29  ;;  %v8839_v46 = vmul.f32 %v16092_v31, %v16092_v31 }
 0xa03   : > { %v9008_v60 = vadd.f32 %v15776_v38, %v8991_v41  ;;  %v9009_v32 = vadd.f32 %v15779_v43, %v8991_v41  ;;  %v8828_v37 = vpop.permute.xlu1 %8827  ;;  %v8849_v14 = vadd.f32 %v8841_v19, %v8840_v1 }
 0xa04   : > { %v16105_v27 = vsub.f32 %v16042_v47, %v8828_v37  ;;  %v16108_v61 = vsub.f32 %v16044_v34, %v8828_v37  ;;  %v8846_v20 = vadd.f32 %v8839_v46, %v8838_v8 }
 0xa05   : > { %8850 = vadd.xlane.f32.xlu1 %v8849_v14  ;;  %vm9016_vm10 = vcmp.gt.f32.partialorder %v9008_v60, 0.0  ;;  %vm9017_vm11 = vcmp.gt.f32.partialorder %v9009_v32, 0.0  ;;  %v9024_v11 = vmul.f32 0.2, %v9008_v60  ;;  %v9025_v39 = vmul.f32 0.2, %v9009_v32 }
 0xa06   : > { %16649 = vst [vmem:[#allocation13_spill] sm:$0xff] %v16108_v61  ;;  %v9001_v15 = vpop.permute.xlu0 %9000  ;;  %8847 = vadd.xlane.f32.xlu0 %v8846_v20  ;;  %v8844_v38 = vmul.f32 %v16105_v27, %v16105_v27  ;;  %v8845_v43 = vmul.f32 %v16108_v61, %v16108_v61 }
 0xa07   : > { %v9012_v47 = vadd.f32 %v15788_v52, %v9001_v15  ;;  %v9013_v1 = vadd.f32 %v15791_v53, %v9001_v15  ;;  %v8823_v34 = vpop.permute.xlu1 %8822  ;;  %v16116_v19 = vsel %vm9016_vm10, %v9008_v60, %v9024_v11  ;;  %v16118_v41 = vsel %vm9017_vm11, %v9009_v32, %v9025_v39 }
 0xa08   : > { %v16121_v8 = vsub.f32 %v16032_v10, %v8823_v34  ;;  %v16124_v20 = vsub.f32 %v16034_v59, %v8823_v34  ;;  %v8855_v46 = vadd.f32 %v8845_v43, %v8844_v38  ;;  %v9040_v37 = vadd.f32 %v16118_v41, %v16116_v19 }
 0xa09   : > { %v9028_v14 = vmul.f32 0.2, %v9012_v47  ;;  %v9029_v61 = vmul.f32 0.2, %v9013_v1  ;;  %vm9020_vm12 = vcmp.gt.f32.partialorder %v9012_v47, 0.0  ;;  %vm9021_vm13 = vcmp.gt.f32.partialorder %v9013_v1, 0.0 }
 0xa0a   : > { %16650 = vst [vmem:[#allocation14_spill] sm:$0xff] %v16121_v8  ;;  %16651 = vst [vmem:[#allocation15_spill] sm:$0xff] %v16124_v20  ;;  %8856 = vadd.xlane.f32.xlu0 %v8855_v46  ;;  %9041 = vadd.xlane.f32.xlu1 %v9040_v37  ;;  %v8842_v52 = vmul.f32 %v16121_v8, %v16121_v8  ;;  %v8843_v53 = vmul.f32 %v16124_v20, %v16124_v20 }
 0xa0b   : > { %v8996_v15 = vpop.permute.xlu1 %8995  ;;  %v16132_v39 = vsel %vm9020_vm12, %v9012_v47, %v9028_v14  ;;  %v16134_v11 = vsel %vm9021_vm13, %v9013_v1, %v9029_v61 }
 0xa0c   : > { %v9010_v10 = vadd.f32 %v15782_v50, %v8996_v15  ;;  %v9011_v59 = vadd.f32 %v15785_v51, %v8996_v15  ;;  %v9046_v60 = vadd.f32 %v16134_v11, %v16132_v39  ;;  %v8852_v32 = vadd.f32 %v8843_v53, %v8842_v52 }
 0xa0e   : > { %9047 = vadd.xlane.f32.xlu1 %v9046_v60  ;;  %8853 = vadd.xlane.f32.xlu0 %v8852_v32  ;;  %vm9018_vm14 = vcmp.gt.f32.partialorder %v9010_v10, 0.0  ;;  %vm9019_vm15 = vcmp.gt.f32.partialorder %v9011_v59, 0.0  ;;  %v9026_v38 = vmul.f32 0.2, %v9010_v10  ;;  %v9027_v43 = vmul.f32 0.2, %v9011_v59 }
 0xa0f   : > { %v9006_v34 = vpop.permute.xlu1 %9005 }
 0xa10   : > { %v9014_v47 = vadd.f32 %v15794_v54, %v9006_v34  ;;  %v9015_v61 = vadd.f32 %v15797_v55, %v9006_v34  ;;  %v9034_v1 = vsel %vm9018_vm14, %v9010_v10, %v9026_v38  ;;  %v9035_v46 = vsel %vm9019_vm15, %v9011_v59, %v9027_v43 }
 0xa11   : > { %v9043_v50 = vadd.f32 %v9035_v46, %v9034_v1 }
 0xa12   : > { %v9030_v37 = vmul.f32 0.2, %v9014_v47  ;;  %v9031_v51 = vmul.f32 0.2, %v9015_v61  ;;  %vm9022_vm1 = vcmp.gt.f32.partialorder %v9014_v47, 0.0  ;;  %vm9023_vm2 = vcmp.gt.f32.partialorder %v9015_v61, 0.0 }
 0xa13   : > { %9044 = vadd.xlane.f32.xlu0 %v9043_v50 }
 0xa14   : > { %v16142_v14 = vsel %vm9022_vm1, %v9014_v47, %v9030_v37  ;;  %v16144_v52 = vsel %vm9023_vm2, %v9015_v61, %v9031_v51 }
 0xa15   : > { %v9049_v53 = vadd.f32 %v16144_v52, %v16142_v14 }
 0xa17   : > { %9050 = vadd.xlane.f32.xlu0 %v9049_v53 }
 0xa92   : > { %v8851_v15 = vpop.xlane.xlu1 %8850 }
 0xa93   : > { %v8848_v54 = vpop.xlane.xlu0 %8847 }
 0xa94   : > { %v11699_v60 = vpack.c.bf16 %v8851_v15, %v8848_v54 }
 0xa96   : > { %11700 = vmatprep.subr.bf16.mxu1 %v11699_v60 }
 0xa97   : > { %v8857_v55 = vpop.xlane.xlu0 %8856  ;;  %11702 = vmatpush3.bf16.msra.mxu1 %v11699_v60  ;;  %v9042_v32 = vpop.xlane.xlu1 %9041  ;;  %v11328_v60 = vld [vmem:[%s16609_s3 + $0x80] sm:$0xff] }
 0xa9b   : > { %v8854_v10 = vpop.xlane.xlu0 %8853  ;;  %v9048_v34 = vpop.xlane.xlu1 %9047 }
 0xa9c   : > { %v11703_v59 = vpack.c.bf16 %v8857_v55, %v8854_v10 }
 0xa9e   : > { %11704 = vmatprep.subr.bf16.mxu1 %v11703_v59 }
 0xa9f   : > { %11706 = vmatpush3.bf16.msra.mxu1 %v11703_v59  ;;  %v11329_v59 = vld [vmem:[%s16609_s3 + $0x88] sm:$0xff] }
 0xaa0   : > { %v9045_v38 = vpop.xlane.xlu0 %9044 }
 0xaa1   : > { %v11707_v43 = vpack.c.bf16 %v9045_v38, %v9042_v32  ;;  %v11331_v32 = vld [vmem:[%s16609_s3 + $0x98] sm:$0xff] }
 0xaa2   : > { %11551 = vmatmul.mubr.msk.f32.vlgmr.msra.gmra.mrb[88].mxu1 %vm5502_vm0, %v15850_v63 }
 0xaa3   : > { %11708 = vmatprep.subr.bf16.mxu1 %v11707_v43  ;;  %11553 = vmatprep.mubr.msk.f32.mxu1 %vm5502_vm0, %v15855_v2 }
 0xaa4   : > { %v9051_v47 = vpop.xlane.xlu0 %9050  ;;  %11710 = vmatpush3.bf16.msra.mxu1 %v11707_v43 }
 0xaa5   : > { %v11711_v61 = vpack.c.bf16 %v9051_v47, %v9048_v34 }
 0xaa6   : > { %11554 = vmatmul.mubr.msk.f32.gmra.mrb[90].mxu1 %vm5502_vm0, %v15864_v30 }
 0xaa7   : > { %11712 = vmatprep.subr.bf16.mxu1 %v11711_v61  ;;  %11564 = vmatprep.mubr.msk.f32.mxu1 %vm5502_vm0, %v15759_v45 }
 0xaa8   : > { %11714 = vmatpush3.bf16.msra.mxu1 %v11711_v61 }
 0xaab   : > { %11565 = vmatmul.mubr.msk.f32.vlgmr.msra.gmra.mrb[92].mxu1 %vm5502_vm0, %v15850_v63 }
 0xaac   : > { %11567 = vmatprep.mubr.msk.f32.mxu1 %vm5502_vm0, %v15855_v2 }
 0xaaf   : > { %11568 = vmatmul.mubr.msk.f32.gmra.mrb[94].mxu1 %vm5502_vm0, %v15864_v30 }
 0xab0   : > { %11578 = vmatprep.mubr.msk.f32.mxu1 %vm5502_vm0, %v15759_v45  ;;  %v11330_v45 = vld [vmem:[%s16609_s3 + $0x90] sm:$0xff] }
 0xb75   : > { %v16164_v50 = vpop.f32.mrb[88].mxu1 }
 0xb76   : > { %v16166_v37 = vpop.f32.mrb[89].mxu1 }
 0xb79   : > { %v16168_v51 = vpop.f32.mrb[90].mxu1 }
 0xb7a   : > { %v16170_v53 = vpop.f32.mrb[91].mxu1 }
 0xb7e   : > { %v11566_v15 = vpop.f32.mrb[92].mxu1 }
 0xb7f   : > { %9144 = vperm.xlu0 %12527, %v11566_v15   ;;  %v9118_v54 = vpop.f32.mrb[93].mxu1 }
 0xb80   : > { %9139 = vperm.xlu1 %12528, %v9118_v54  }
 0xb82   : > { %v11569_v55 = vpop.f32.mrb[94].mxu1 }
 0xb83   : > { %9317 = vperm.xlu0 %12527, %v11328_v60   ;;  %v9128_v10 = vpop.f32.mrb[95].mxu1 }
 0xb84   : > { %9154 = vperm.xlu1 %12528, %v11569_v55  }
 0xb87   : > { %9327 = vperm.xlu0 %12527, %v11330_v45  }
 0xb88   : > { %9149 = vperm.xlu1 %12528, %v9128_v10  }
 0xb8c   : > { %9322 = vperm.xlu1 %12528, %v11329_v59  }
 0xb90   : > { %9332 = vperm.xlu1 %12528, %v11331_v32  }
 0xbfe   : > { %v9145_v38 = vpop.permute.xlu0 %9144 }
 0xbff   : > { %v16184_v43 = vsub.f32 %v9034_v1, %v9145_v38  ;;  %v16186_v34 = vsub.f32 %v9035_v46, %v9145_v38  ;;  %v9140_v47 = vpop.permute.xlu1 %9139 }
 0xc00   : > { %v16189_v61 = vsub.f32 %v16116_v19, %v9140_v47  ;;  %v16192_v15 = vsub.f32 %v16118_v41, %v9140_v47 }
 0xc01   : > { %v9167_v54 = vmul.f32 %v16184_v43, %v16184_v43  ;;  %v9168_v60 = vmul.f32 %v16186_v34, %v16186_v34 }
 0xc02   : > { %v9318_v55 = vpop.permute.xlu0 %9317  ;;  %v9165_v1 = vmul.f32 %v16189_v61, %v16189_v61  ;;  %v9166_v46 = vmul.f32 %v16192_v15, %v16192_v15 }
 0xc03   : > { %v9335_v10 = vadd.f32 %v15800_v56, %v9318_v55  ;;  %v9336_v19 = vadd.f32 %v15803_v58, %v9318_v55  ;;  %v9155_v45 = vpop.permute.xlu1 %9154  ;;  %v9176_v41 = vadd.f32 %v9168_v60, %v9167_v54 }
 0xc04   : > { %v16205_v59 = vsub.f32 %v16142_v14, %v9155_v45  ;;  %v16208_v32 = vsub.f32 %v16144_v52, %v9155_v45  ;;  %v9173_v38 = vadd.f32 %v9166_v46, %v9165_v1 }
 0xc05   : > { %v9351_v47 = vmul.f32 0.2, %v9335_v10  ;;  %v9352_v20 = vmul.f32 0.2, %v9336_v19  ;;  %9177 = vadd.xlane.f32.xlu1 %v9176_v41  ;;  %vm9343_vm3 = vcmp.gt.f32.partialorder %v9335_v10, 0.0  ;;  %vm9344_vm4 = vcmp.gt.f32.partialorder %v9336_v19, 0.0 }
 0xc06   : > { %16652 = vst [vmem:[#allocation16_spill] sm:$0xff] %v16208_v32  ;;  %v9328_v8 = vpop.permute.xlu0 %9327  ;;  %9174 = vadd.xlane.f32.xlu0 %v9173_v38  ;;  %v9171_v56 = vmul.f32 %v16205_v59, %v16205_v59  ;;  %v9172_v58 = vmul.f32 %v16208_v32, %v16208_v32 }
 0xc07   : > { %v9339_v14 = vadd.f32 %v15812_v9, %v9328_v8  ;;  %v9340_v54 = vadd.f32 %v15815_v13, %v9328_v8  ;;  %v9150_v52 = vpop.permute.xlu1 %9149  ;;  %v16216_v60 = vsel %vm9343_vm3, %v9335_v10, %v9351_v47  ;;  %v16218_v55 = vsel %vm9344_vm4, %v9336_v19, %v9352_v20 }
 0xc08   : > { %v16221_v1 = vsub.f32 %v16132_v39, %v9150_v52  ;;  %v16224_v46 = vsub.f32 %v16134_v11, %v9150_v52  ;;  %v9182_v45 = vadd.f32 %v9172_v58, %v9171_v56  ;;  %v9367_v41 = vadd.f32 %v16218_v55, %v16216_v60 }
 0xc09   : > { %v9355_v38 = vmul.f32 0.2, %v9339_v14  ;;  %v9356_v32 = vmul.f32 0.2, %v9340_v54  ;;  %vm9347_vm5 = vcmp.gt.f32.partialorder %v9339_v14, 0.0  ;;  %vm9348_vm6 = vcmp.gt.f32.partialorder %v9340_v54, 0.0 }
 0xc0a   : > { %16653 = vst [vmem:[#allocation17_spill] sm:$0xff] %v16224_v46  ;;  %9183 = vadd.xlane.f32.xlu0 %v9182_v45  ;;  %9368 = vadd.xlane.f32.xlu1 %v9367_v41  ;;  %v9169_v9 = vmul.f32 %v16221_v1, %v16221_v1  ;;  %v9170_v13 = vmul.f32 %v16224_v46, %v16224_v46  ;;  %vm13885_vm4 = vmmov 0  }
 0xc0b   : > { %v9323_v8 = vpop.permute.xlu1 %9322  ;;  %v16232_v20 = vsel %vm9347_vm5, %v9339_v14, %v9355_v38  ;;  %v16234_v39 = vsel %vm9348_vm6, %v9340_v54, %v9356_v32  ;;  %vm10057_vm5 = vcmask 7168   ;;  %vm10141_vm6 = vcmask 15360  }
 0xc0c   : > { %v9337_v11 = vadd.f32 %v15806_v0, %v9323_v8  ;;  %v9338_v10 = vadd.f32 %v15809_v4, %v9323_v8  ;;  %v9373_v19 = vadd.f32 %v16234_v39, %v16232_v20  ;;  %v9179_v47 = vadd.f32 %v9170_v13, %v9169_v9 }
 0xc0e   : > { %v9353_v56 = vmul.f32 0.2, %v9337_v11  ;;  %v9354_v58 = vmul.f32 0.2, %v9338_v10  ;;  %9374 = vadd.xlane.f32.xlu1 %v9373_v19  ;;  %9180 = vadd.xlane.f32.xlu0 %v9179_v47  ;;  %vm9345_vm7 = vcmp.gt.f32.partialorder %v9337_v11, 0.0  ;;  %vm9346_vm8 = vcmp.gt.f32.partialorder %v9338_v10, 0.0 }
 0xc0f   : > { %v9333_v52 = vpop.permute.xlu1 %9332 }
 0xc10   : > { %v9341_v14 = vadd.f32 %v15818_v18, %v9333_v52  ;;  %v9342_v32 = vadd.f32 %v15821_v22, %v9333_v52  ;;  %v9361_v54 = vsel %vm9345_vm7, %v9337_v11, %v9353_v56  ;;  %v9362_v45 = vsel %vm9346_vm8, %v9338_v10, %v9354_v58 }
 0xc11   : > { %v9370_v0 = vadd.f32 %v9362_v45, %v9361_v54  ;;  %vm10154_vm7 = vcmask 1041408  }
 0xc12   : > { %v9357_v41 = vmul.f32 0.2, %v9341_v14  ;;  %v9358_v4 = vmul.f32 0.2, %v9342_v32  ;;  %vm9349_vm9 = vcmp.gt.f32.partialorder %v9341_v14, 0.0  ;;  %vm9350_vm10 = vcmp.gt.f32.partialorder %v9342_v32, 0.0 }
 0xc13   : > { %9371 = vadd.xlane.f32.xlu0 %v9370_v0  ;;  %v16257_v0 = vld [vmem:[%s16612_s6] sm:$0xff] }
 0xc14   : > { %v16242_v38 = vsel %vm9349_vm9, %v9341_v14, %v9357_v41  ;;  %v16244_v9 = vsel %vm9350_vm10, %v9342_v32, %v9358_v4 }
 0xc15   : > { %v9376_v13 = vadd.f32 %v16244_v9, %v16242_v38 }
 0xc17   : > { %9377 = vadd.xlane.f32.xlu0 %v9376_v13 }
 0xc92   : > { %v9178_v8 = vpop.xlane.xlu1 %9177 }
 0xc93   : > { %v9175_v18 = vpop.xlane.xlu0 %9174 }
 0xc94   : > { %v11715_v19 = vpack.c.bf16 %v9178_v8, %v9175_v18 }
 0xc96   : > { %11716 = vmatprep.subr.bf16.mxu1 %v11715_v19 }
 0xc97   : > { %v9184_v22 = vpop.xlane.xlu0 %9183  ;;  %11718 = vmatpush3.bf16.msra.mxu1 %v11715_v19  ;;  %v9369_v47 = vpop.xlane.xlu1 %9368 }
 0xc9b   : > { %v9181_v11 = vpop.xlane.xlu0 %9180  ;;  %v9375_v52 = vpop.xlane.xlu1 %9374 }
 0xc9c   : > { %v11719_v10 = vpack.c.bf16 %v9184_v22, %v9181_v11  ;;  %v11342_v22 = vld [vmem:[%s16609_s3 + $0xb0] sm:$0xff]  ;;  %v11341_v11 = vld [vmem:[%s16609_s3 + $0xa8] sm:$0xff] }
 0xc9e   : > { %11720 = vmatprep.subr.bf16.mxu1 %v11719_v10 }
 0xc9f   : > { %11722 = vmatpush3.bf16.msra.mxu1 %v11719_v10  ;;  %v11343_v10 = vld [vmem:[%s16609_s3 + $0xb8] sm:$0xff] }
 0xca0   : > { %v9372_v56 = vpop.xlane.xlu0 %9371 }
 0xca1   : > { %v11723_v58 = vpack.c.bf16 %v9372_v56, %v9369_v47 }
 0xca2   : > { %11579 = vmatmul.mubr.msk.f32.vlgmr.msra.gmra.mrb[96].mxu1 %vm5502_vm0, %v15850_v63 }
 0xca3   : > { %11724 = vmatprep.subr.bf16.mxu1 %v11723_v58  ;;  %11581 = vmatprep.mubr.msk.f32.mxu1 %vm5502_vm0, %v15855_v2 }
 0xca4   : > { %v9378_v14 = vpop.xlane.xlu0 %9377  ;;  %11726 = vmatpush3.bf16.msra.mxu1 %v11723_v58 }
 0xca5   : > { %v11727_v32 = vpack.c.bf16 %v9378_v14, %v9375_v52 }
 0xca6   : > { %11582 = vmatmul.mubr.msk.f32.gmra.mrb[98].mxu1 %vm5502_vm0, %v15864_v30 }
 0xca7   : > { %11728 = vmatprep.subr.bf16.mxu1 %v11727_v32  ;;  %11592 = vmatprep.mubr.msk.f32.mxu1 %vm5502_vm0, %v16257_v0 }
 0xca8   : > { %11730 = vmatpush3.bf16.msra.mxu1 %v11727_v32 }
 0xcab   : > { %11593 = vmatmul.mubr.msk.f32.vlgmr.msra.gmra.mrb[100].mxu1 %vm5502_vm0, %v15850_v63 }
 0xcac   : > { %11595 = vmatprep.mubr.msk.f32.mxu1 %vm5502_vm0, %v15855_v2  ;;  %v11340_v2 = vld [vmem:[%s16609_s3 + $0xa0] sm:$0xff] }
 0xcaf   : > { %11596 = vmatmul.mubr.msk.f32.gmra.mrb[102].mxu1 %vm5502_vm0, %v15864_v30 }
 0xcb0   : > { %11606 = vmatprep.mubr.msk.f32.mxu1 %vm5502_vm0, %v16257_v0 }
 0xd75   : > { %v16269_v41 = vpop.f32.mrb[96].mxu1 }
 0xd76   : > { %v16271_v4 = vpop.f32.mrb[97].mxu1 }
 0xd79   : > { %v16273_v13 = vpop.f32.mrb[98].mxu1 }
 0xd7a   : > { %v16275_v8 = vpop.f32.mrb[99].mxu1 }
 0xd7e   : > { %v11594_v18 = vpop.f32.mrb[100].mxu1 }
 0xd7f   : > { %9471 = vperm.xlu0 %12527, %v11594_v18   ;;  %v9445_v63 = vpop.f32.mrb[101].mxu1 }
 0xd80   : > { %9466 = vperm.xlu1 %12528, %v9445_v63  }
 0xd82   : > { %v11597_v30 = vpop.f32.mrb[102].mxu1 }
 0xd83   : > { %9644 = vperm.xlu0 %12527, %v11340_v2   ;;  %v9455_v19 = vpop.f32.mrb[103].mxu1 }
 0xd84   : > { %9481 = vperm.xlu1 %12528, %v11597_v30  }
 0xd87   : > { %9654 = vperm.xlu0 %12527, %v11342_v22  }
 0xd88   : > { %9476 = vperm.xlu1 %12528, %v9455_v19  }
 0xd8c   : > { %9649 = vperm.xlu1 %12528, %v11341_v11  }
 0xd90   : > { %9659 = vperm.xlu1 %12528, %v11343_v10  }
 0xdfe   : > { %v9472_v47 = vpop.permute.xlu0 %9471 }
 0xdff   : > { %v16289_v56 = vsub.f32 %v9361_v54, %v9472_v47  ;;  %v16291_v58 = vsub.f32 %v9362_v45, %v9472_v47  ;;  %v9467_v52 = vpop.permute.xlu1 %9466 }
 0xe00   : > { %v16294_v14 = vsub.f32 %v16216_v60, %v9467_v52  ;;  %v16297_v32 = vsub.f32 %v16218_v55, %v9467_v52 }
 0xe01   : > { %v9494_v18 = vmul.f32 %v16289_v56, %v16289_v56  ;;  %v9495_v63 = vmul.f32 %v16291_v58, %v16291_v58 }
 0xe02   : > { %v9645_v2 = vpop.permute.xlu0 %9644  ;;  %v9492_v54 = vmul.f32 %v16294_v14, %v16294_v14  ;;  %v9493_v45 = vmul.f32 %v16297_v32, %v16297_v32 }
 0xe03   : > { %v9662_v30 = vadd.f32 %v15824_v25, %v9645_v2  ;;  %v9663_v60 = vadd.f32 %v15827_v33, %v9645_v2  ;;  %v9482_v19 = vpop.permute.xlu1 %9481  ;;  %v9503_v55 = vadd.f32 %v9495_v63, %v9494_v18 }
 0xe04   : > { %v16310_v22 = vsub.f32 %v16242_v38, %v9482_v19  ;;  %v16313_v11 = vsub.f32 %v16244_v9, %v9482_v19  ;;  %v9500_v10 = vadd.f32 %v9493_v45, %v9492_v54 }
 0xe05   : > { %v9678_v47 = vmul.f32 0.2, %v9662_v30  ;;  %v9679_v52 = vmul.f32 0.2, %v9663_v60  ;;  %9504 = vadd.xlane.f32.xlu1 %v9503_v55  ;;  %vm9670_vm11 = vcmp.gt.f32.partialorder %v9662_v30, 0.0  ;;  %vm9671_vm12 = vcmp.gt.f32.partialorder %v9663_v60, 0.0 }
 0xe06   : > { %16654 = vst [vmem:[#allocation18_spill] sm:$0xff] %v16310_v22  ;;  %16655 = vst [vmem:[#allocation19_spill] sm:$0xff] %v16313_v11  ;;  %v9655_v46 = vpop.permute.xlu0 %9654  ;;  %9501 = vadd.xlane.f32.xlu0 %v9500_v10  ;;  %v9498_v25 = vmul.f32 %v16310_v22, %v16310_v22  ;;  %v9499_v33 = vmul.f32 %v16313_v11, %v16313_v11 }
 0xe07   : > { %v9666_v38 = vadd.f32 %v15836_v3, %v9655_v46  ;;  %v9667_v18 = vadd.f32 %v15839_v7, %v9655_v46  ;;  %v9477_v9 = vpop.permute.xlu1 %9476  ;;  %v16321_v63 = vsel %vm9670_vm11, %v9662_v30, %v9678_v47  ;;  %v16323_v2 = vsel %vm9671_vm12, %v9663_v60, %v9679_v52 }
 0xe08   : > { %v16326_v54 = vsub.f32 %v16232_v20, %v9477_v9  ;;  %v16329_v45 = vsub.f32 %v16234_v39, %v9477_v9  ;;  %v9509_v19 = vadd.f32 %v9499_v33, %v9498_v25  ;;  %v9694_v55 = vadd.f32 %v16323_v2, %v16321_v63 }
 0xe09   : > { %v9682_v10 = vmul.f32 0.2, %v9666_v38  ;;  %v9683_v11 = vmul.f32 0.2, %v9667_v18  ;;  %vm9674_vm13 = vcmp.gt.f32.partialorder %v9666_v38, 0.0  ;;  %vm9675_vm14 = vcmp.gt.f32.partialorder %v9667_v18, 0.0 }
 0xe0a   : > { %9510 = vadd.xlane.f32.xlu0 %v9509_v19  ;;  %9695 = vadd.xlane.f32.xlu1 %v9694_v55  ;;  %v9496_v3 = vmul.f32 %v16326_v54, %v16326_v54  ;;  %v9497_v7 = vmul.f32 %v16329_v45, %v16329_v45 }
 0xe0b   : > { %v9650_v46 = vpop.permute.xlu1 %9649  ;;  %v16337_v20 = vsel %vm9674_vm13, %v9666_v38, %v9682_v10  ;;  %v16339_v39 = vsel %vm9675_vm14, %v9667_v18, %v9683_v11 }
 0xe0c   : > { %v9664_v30 = vadd.f32 %v15830_v57, %v9650_v46  ;;  %v9665_v60 = vadd.f32 %v15833_v62, %v9650_v46  ;;  %v9700_v47 = vadd.f32 %v16339_v39, %v16337_v20  ;;  %v9506_v52 = vadd.f32 %v9497_v7, %v9496_v3 }
 0xe0e   : > { %v9680_v25 = vmul.f32 0.2, %v9664_v30  ;;  %v9681_v33 = vmul.f32 0.2, %v9665_v60  ;;  %9701 = vadd.xlane.f32.xlu1 %v9700_v47  ;;  %9507 = vadd.xlane.f32.xlu0 %v9506_v52  ;;  %vm9672_vm15 = vcmp.gt.f32.partialorder %v9664_v30, 0.0  ;;  %vm9673_vm1 = vcmp.gt.f32.partialorder %v9665_v60, 0.0 }
 0xe0f   : > { %v9660_v9 = vpop.permute.xlu1 %9659 }
 0xe10   : > { %v9668_v38 = vadd.f32 %v15842_v12, %v9660_v9  ;;  %v9669_v11 = vadd.f32 %v15845_v16, %v9660_v9  ;;  %v9688_v18 = vsel %vm9672_vm15, %v9664_v30, %v9680_v25  ;;  %v9689_v19 = vsel %vm9673_vm1, %v9665_v60, %v9681_v33  ;;  %v16356_v9 = vld [vmem:[%s16612_s6 + $0x8] sm:$0xff] }
 0xe11   : > { %v9697_v57 = vadd.f32 %v9689_v19, %v9688_v18 }
 0xe12   : > { %v9684_v55 = vmul.f32 0.2, %v9668_v38  ;;  %v9685_v62 = vmul.f32 0.2, %v9669_v11  ;;  %vm9676_vm2 = vcmp.gt.f32.partialorder %v9668_v38, 0.0  ;;  %vm9677_vm3 = vcmp.gt.f32.partialorder %v9669_v11, 0.0 }
 0xe13   : > { %9698 = vadd.xlane.f32.xlu0 %v9697_v57 }
 0xe14   : > { %v16347_v10 = vsel %vm9676_vm2, %v9668_v38, %v9684_v55  ;;  %v16349_v3 = vsel %vm9677_vm3, %v9669_v11, %v9685_v62  ;;  %v16363_v38 = vld [vmem:[%s16612_s6 + $0x10] sm:$0xff]  ;;  %v16370_v62 = vld [vmem:[%s16612_s6 + $0x18] sm:$0xff] }
 0xe15   : > { %v9703_v7 = vadd.f32 %v16349_v3, %v16347_v10 }
 0xe17   : > { %9704 = vadd.xlane.f32.xlu0 %v9703_v7 }
 0xe92   : > { %v9505_v46 = vpop.xlane.xlu1 %9504 }
 0xe93   : > { %v9502_v12 = vpop.xlane.xlu0 %9501 }
 0xe94   : > { %v11731_v47 = vpack.c.bf16 %v9505_v46, %v9502_v12 }
 0xe96   : > { %11732 = vmatprep.subr.bf16.mxu1 %v11731_v47 }
 0xe97   : > { %v9511_v16 = vpop.xlane.xlu0 %9510  ;;  %11734 = vmatpush3.bf16.msra.mxu1 %v11731_v47  ;;  %v9696_v52 = vpop.xlane.xlu1 %9695 }
 0xe9b   : > { %v9508_v30 = vpop.xlane.xlu0 %9507  ;;  %v9702_v11 = vpop.xlane.xlu1 %9701 }
 0xe9c   : > { %v11735_v60 = vpack.c.bf16 %v9511_v16, %v9508_v30 }
 0xe9e   : > { %11736 = vmatprep.subr.bf16.mxu1 %v11735_v60 }
 0xe9f   : > { %11738 = vmatpush3.bf16.msra.mxu1 %v11735_v60 }
 0xea0   : > { %v9699_v25 = vpop.xlane.xlu0 %9698 }
 0xea1   : > { %v11739_v33 = vpack.c.bf16 %v9699_v25, %v9696_v52 }
 0xea2   : > { %11607 = vmatmul.mubr.msk.f32.vlgmr.msra.gmra.mrb[104].mxu1 %vm5502_vm0, %v16356_v9 }
 0xea3   : > { %11740 = vmatprep.subr.bf16.mxu1 %v11739_v33  ;;  %11609 = vmatprep.mubr.msk.f32.mxu1 %vm5502_vm0, %v16363_v38 }
 0xea4   : > { %11742 = vmatpush3.bf16.msra.mxu1 %v11739_v33  ;;  %v9705_v57 = vpop.xlane.xlu0 %9704 }
 0xea5   : > { %v11743_v55 = vpack.c.bf16 %v9705_v57, %v9702_v11 }
 0xea6   : > { %11610 = vmatmul.mubr.msk.f32.gmra.mrb[106].mxu1 %vm5502_vm0, %v16370_v62 }
 0xea7   : > { %11744 = vmatprep.subr.bf16.mxu1 %v11743_v55  ;;  %11620 = vmatprep.mubr.msk.f32.mxu1 %vm5502_vm0, %v16257_v0 }
 0xea8   : > { %11746 = vmatpush3.bf16.msra.mxu1 %v11743_v55 }
 0xeab   : > { %11621 = vmatmul.mubr.msk.f32.vlgmr.msra.gmra.mrb[108].mxu1 %vm5502_vm0, %v16356_v9 }
 0xeac   : > { %11623 = vmatprep.mubr.msk.f32.mxu1 %vm5502_vm0, %v16363_v38 }
 0xeaf   : > { %11624 = vmatmul.mubr.msk.f32.gmra.mrb[110].mxu1 %vm5502_vm0, %v16370_v62 }
 0xeb0   : > { %11634 = vmatprep.mubr.msk.f32.mxu1 %vm5502_vm0, %v16257_v0 }
 0xf75   : > { %v16384_v7 = vpop.f32.mrb[104].mxu1 }
 0xf76   : > { %v16386_v46 = vpop.f32.mrb[105].mxu1 }
 0xf79   : > { %v16388_v12 = vpop.f32.mrb[106].mxu1 }
 0xf7a   : > { %v16390_v47 = vpop.f32.mrb[107].mxu1 }
 0xf7e   : > { %v11622_v16 = vpop.f32.mrb[108].mxu1 }
 0xf7f   : > { %9798 = vperm.xlu0 %12527, %v11622_v16   ;;  %v9772_v30 = vpop.f32.mrb[109].mxu1 }
 0xf80   : > { %9793 = vperm.xlu1 %12528, %v9772_v30  }
 0xf82   : > { %v11625_v60 = vpop.f32.mrb[110].mxu1 }
 0xf83   : > { %v9782_v52 = vpop.f32.mrb[111].mxu1 }
 0xf84   : > { %9803 = vperm.xlu1 %12528, %v9782_v52  }
 0xf88   : > { %9808 = vperm.xlu1 %12528, %v11625_v60  }
 0xffe   : > { %v9799_v25 = vpop.permute.xlu0 %9798 }
 0xfff   : > { %v16392_v33 = vsub.f32 %v9688_v18, %v9799_v25  ;;  %v16394_v0 = vsub.f32 %v9689_v19, %v9799_v25  ;;  %v9794_v11 = vpop.permute.xlu1 %9793 }
0x1000   : > { %v16397_v57 = vsub.f32 %v16321_v63, %v9794_v11  ;;  %v16400_v55 = vsub.f32 %v16323_v2, %v9794_v11 }
0x1001   : > { %v9821_v16 = vmul.f32 %v16392_v33, %v16392_v33  ;;  %v9822_v30 = vmul.f32 %v16394_v0, %v16394_v0 }
0x1002   : > { %16656 = vst [vmem:[#allocation20_spill] sm:$0xff] %v16397_v57  ;;  %16657 = vst [vmem:[#allocation21_spill] sm:$0xff] %v16400_v55  ;;  %v9819_v60 = vmul.f32 %v16397_v57, %v16397_v57  ;;  %v9820_v18 = vmul.f32 %v16400_v55, %v16400_v55  ;;  %v8271_v57 = vadd.f32 1e-05, %v15966_v35  ;;  %v8603_v35 = vadd.f32 1e-05, %v16064_v44 }
0x1003   : > { %v9804_v19 = vpop.permute.xlu1 %9803  ;;  %v9830_v52 = vadd.f32 %v9822_v30, %v9821_v16 }
0x1004   : > { %v16411_v63 = vsub.f32 %v16337_v20, %v9804_v19  ;;  %v16414_v2 = vsub.f32 %v16339_v39, %v9804_v19  ;;  %v9827_v25 = vadd.f32 %v9820_v18, %v9819_v60  ;;  %13807 = vrsqrt.f32 %v8271_v57 }
0x1005   : > { %9831 = vadd.xlane.f32.xlu1 %v9830_v52  ;;  %v8598_v18 = vadd.f32 1e-05, %v16066_v49  ;;  %v8925_v57 = vadd.f32 1e-05, %v16166_v37  ;;  %v8613_v49 = vadd.f32 1e-05, %v16068_v21 }
0x1006   : > { %9828 = vadd.xlane.f32.xlu0 %v9827_v25  ;;  %v9823_v11 = vmul.f32 %v16411_v63, %v16411_v63  ;;  %v9824_v22 = vmul.f32 %v16414_v2, %v16414_v2  ;;  %v8281_v25 = vadd.f32 1e-05, %v15970_v26  ;;  %v8940_v37 = vadd.f32 1e-05, %v16168_v51 }
0x1007   : > { %v9809_v55 = vpop.permute.xlu1 %9808  ;;  %13809 = vrsqrt.f32 %v8598_v18  ;;  %v9252_v21 = vadd.f32 1e-05, %v16271_v4  ;;  %v9267_v51 = vadd.f32 1e-05, %v16273_v13  ;;  %v9579_v4 = vadd.f32 1e-05, %v16386_v46 }
0x1008   : > { %v16422_v16 = vsub.f32 %v16347_v10, %v9809_v55  ;;  %v16425_v20 = vsub.f32 %v16349_v3, %v9809_v55  ;;  %v9833_v39 = vadd.f32 %v9824_v22, %v9823_v11  ;;  %13811 = vrsqrt.f32 %v8603_v35 }
0x1009   : > { %v8930_v10 = vadd.f32 1e-05, %v16164_v50  ;;  %v8276_v22 = vadd.f32 1e-05, %v15964_v36  ;;  %v8286_v55 = vadd.f32 1e-05, %v15968_v6 }
0x100a   : > { %9834 = vadd.xlane.f32.xlu0 %v9833_v39  ;;  %v9825_v30 = vmul.f32 %v16422_v16, %v16422_v16  ;;  %v9826_v60 = vmul.f32 %v16425_v20, %v16425_v20  ;;  %v9257_v36 = vadd.f32 1e-05, %v16269_v41  ;;  %v8608_v6 = vadd.f32 1e-05, %v16070_v24 }
0x100b   : > { %13813 = vrsqrt.f32 %v8930_v10 }
0x100c   : > { %v9836_v19 = vadd.f32 %v9826_v60, %v9825_v30  ;;  %13815 = vrsqrt.f32 %v8276_v22  ;;  %v9584_v30 = vadd.f32 1e-05, %v16384_v7  ;;  %v8935_v60 = vadd.f32 1e-05, %v16170_v53 }
0x100d   : > { %13817 = vrsqrt.f32 %v8286_v55  ;;  %v9594_v7 = vadd.f32 1e-05, %v16388_v12  ;;  %v9262_v53 = vadd.f32 1e-05, %v16275_v8 }
0x100e   : > { %9837 = vadd.xlane.f32.xlu0 %v9836_v19  ;;  %v13808_v3 = vpop.eup %13807  ;;  %13819 = vrsqrt.f32 %v8925_v57 }
0x100f   : > { %13821 = vrsqrt.f32 %v8613_v49  ;;  %v9964_v49 = vld [vmem:[%s16610_s4] sm:$0xff] }
0x1010   : > { %13823 = vrsqrt.f32 %v8281_v25 }
0x1011   : > { %v13810_v52 = vpop.eup %13809  ;;  %13825 = vrsqrt.f32 %v9257_v36 }
0x1012   : > { %v13812_v44 = vpop.eup %13811  ;;  %13827 = vrsqrt.f32 %v8608_v6 }
0x1013   : > { %13829 = vrsqrt.f32 %v8940_v37 }
0x1014   : > { %13831 = vrsqrt.f32 %v9252_v21 }
0x1015   : > { %v13814_v50 = vpop.eup %13813  ;;  %13833 = vrsqrt.f32 %v9584_v30 }
0x1016   : > { %8295 = vperm.xlu1 %12528, %v13808_v3   ;;  %v13816_v11 = vpop.eup %13815  ;;  %13835 = vrsqrt.f32 %v8935_v60  ;;  %v9589_v3 = vadd.f32 1e-05, %v16390_v47  ;;  %v9997_v47 = vld [vmem:[%s16611_s5 + $0x8] sm:$0xff] }
0x1017   : > { %v13818_v39 = vpop.eup %13817  ;;  %13837 = vrsqrt.f32 %v9267_v51 }
0x1018   : > { %v13820_v26 = vpop.eup %13819  ;;  %13839 = vrsqrt.f32 %v9579_v4 }
0x1019   : > { %v13822_v41 = vpop.eup %13821  ;;  %13841 = vrsqrt.f32 %v9594_v7  ;;  %v9999_v7 = vld [vmem:[%s16611_s5 + $0x18] sm:$0xff] }
0x101a   : > { %8622 = vperm.xlu1 %12528, %v13810_v52   ;;  %v13824_v24 = vpop.eup %13823  ;;  %13843 = vrsqrt.f32 %v9262_v53  ;;  %v9965_v52 = vld [vmem:[%s16610_s4 + $0x8] sm:$0xff] }
0x101b   : > { %v13826_v18 = vpop.eup %13825  ;;  %13845 = vrsqrt.f32 %v9589_v3 }
0x101c   : > { %v13828_v19 = vpop.eup %13827 }
0x101d   : > { %v13830_v35 = vpop.eup %13829 }
0x101e   : > { %8627 = vperm.xlu1 %12528, %v13812_v44   ;;  %v13832_v10 = vpop.eup %13831  ;;  %v9996_v44 = vld [vmem:[%s16611_s5] sm:$0xff] }
0x101f   : > { %v13834_v13 = vpop.eup %13833 }
0x1020   : > { %v13836_v46 = vpop.eup %13835 }
0x1021   : > { %v13838_v22 = vpop.eup %13837 }
0x1022   : > { %8954 = vperm.xlu1 %12528, %v13814_v50   ;;  %v13840_v12 = vpop.eup %13839 }
0x1023   : > { %v13842_v55 = vpop.eup %13841 }
0x1024   : > { %8300 = vperm.xlu0 %12527, %v13816_v11   ;;  %v13844_v8 = vpop.eup %13843 }
0x1025   : > { %v13846_v57 = vpop.eup %13845 }
0x1026   : > { %8310 = vperm.xlu1 %12528, %v13818_v39  }
0x1028   : > { %8949 = vperm.xlu0 %12527, %v13820_v26  }
0x102a   : > { %8637 = vperm.xlu1 %12528, %v13822_v41  }
0x102c   : > { %8305 = vperm.xlu0 %12527, %v13824_v24  }
0x102e   : > { %9281 = vperm.xlu1 %12528, %v13826_v18  }
0x1030   : > { %8632 = vperm.xlu0 %12527, %v13828_v19   ;;  %v9966_v19 = vld [vmem:[%s16610_s4 + $0x10] sm:$0xff] }
0x1032   : > { %8964 = vperm.xlu1 %12528, %v13830_v35   ;;  %v9998_v35 = vld [vmem:[%s16611_s5 + $0x10] sm:$0xff] }
0x1034   : > { %9276 = vperm.xlu0 %12527, %v13832_v10  }
0x1036   : > { %9608 = vperm.xlu1 %12528, %v13834_v13  }
0x1038   : > { %8959 = vperm.xlu0 %12527, %v13836_v46  }
0x103a   : > { %9291 = vperm.xlu1 %12528, %v13838_v22  }
0x103c   : > { %9603 = vperm.xlu0 %12527, %v13840_v12  }
0x103e   : > { %9618 = vperm.xlu1 %12528, %v13842_v55  }
0x1040   : > { %9286 = vperm.xlu0 %12527, %v13844_v8  }
0x1042   : > { %9975 = vperm.xlu1 %12528, %v9965_v52  }
0x1044   : > { %9613 = vperm.xlu0 %12527, %v13846_v57  }
0x1046   : > { %10007 = vperm.xlu1 %12528, %v9997_v47  }
0x1048   : > { %9970 = vperm.xlu0 %12527, %v9964_v49  }
0x104c   : > { %10002 = vperm.xlu0 %12527, %v9996_v44  }
0x1092   : > { %v9832_v25 = vpop.xlane.xlu1 %9831 }
0x1093   : > { %v9829_v36 = vpop.xlane.xlu0 %9828 }
0x1094   : > { %v11747_v50 = vpack.c.bf16 %v9832_v25, %v9829_v36 }
0x1096   : > { %11748 = vmatprep.subr.bf16.mxu1 %v11747_v50  ;;  %v8296_v53 = vpop.permute.xlu1 %8295 }
0x1097   : > { %v9835_v6 = vpop.xlane.xlu0 %9834  ;;  %11750 = vmatpush3.bf16.msra.mxu1 %v11747_v50 }
0x109a   : > { %v8623_v10 = vpop.permute.xlu1 %8622 }
0x109b   : > { %v9838_v11 = vpop.xlane.xlu0 %9837 }
0x109c   : > { %v11751_v37 = vpack.c.bf16 %v9838_v11, %v9835_v6  ;;  %v16658_v11 = vld [vmem:[#allocation2_spill] sm:$0xff] }
0x109e   : > { %11752 = vmatprep.subr.bf16.mxu1 %v11751_v37  ;;  %v8628_v13 = vpop.permute.xlu1 %8627 }
0x109f   : > { %11754 = vmatpush3.bf16.msra.mxu1 %v11751_v37 }
0x10a2   : > { %11635 = vmatmul.mubr.msk.f32.vlgmr.msra.gmra.mrb[112].mxu1 %vm5502_vm0, %v16356_v9  ;;  %v8955_v46 = vpop.permute.xlu1 %8954 }
0x10a3   : > { %11637 = vmatprep.mubr.msk.f32.mxu1 %vm5502_vm0, %v16363_v38  ;;  %v8301_v3 = vpop.permute.xlu0 %8300 }
0x10a4   : > { %v8315_v37 = vmul.f32 %v8301_v3, %v16658_v11  ;;  %v16663_v11 = vld [vmem:[#allocation9_spill] sm:$0xff] }
0x10a6   : > { %11638 = vmatmul.mubr.msk.f32.gmra.mrb[114].mxu1 %vm5502_vm0, %v16370_v62  ;;  %v9967_v62 = vld [vmem:[%s16610_s4 + $0x18] sm:$0xff]  ;;  %v8311_v12 = vpop.permute.xlu1 %8310 }
0x10a7   : > { %v8950_v22 = vpop.permute.xlu0 %8949 }
0x10aa   : > { %v8638_v8 = vpop.permute.xlu1 %8637 }
0x10ab   : > { %v8306_v55 = vpop.permute.xlu0 %8305 }
0x10ae   : > { %v9282_v57 = vpop.permute.xlu1 %9281 }
0x10af   : > { %v8633_v52 = vpop.permute.xlu0 %8632 }
0x10b2   : > { %v8965_v49 = vpop.permute.xlu1 %8964 }
0x10b3   : > { %v9277_v47 = vpop.permute.xlu0 %9276 }
0x10b6   : > { %v9609_v25 = vpop.permute.xlu1 %9608 }
0x10b7   : > { %v8960_v44 = vpop.permute.xlu0 %8959 }
0x10ba   : > { %v9292_v50 = vpop.permute.xlu1 %9291 }
0x10bb   : > { %v9604_v36 = vpop.permute.xlu0 %9603 }
0x10bf   : > { %v9287_v6 = vpop.permute.xlu0 %9286 }
0x1175   : > { %v11636_v39 = vpop.f32.mrb[112].mxu1 }
0x1176   : > { %v9911_v21 = vadd.f32 1e-05, %v11636_v39  ;;  %v9905_v26 = vpop.f32.mrb[113].mxu1  ;;  %v16659_v39 = vld [vmem:[#allocation3_spill] sm:$0xff] }
0x1177   : > { %v9906_v30 = vadd.f32 1e-05, %v9905_v26  ;;  %v16482_v26 = vpop.permute.xlu1 %9618 }
0x1178   : > { %13847 = vrsqrt.f32 %v9911_v21  ;;  %v8316_v21 = vmul.f32 %v8301_v3, %v16659_v39  ;;  %v8646_v39 = vmul.f32 %v8638_v8, %v16663_v11 }
0x1179   : > { %13849 = vrsqrt.f32 %v9906_v30  ;;  %v11639_v41 = vpop.f32.mrb[114].mxu1  ;;  %v8640_v30 = vmul.f32 %v8623_v10, %v15989_v28  ;;  %v8969_v28 = vmul.f32 %v8955_v46, %v16084_v17 }
0x117a   : > { %v9921_v60 = vadd.f32 1e-05, %v11639_v41  ;;  %v9915_v24 = vpop.f32.mrb[115].mxu1  ;;  %v8641_v41 = vmul.f32 %v8623_v10, %v15992_v40  ;;  %v8970_v40 = vmul.f32 %v8955_v46, %v16086_v42  ;;  %v16665_v46 = vld [vmem:[#allocation7_spill] sm:$0xff] }
0x117b   : > { %v9916_v51 = vadd.f32 1e-05, %v9915_v24  ;;  %v8643_v24 = vmul.f32 %v8628_v13, %v15986_v5  ;;  %v16662_v5 = vld [vmem:[#allocation6_spill] sm:$0xff] }
0x117c   : > { %13851 = vrsqrt.f32 %v9921_v60  ;;  %v8642_v60 = vmul.f32 %v8628_v13, %v15984_v23  ;;  %v16661_v23 = vld [vmem:[#allocation5_spill] sm:$0xff]  ;;  %v8320_v13 = vmul.f32 %v8311_v12, %v16662_v5  ;;  %v16672_v5 = vld [vmem:[#allocation16_spill] sm:$0xff] }
0x117d   : > { %13853 = vrsqrt.f32 %v9916_v51  ;;  %v9614_v51 = vpop.permute.xlu0 %9613  ;;  %v8319_v10 = vmul.f32 %v8311_v12, %v16661_v23  ;;  %v16671_v23 = vld [vmem:[#allocation15_spill] sm:$0xff] }
0x1182   : > { %v13848_v18 = vpop.eup %13847 }
0x1183   : > { %v13850_v9 = vpop.eup %13849  ;;  %9935 = vperm.xlu1 %12528, %v13848_v18   ;;  %v16660_v18 = vld [vmem:[#allocation4_spill] sm:$0xff] }
0x1184   : > { %9930 = vperm.xlu0 %12527, %v13850_v9   ;;  %v8313_v9 = vmul.f32 %v8296_v53, %v16660_v18  ;;  %v16664_v18 = vld [vmem:[#allocation10_spill] sm:$0xff] }
0x1186   : > { %v13852_v38 = vpop.eup %13851 }
0x1187   : > { %v13854_v4 = vpop.eup %13853  ;;  %9945 = vperm.xlu1 %12528, %v13852_v38   ;;  %v8314_v38 = vmul.f32 %v8296_v53, %v15892_v48  ;;  %v8647_v48 = vmul.f32 %v8638_v8, %v16664_v18  ;;  %v16498_v53 = vpop.permute.xlu1 %9975 }
0x1188   : > { %9940 = vperm.xlu0 %12527, %v13854_v4   ;;  %v8650_v4 = vadd.f32 %v8642_v60, %v8315_v37  ;;  %v16667_v60 = vld [vmem:[#allocation11_spill] sm:$0xff] }
0x1189   : > { %v8649_v3 = vadd.f32 %v8641_v41, %v8314_v38  ;;  %v16666_v41 = vld [vmem:[#allocation8_spill] sm:$0xff]  ;;  %v8973_v38 = vmul.f32 %v8965_v49, %v16105_v27  ;;  %v9300_v27 = vmul.f32 %v9292_v50, %v16205_v59 }
0x118a   : > { %v8977_v37 = vadd.f32 %v8969_v28, %v8650_v4  ;;  %v8318_v12 = vmul.f32 %v8306_v55, %v16666_v41  ;;  %v16669_v4 = vld [vmem:[#allocation13_spill] sm:$0xff]  ;;  %v8654_v28 = vadd.f32 %v8646_v39, %v8319_v10 }
0x118b   : > { %9985 = vperm.xlu1 %12528, %v9967_v62   ;;  %v8651_v62 = vadd.f32 %v8643_v24, %v8316_v21  ;;  %v16502_v21 = vpop.permute.xlu0 %9970  ;;  %v8644_v24 = vmul.f32 %v8633_v52, %v16667_v60  ;;  %v10008_v10 = vpop.permute.xlu1 %10007  ;;  %v16675_v60 = vld [vmem:[#allocation21_spill] sm:$0xff] }
0x118c   : > { %9980 = vperm.xlu0 %12527, %v9966_v19   ;;  %v8967_v19 = vmul.f32 %v8950_v22, %v16089_v29 }
0x118d   : > { %v8978_v29 = vadd.f32 %v8970_v40, %v8651_v62  ;;  %v8974_v62 = vmul.f32 %v8965_v49, %v16669_v4  ;;  %v9301_v49 = vmul.f32 %v9292_v50, %v16672_v5  ;;  %v16676_v4 = vld [vmem:[#allocation18_spill] sm:$0xff] }
0x118f   : > { %10017 = vperm.xlu1 %12528, %v9999_v7   ;;  %v8968_v7 = vmul.f32 %v8950_v22, %v16092_v31  ;;  %v9296_v31 = vmul.f32 %v9282_v57, %v16184_v43  ;;  %v9297_v22 = vmul.f32 %v9282_v57, %v16186_v34  ;;  %v8655_v43 = vadd.f32 %v8647_v48, %v8320_v13 }
0x1190   : > { %10012 = vperm.xlu0 %12527, %v9998_v35   ;;  %v8648_v35 = vadd.f32 %v8640_v30, %v8313_v9  ;;  %v8317_v30 = vmul.f32 %v8306_v55, %v16665_v46  ;;  %v16668_v9 = vld [vmem:[#allocation12_spill] sm:$0xff]  ;;  %v9294_v34 = vmul.f32 %v9277_v47, %v16189_v61  ;;  %v9295_v57 = vmul.f32 %v9277_v47, %v16192_v15  ;;  %v10003_v15 = vpop.permute.xlu0 %10002 }
0x1191   : > { %v8976_v42 = vadd.f32 %v8968_v7, %v8649_v3  ;;  %v8645_v8 = vmul.f32 %v8633_v52, %v16668_v9  ;;  %v9305_v7 = vadd.f32 %v9297_v22, %v8978_v29  ;;  %v9624_v55 = vmul.f32 %v9609_v25, %v16291_v58  ;;  %v16670_v3 = vld [vmem:[#allocation14_spill] sm:$0xff] }
0x1192   : > { %v8975_v17 = vadd.f32 %v8967_v19, %v8648_v35  ;;  %v9304_v19 = vadd.f32 %v9296_v31, %v8977_v37  ;;  %v9623_v35 = vmul.f32 %v9609_v25, %v16289_v56  ;;  %v8971_v40 = vmul.f32 %v8960_v44, %v16670_v3  ;;  %v16673_v37 = vld [vmem:[#allocation17_spill] sm:$0xff] }
0x1193   : > { %v8972_v52 = vmul.f32 %v8960_v44, %v16671_v23  ;;  %v8652_v13 = vadd.f32 %v8644_v24, %v8317_v30  ;;  %v8653_v11 = vadd.f32 %v8645_v8, %v8318_v12  ;;  %v8981_v61 = vadd.f32 %v8973_v38, %v8654_v28  ;;  %v16674_v12 = vld [vmem:[#allocation20_spill] sm:$0xff] }
0x1194   : > { %v8982_v39 = vadd.f32 %v8974_v62, %v8655_v43  ;;  %v9302_v47 = vadd.f32 %v9294_v34, %v8975_v17  ;;  %v9303_v18 = vadd.f32 %v9295_v57, %v8976_v42  ;;  %v9621_v56 = vmul.f32 %v9604_v36, %v16294_v14  ;;  %v16677_v62 = vld [vmem:[#allocation19_spill] sm:$0xff] }
0x1195   : > { %v9622_v58 = vmul.f32 %v9604_v36, %v16297_v32  ;;  %v9631_v25 = vadd.f32 %v9623_v35, %v9304_v19  ;;  %v9632_v48 = vadd.f32 %v9624_v55, %v9305_v7  ;;  %v9298_v44 = vmul.f32 %v9287_v6, %v16221_v1 }
0x1196   : > { %v9299_v59 = vmul.f32 %v9287_v6, %v16673_v37  ;;  %v8979_v29 = vadd.f32 %v8971_v40, %v8652_v13  ;;  %v8980_v50 = vadd.f32 %v8972_v52, %v8653_v11  ;;  %v9308_v31 = vadd.f32 %v9300_v27, %v8981_v61 }
0x1197   : > { %v9309_v22 = vadd.f32 %v9301_v49, %v8982_v39  ;;  %v9625_v30 = vmul.f32 %v9614_v51, %v16326_v54  ;;  %v9626_v17 = vmul.f32 %v9614_v51, %v16329_v45  ;;  %v9629_v36 = vadd.f32 %v9621_v56, %v9302_v47 }
0x1198   : > { %v9630_v41 = vadd.f32 %v9622_v58, %v9303_v18  ;;  %v9306_v24 = vadd.f32 %v9298_v44, %v8979_v29  ;;  %v9307_v9 = vadd.f32 %v9299_v59, %v8980_v50  ;;  %v9627_v54 = vmul.f32 %v16482_v26, %v16676_v4 }
0x1199   : > { %v9628_v45 = vmul.f32 %v16482_v26, %v16677_v62 }
0x119a   : > { %v9633_v28 = vadd.f32 %v9625_v30, %v9306_v24  ;;  %v9634_v43 = vadd.f32 %v9626_v17, %v9307_v9  ;;  %v9635_v27 = vadd.f32 %v9627_v54, %v9308_v31  ;;  %v13886_v30 = vmov 0.0  }
0x119b   : > { %v9636_v5 = vadd.f32 %v9628_v45, %v9309_v22  ;;  %11648 = vmatprep.mubr.msk.f32.mxu1 %vm13885_vm4, %v13886_v30  ;;  %v10318_v30 = vld [vmem:[%s347_s16 + $0x18] sm:$0xff] }
0x1202   : > { %v9936_v46 = vpop.permute.xlu1 %9935 }
0x1203   : > { %v9950_v42 = vmul.f32 %v9936_v46, %v16392_v33  ;;  %v9951_v14 = vmul.f32 %v9936_v46, %v16394_v0  ;;  %v9931_v32 = vpop.permute.xlu0 %9930  ;;  %v13884_v46 = vmov 0.0|0.0  }
0x1204   : > { %v9948_v1 = vmul.f32 %v9931_v32, %v16674_v12  ;;  %v9949_v6 = vmul.f32 %v9931_v32, %v16675_v60  ;;  %11755 = vmatprep.subr.bf16.mxu1 %v13884_v46 }
0x1205   : > { %v9958_v8 = vadd.f32 %v9950_v42, %v9631_v25  ;;  %v9959_v38 = vadd.f32 %v9951_v14, %v9632_v48 }
0x1206   : > { %v9956_v33 = vadd.f32 %v9948_v1, %v9629_v36  ;;  %v9957_v51 = vadd.f32 %v9949_v6, %v9630_v41  ;;  %v9946_v0 = vpop.permute.xlu1 %9945 }
0x1207   : > { %v9990_v34 = vmul.f32 %v16498_v53, %v9958_v8  ;;  %v9991_v57 = vmul.f32 %v16498_v53, %v9959_v38  ;;  %v9941_v19 = vpop.permute.xlu0 %9940  ;;  %v9954_v23 = vmul.f32 %v9946_v0, %v16422_v16  ;;  %v9955_v52 = vmul.f32 %v9946_v0, %v16425_v20 }
0x1208   : > { %v9988_v7 = vmul.f32 %v16502_v21, %v9956_v33  ;;  %v9989_v35 = vmul.f32 %v16502_v21, %v9957_v51  ;;  %v9952_v55 = vmul.f32 %v9941_v19, %v16411_v63  ;;  %v9953_v3 = vmul.f32 %v9941_v19, %v16414_v2  ;;  %v10062_v33 = vld [vmem:[%s16613_s7] sm:$0x3]  ;;  %v10140_v19 = vld [vmem:[%s16614_s8 + $0x18] sm:$0xff] }
0x1209   : > { %v16538_v40 = vadd.f32 %v10008_v10, %v9990_v34  ;;  %v16540_v26 = vadd.f32 %v10008_v10, %v9991_v57  ;;  %v9962_v61 = vadd.f32 %v9954_v23, %v9635_v27  ;;  %v9963_v16 = vadd.f32 %v9955_v52, %v9636_v5  ;;  %v10137_v51 = vld [vmem:[%s16614_s8] sm:$0xff]  ;;  %v10138_v34 = vld [vmem:[%s16614_s8 + $0x8] sm:$0xff]  ;;  %v10139_v57 = vld [vmem:[%s16614_s8 + $0x10] sm:$0xff] }
0x120a   : > { %v9986_v53 = vpop.permute.xlu1 %9985  ;;  %v9960_v49 = vadd.f32 %v9952_v55, %v9633_v28  ;;  %v9961_v13 = vadd.f32 %v9953_v3, %v9634_v43  ;;  %v16544_v11 = vadd.f32 %v10003_v15, %v9988_v7  ;;  %v16546_v21 = vadd.f32 %v10003_v15, %v9989_v35 }
0x120b   : > { %v9981_v63 = vpop.permute.xlu0 %9980  ;;  %v10048_v2 = vmax.f32 %v16538_v40, %v16540_v26  ;;  %v10031_v10 = vadd.f32 %v16540_v26, %v16538_v40  ;;  %v9994_v25 = vmul.f32 %v9986_v53, %v9962_v61  ;;  %v9995_v48 = vmul.f32 %v9986_v53, %v9963_v16 }
0x120c   : > { %v9992_v20 = vmul.f32 %v9981_v63, %v9960_v49  ;;  %v9993_v39 = vmul.f32 %v9981_v63, %v9961_v13  ;;  %v10028_v18 = vadd.f32 %v16546_v21, %v16544_v11  ;;  %v10045_v29 = vmax.f32 %v16544_v11, %v16546_v21 }
0x120d   : > { %10049 = vmax.xlane.f32.xlu0 %v10048_v2  ;;  %10032 = vadd.xlane.f32.xlu1 %v10031_v10 }
0x120e   : > { %v10018_v56 = vpop.permute.xlu1 %10017 }
0x120f   : > { %v10013_v47 = vpop.permute.xlu0 %10012  ;;  %v16560_v37 = vadd.f32 %v10018_v56, %v9994_v25  ;;  %v16562_v59 = vadd.f32 %v10018_v56, %v9995_v48 }
0x1210   : > { %v16554_v15 = vadd.f32 %v10013_v47, %v9992_v20  ;;  %v16556_v58 = vadd.f32 %v10013_v47, %v9993_v39 }
0x1211   : > { %10029 = vadd.xlane.f32.xlu0 %v10028_v18  ;;  %v10037_v31 = vadd.f32 %v16562_v59, %v16560_v37  ;;  %v10054_v22 = vmax.f32 %v16560_v37, %v16562_v59 }
0x1212   : > { %v10034_v44 = vadd.f32 %v16556_v58, %v16554_v15  ;;  %v10051_v50 = vmax.f32 %v16554_v15, %v16556_v58 }
0x1214   : > { %10035 = vadd.xlane.f32.xlu1 %v10034_v44 }
0x1215   : > { %10046 = vmax.xlane.f32.xlu0 %v10045_v29 }
0x1218   : > { %10052 = vmax.xlane.f32.xlu1 %v10051_v50 }
0x1219   : > { %10038 = vadd.xlane.f32.xlu0 %v10037_v31 }
0x121d   : > { %10055 = vmax.xlane.f32.xlu0 %v10054_v22 }
0x129a   : > { %v10050_v17 = vpop.xlane.xlu0 %10049  ;;  %v10033_v42 = vpop.xlane.xlu1 %10032 }
0x129b   : > { %v10042_v32 = vmul.f32 0.00390625, %v10033_v42 }
0x129d   : > { %v10059_v60 = vsel %vm10057_vm5, %v10042_v32, %v10050_v17  ;;  %v10315_v32 = vld [vmem:[%s347_s16] sm:$0xff] }
0x129e   : > { %v10030_v14 = vpop.xlane.xlu0 %10029 }
0x129f   : > { %v10041_v36 = vmul.f32 0.00390625, %v10030_v14 }
0x12a1   : > { %v10036_v41 = vpop.xlane.xlu1 %10035 }
0x12a2   : > { %v10047_v12 = vpop.xlane.xlu0 %10046  ;;  %v10043_v8 = vmul.f32 0.00390625, %v10036_v41 }
0x12a3   : > { %v10058_v1 = vsel %vm10057_vm5, %v10041_v36, %v10047_v12  ;;  %v10316_v36 = vld [vmem:[%s347_s16 + $0x8] sm:$0xff] }
0x12a4   : > { %v11756_v6 = vpack.c.bf16 %v10059_v60, %v10058_v1 }
0x12a5   : > { %v10053_v9 = vpop.xlane.xlu1 %10052 }
0x12a6   : > { %v10039_v24 = vpop.xlane.xlu0 %10038  ;;  %11757 = vmatpush3.bf16.msra.mxu1 %v11756_v6  ;;  %v10060_v54 = vsel %vm10057_vm5, %v10043_v8, %v10053_v9  ;;  %v10320_v8 = vld [vmem:[%s347_s16 + $0x28] sm:$0xff] }
0x12a7   : > { %11758 = vmatprep.subr.bf16.mxu1 %v13884_v46  ;;  %v10044_v38 = vmul.f32 0.00390625, %v10039_v24  ;;  %v10317_v46 = vld [vmem:[%s347_s16 + $0x10] sm:$0xff] }
0x12aa   : > { %v10056_v4 = vpop.xlane.xlu0 %10055 }
0x12ab   : > { %v10061_v62 = vsel %vm10057_vm5, %v10044_v38, %v10056_v4 }
0x12ac   : > { %v11759_v45 = vpack.c.bf16 %v10061_v62, %v10060_v54 }
0x12ae   : > { %11760 = vmatpush3.bf16.msra.mxu1 %v11759_v45  ;;  %v10322_v45 = vld [vmem:[%s347_s16 + $0x38] sm:$0xff] }
0x12b1   : > { %11649 = vmatmul.mubr.msk.f32.vlgmr.msra.gmra.mrb[116].mxu1 %vm5502_vm0, %v10062_v33 }
0x12b2   : > { %11653 = vmatprep.mubr.msk.f32.mxu1 %vm10141_vm6, %v10137_v51 }
0x1384   : > { %v10132_v0 = vpop.f32.mrb[116].mxu1 }
0x1385   : > { %v10136_v28 = vmax.f32 %v10132_v0, 0.0  ;;  %v11650_v43 = vpop.f32.mrb[117].mxu1 }
0x1387   : > { %11651 = vmatprep.subr.msk.mxu1 %vm10154_vm7, %v10136_v28 }
0x1388   : > { %11652 = vmatpush3.msk.msra.mxu1 %vm10154_vm7, %v10136_v28 }
0x1389   : > { %11654 = vmatmul.mubr.msk.f32.vlgmr.msra.gmra.mrb[118].mxu1 %vm10141_vm6, %v10138_v34 }
0x138a   : > { %11656 = vmatprep.mubr.msk.f32.mxu1 %vm10141_vm6, %v10139_v57 }
0x138d   : > { %11657 = vmatmul.mubr.msk.f32.gmra.mrb[120].mxu1 %vm10141_vm6, %v10140_v19 }
0x145c   : > { %v11655_v7 = vpop.f32.mrb[118].mxu1 }
0x145d   : > { %10249 = vrot.lane.b32.xlu0 %v11655_v7, %s13887_s12  ;;  %v10224_v35 = vpop.f32.mrb[119].mxu1 }
0x145e   : > { %10247 = vrot.lane.b32.xlu1 %v10224_v35, %s13887_s12 }
0x1460   : > { %v11658_v55 = vpop.f32.mrb[120].mxu1 }
0x1461   : > { %v10234_v3 = vpop.f32.mrb[121].mxu1 }
0x1462   : > { %10251 = vrot.lane.b32.xlu1 %v10234_v3, %s13887_s12 }
0x1466   : > { %10253 = vrot.lane.b32.xlu1 %v11658_v55, %s13887_s12 }
0x14cf   : > { %v10250_v23 = vpop.permute.xlu0 %10249 }
0x14d0   : > { %v10260_v52 = vadd.f32 %v11655_v7, %v10250_v23  ;;  %v10248_v27 = vpop.permute.xlu1 %10247 }
0x14d1   : > { %v10259_v5 = vadd.f32 %v10248_v27, %v10224_v35 }
0x14d2   : > { %v11359_v53 = vmul.f32 -1.442695, %v10260_v52 }
0x14d3   : > { %v11358_v49 = vmul.f32 -1.442695, %v10259_v5 }
0x14d4   : > { %13855 = vpow2.f32 %v11359_v53  ;;  %v10252_v13 = vpop.permute.xlu1 %10251 }
0x14d5   : > { %13857 = vpow2.f32 %v11358_v49  ;;  %v10261_v63 = vadd.f32 %v10252_v13, %v10234_v3 }
0x14d7   : > { %v11360_v2 = vmul.f32 -1.442695, %v10261_v63 }
0x14d8   : > { %v10254_v10 = vpop.permute.xlu1 %10253 }
0x14d9   : > { %13859 = vpow2.f32 %v11360_v2  ;;  %v10262_v61 = vadd.f32 %v11658_v55, %v10254_v10 }
0x14db   : > { %v11361_v16 = vmul.f32 -1.442695, %v10262_v61 }
0x14dd   : > { %13861 = vpow2.f32 %v11361_v16 }
0x14de   : > { %v13856_v20 = vpop.eup %13855 }
0x14df   : > { %v13858_v39 = vpop.eup %13857  ;;  %v10276_v47 = vadd.f32 1.0, %v13856_v20 }
0x14e0   : > { %v10275_v18 = vadd.f32 1.0, %v13858_v39 }
0x14e1   : > { %13863 = vrcp.f32 %v10276_v47 }
0x14e2   : > { %13865 = vrcp.f32 %v10275_v18 }
0x14e3   : > { %v13860_v56 = vpop.eup %13859 }
0x14e4   : > { %v10277_v25 = vadd.f32 1.0, %v13860_v56 }
0x14e6   : > { %13867 = vrcp.f32 %v10277_v25 }
0x14e7   : > { %v13862_v48 = vpop.eup %13861 }
0x14e8   : > { %v10278_v44 = vadd.f32 1.0, %v13862_v48 }
0x14ea   : > { %13869 = vrcp.f32 %v10278_v44 }
0x14eb   : > { %v13864_v29 = vpop.eup %13863 }
0x14ec   : > { %v13866_v50 = vpop.eup %13865  ;;  %10294 = vperm.xlu1 %12528, %v13864_v29  }
0x14ed   : > { %10289 = vperm.xlu0 %12527, %v13866_v50  }
0x14f0   : > { %v13868_v31 = vpop.eup %13867 }
0x14f1   : > { %10299 = vperm.xlu0 %12527, %v13868_v31  }
0x14f4   : > { %v13870_v22 = vpop.eup %13869 }
0x14f5   : > { %10304 = vperm.xlu1 %12528, %v13870_v22  }
0x156b   : > { %v10295_v17 = vpop.permute.xlu1 %10294 }
0x156c   : > { %v10309_v42 = vmul.f32 %v10295_v17, %v16538_v40  ;;  %v10310_v14 = vmul.f32 %v10295_v17, %v16540_v26  ;;  %v10290_v41 = vpop.permute.xlu0 %10289  ;;  %v10319_v40 = vld [vmem:[%s347_s16 + $0x20] sm:$0xff] }
0x156d   : > { %v10307_v12 = vmul.f32 %v10290_v41, %v16544_v11  ;;  %v10308_v1 = vmul.f32 %v10290_v41, %v16546_v21  ;;  %v10321_v11 = vld [vmem:[%s347_s16 + $0x30] sm:$0xff] }
0x156e   : > { %v10325_v60 = vadd.f32 %v10317_v46, %v10309_v42  ;;  %v10326_v6 = vadd.f32 %v10318_v30, %v10310_v14 }
0x156f   : > { %v10323_v24 = vadd.f32 %v10315_v32, %v10307_v12  ;;  %v10324_v9 = vadd.f32 %v10316_v36, %v10308_v1 }
0x1570   : > { %10333 = vst [vmem:[%s352_s20 + $0x10] sm:$0xff] %v10325_v60  ;;  %10334 = vst [vmem:[%s352_s20 + $0x18] sm:$0xff] %v10326_v6  ;;  %v10300_v26 = vpop.permute.xlu0 %10299 }
0x1571   : > { %10331 = vst [vmem:[%s352_s20] sm:$0xff] %v10323_v24  ;;  %10332 = vst [vmem:[%s352_s20 + $0x8] sm:$0xff] %v10324_v9  ;;  %v10311_v38 = vmul.f32 %v10300_v26, %v16554_v15  ;;  %v10312_v4 = vmul.f32 %v10300_v26, %v16556_v58 }
0x1573   : > { %v10327_v54 = vadd.f32 %v10319_v40, %v10311_v38  ;;  %v10328_v62 = vadd.f32 %v10320_v8, %v10312_v4 }
0x1574   : > { %v10305_v21 = vpop.permute.xlu1 %10304 }
0x1575   : > { %10335 = vst [vmem:[%s352_s20 + $0x20] sm:$0xff] %v10327_v54  ;;  %10336 = vst [vmem:[%s352_s20 + $0x28] sm:$0xff] %v10328_v62  ;;  %v10313_v33 = vmul.f32 %v10305_v21, %v16560_v37  ;;  %v10314_v51 = vmul.f32 %v10305_v21, %v16562_v59 }
0x1577   : > { %v10329_v0 = vadd.f32 %v10321_v11, %v10313_v33  ;;  %v10330_v28 = vadd.f32 %v10322_v45, %v10314_v51 }
0x1579   : > { %10337 = vst [vmem:[%s352_s20 + $0x30] sm:$0xff] %v10329_v0  ;;  %10338 = vst [vmem:[%s352_s20 + $0x38] sm:$0xff] %v10330_v28 }
0x157a PF: > { %s19_s30 = sadd.s32 1, %s13881_s30  }
0x157b   : > { %p16_p4 = scmp.ge.s32.totalorder %s19_s30, 4  }
0x157d   :  { %18 = sbr.rel (!%p16_p4) target bundleno = 1 (0x1), region = 94 }

</bundles_post_ra>
